<compile_context>
chip_gen: v5e
topology: v5e:2x2
jax: 0.10.0
libtpu: 0.0.40
codegen_flags: <defaults>
</compile_context>

<pallas_src>
import jax
import jax.numpy as jnp
from jax.experimental import pallas as pl
from jax.experimental.pallas import tpu as pltpu


def _make_pool_conv_kernel(H, W):
    """MaxPool2d(3,1,1) + 1x1 Conv (no bias), fused, channels-first layout.

    x_ref : (Cin, H*W) f32   -- free reshape of the NCHW input
    w_ref : (Cout, Cin) f32  -- free reshape of the OIHW 1x1 weight
    o_ref : (Cout, H*W) f32  -- free reshape back to NCHW
    xsc   : (Cin, PADW) f32  -- -inf halo scratch for the shifted-window loads
    """
    HW = H * W

    def kernel(x_ref, w_ref, o_ref, xsc_ref):
        neg = -jnp.inf

        # Halo buffer: columns [W, W+HW) hold the activation, the rest -inf.
        xsc_ref[...] = jnp.full(xsc_ref.shape, neg, dtype=jnp.float32)
        x = x_ref[...]                                   # (Cin, HW)
        xsc_ref[:, pl.ds(W, HW)] = x

        # Lane masks for the intra-row (w) boundaries: p % W == 0 / == W-1,
        # built from a 2D iota + static equality comparisons (no integer mod).
        col = jax.lax.broadcasted_iota(jnp.int32, (1, HW), 1)
        is_w0 = col == 0
        is_wL = col == (W - 1)
        for h in range(1, H):
            is_w0 = jnp.logical_or(is_w0, col == h * W)
            is_wL = jnp.logical_or(is_wL, col == h * W + (W - 1))

        # Separable 3x3 max, pass 1: along w (lane shifts by +-1).
        left = jnp.where(is_w0, neg, xsc_ref[:, pl.ds(W - 1, HW)])
        right = jnp.where(is_wL, neg, xsc_ref[:, pl.ds(W + 1, HW)])
        rm = jnp.maximum(jnp.maximum(left, x), right)

        # Pass 2: along h (lane shifts by +-W). The -inf halo columns already
        # cover the h boundaries, so no extra masks are needed.
        xsc_ref[:, pl.ds(W, HW)] = rm
        up = xsc_ref[:, pl.ds(0, HW)]
        down = xsc_ref[:, pl.ds(2 * W, HW)]
        pooled = jnp.maximum(jnp.maximum(up, rm), down)  # (Cin, HW), finite

        # 1x1 conv == (Cout, Cin) @ (Cin, HW): bf16 inputs, f32 accumulation.
        o_ref[...] = jnp.dot(
            w_ref[...].astype(jnp.bfloat16),
            pooled.astype(jnp.bfloat16),
            preferred_element_type=jnp.float32,
        )

    return kernel


def maxpool3x3_conv1x1(x_nchw, weight_oihw):
    """x_nchw: (1, Cin, H, W) f32; weight_oihw: (Cout, Cin, 1, 1) f32.

    Returns (1, Cout, H, W) f32, matching
    Conv2d(Cin, Cout, 1, bias=False)(MaxPool2d(3, 1, 1, ceil_mode=True)(x)).
    """
    n, cin, H, W = x_nchw.shape
    assert n == 1, "kernel written for batch size 1 (as in the reference module)"
    cout, cin_w, kh, kw = weight_oihw.shape
    assert (cin_w, kh, kw) == (cin, 1, 1)

    HW = H * W
    padw = ((2 * W + HW) + 7) // 8 * 8  # halo scratch width (>= W + HW + W)

    # Metadata-only reshapes (no HBM data movement, no transposes):
    x2 = x_nchw.reshape(cin, HW)          # NCHW -> (Cin, H*W)
    w2 = weight_oihw.reshape(cout, cin)   # OIHW -> (Cout, Cin)

    out2 = pl.pallas_call(
        _make_pool_conv_kernel(H, W),
        out_shape=jax.ShapeDtypeStruct((cout, HW), jnp.float32),
        in_specs=[
            pl.BlockSpec(memory_space=pltpu.MemorySpace.VMEM),
            pl.BlockSpec(memory_space=pltpu.MemorySpace.VMEM),
        ],
        out_specs=pl.BlockSpec(memory_space=pltpu.MemorySpace.VMEM),
        scratch_shapes=[pltpu.VMEM((cin, padw), jnp.float32)],
        cost_estimate=pl.CostEstimate(
            flops=2 * cout * cin * HW + 8 * cin * HW,
            transcendentals=0,
            bytes_accessed=4 * (cin * HW + cout * cin + cout * HW),
        ),
    )(x2, w2)

    # (Cout, H*W) -> (1, Cout, H, W): metadata-only reshape.
    return out2.reshape(1, cout, H, W)


def _reference(x_nchw, weight_oihw):
    """Pure-JAX f32 reference (MaxPool2d(3,1,1) -> 1x1 conv, NCHW)."""
    _, cin, H, W = x_nchw.shape
    x = x_nchw[0]                                           # (Cin, H, W)
    xp = jnp.pad(x, ((0, 0), (1, 1), (1, 1)), constant_values=-jnp.inf)
    pooled = None
    for dy in range(3):
        for dx in range(3):
            win = xp[:, dy:dy + H, dx:dx + W]
            pooled = win if pooled is None else jnp.maximum(pooled, win)
    w = weight_oihw[:, :, 0, 0]                             # (Cout, Cin)
    out = jnp.einsum("oc,chw->ohw", w, pooled,
                     precision=jax.lax.Precision.HIGHEST)
    return out[None]


if __name__ == "__main__":
    key = jax.random.PRNGKey(0)
    k_x, k_w = jax.random.split(key)

    # Shapes from the module: x186 ~ (1, 832, 7, 7), Conv2d(832 -> 128, 1x1).
    CIN, COUT, H, W = 832, 128, 7, 7
    x = jax.random.normal(k_x, (1, CIN, H, W), dtype=jnp.float32)
    weight = jax.random.normal(k_w, (COUT, CIN, 1, 1), dtype=jnp.float32) * 0.02

    fwd = jax.jit(maxpool3x3_conv1x1)
    out = jax.block_until_ready(fwd(x, weight))

    ref = _reference(x, weight)
    assert out.shape == (1, COUT, H, W), out.shape
    assert bool(jnp.all(jnp.isfinite(out))), "non-finite values in output"
    # bf16 matmul inputs with f32 accumulation -> loosened tolerance.
    assert jnp.allclose(out, ref, atol=5e-2, rtol=5e-2), "mismatch vs reference"

    print("KERNEL_OK")
</pallas_src>

<mosaic_0001>
module attributes {stable_mosaic.version = 11 : i64} {
  func.func @kernel(%arg0: memref<832x49xf32, #tpu.memory_space<vmem>>, %arg1: memref<128x832xf32, #tpu.memory_space<vmem>>, %arg2: memref<128x49xf32, #tpu.memory_space<vmem>>, %arg3: memref<832x64xf32, #tpu.memory_space<vmem>>) attributes {dimension_semantics = [], scalar_prefetch = 0 : i64, scratch_operands = 1 : i64, tpu.core_type = #tpu.core_type<tc>} {
    %cst = arith.constant 0xFF800000 : f32
    %0 = vector.broadcast %cst : f32 to vector<832x64xf32>
    %c0 = arith.constant 0 : index
    %c0_0 = arith.constant 0 : index
    %1 = vector.load %arg3[%c0, %c0_0] : memref<832x64xf32, #tpu.memory_space<vmem>>, vector<832x64xf32>
    tpu.vector_store %arg3[%c0, %c0_0], %0 {strides = array<i32>} : memref<832x64xf32, #tpu.memory_space<vmem>>, vector<832x64xf32>,
    %c0_1 = arith.constant 0 : index
    %c0_2 = arith.constant 0 : index
    %2 = vector.load %arg0[%c0_1, %c0_2] : memref<832x49xf32, #tpu.memory_space<vmem>>, vector<832x49xf32>
    %c0_3 = arith.constant 0 : index
    %c7 = arith.constant 7 : index
    %3 = vector.load %arg3[%c0_3, %c7] : memref<832x64xf32, #tpu.memory_space<vmem>>, vector<832x49xf32>
    tpu.vector_store %arg3[%c0_3, %c7], %2 {strides = array<i32>} : memref<832x64xf32, #tpu.memory_space<vmem>>, vector<832x49xf32>,
    %4 = tpu.iota {dimensions = array<i32: 1>} : vector<1x49xi32>
    %c0_i32 = arith.constant 0 : i32
    %5 = vector.broadcast %c0_i32 : i32 to vector<1x49xi32>
    %6 = arith.cmpi eq, %4, %5 : vector<1x49xi32>
    %c6_i32 = arith.constant 6 : i32
    %7 = vector.broadcast %c6_i32 : i32 to vector<1x49xi32>
    %8 = arith.cmpi eq, %4, %7 : vector<1x49xi32>
    %c7_i32 = arith.constant 7 : i32
    %9 = vector.broadcast %c7_i32 : i32 to vector<1x49xi32>
    %10 = arith.cmpi eq, %4, %9 : vector<1x49xi32>
    %11 = arith.ori %6, %10 : vector<1x49xi1>
    %c13_i32 = arith.constant 13 : i32
    %12 = vector.broadcast %c13_i32 : i32 to vector<1x49xi32>
    %13 = arith.cmpi eq, %4, %12 : vector<1x49xi32>
    %14 = arith.ori %8, %13 : vector<1x49xi1>
    %c14_i32 = arith.constant 14 : i32
    %15 = vector.broadcast %c14_i32 : i32 to vector<1x49xi32>
    %16 = arith.cmpi eq, %4, %15 : vector<1x49xi32>
    %17 = arith.ori %11, %16 : vector<1x49xi1>
    %c20_i32 = arith.constant 20 : i32
    %18 = vector.broadcast %c20_i32 : i32 to vector<1x49xi32>
    %19 = arith.cmpi eq, %4, %18 : vector<1x49xi32>
    %20 = arith.ori %14, %19 : vector<1x49xi1>
    %c21_i32 = arith.constant 21 : i32
    %21 = vector.broadcast %c21_i32 : i32 to vector<1x49xi32>
    %22 = arith.cmpi eq, %4, %21 : vector<1x49xi32>
    %23 = arith.ori %17, %22 : vector<1x49xi1>
    %c27_i32 = arith.constant 27 : i32
    %24 = vector.broadcast %c27_i32 : i32 to vector<1x49xi32>
    %25 = arith.cmpi eq, %4, %24 : vector<1x49xi32>
    %26 = arith.ori %20, %25 : vector<1x49xi1>
    %c28_i32 = arith.constant 28 : i32
    %27 = vector.broadcast %c28_i32 : i32 to vector<1x49xi32>
    %28 = arith.cmpi eq, %4, %27 : vector<1x49xi32>
    %29 = arith.ori %23, %28 : vector<1x49xi1>
    %c34_i32 = arith.constant 34 : i32
    %30 = vector.broadcast %c34_i32 : i32 to vector<1x49xi32>
    %31 = arith.cmpi eq, %4, %30 : vector<1x49xi32>
    %32 = arith.ori %26, %31 : vector<1x49xi1>
    %c35_i32 = arith.constant 35 : i32
    %33 = vector.broadcast %c35_i32 : i32 to vector<1x49xi32>
    %34 = arith.cmpi eq, %4, %33 : vector<1x49xi32>
    %35 = arith.ori %29, %34 : vector<1x49xi1>
    %c41_i32 = arith.constant 41 : i32
    %36 = vector.broadcast %c41_i32 : i32 to vector<1x49xi32>
    %37 = arith.cmpi eq, %4, %36 : vector<1x49xi32>
    %38 = arith.ori %32, %37 : vector<1x49xi1>
    %c42_i32 = arith.constant 42 : i32
    %39 = vector.broadcast %c42_i32 : i32 to vector<1x49xi32>
    %40 = arith.cmpi eq, %4, %39 : vector<1x49xi32>
    %41 = arith.ori %35, %40 : vector<1x49xi1>
    %c48_i32 = arith.constant 48 : i32
    %42 = vector.broadcast %c48_i32 : i32 to vector<1x49xi32>
    %43 = arith.cmpi eq, %4, %42 : vector<1x49xi32>
    %44 = arith.ori %38, %43 : vector<1x49xi1>
    %c0_4 = arith.constant 0 : index
    %c6 = arith.constant 6 : index
    %45 = vector.load %arg3[%c0_4, %c6] : memref<832x64xf32, #tpu.memory_space<vmem>>, vector<832x49xf32>
    %cst_5 = arith.constant 0xFF800000 : f32
    %46 = vector.shape_cast %41 : vector<1x49xi1> to vector<1x49xi1>
    %47 = vector.broadcast %46 : vector<1x49xi1> to vector<832x49xi1>
    %48 = vector.broadcast %cst_5 : f32 to vector<832x49xf32>
    %49 = arith.select %47, %48, %45 : vector<832x49xi1>, vector<832x49xf32>
    %c0_6 = arith.constant 0 : index
    %c8 = arith.constant 8 : index
    %50 = vector.load %arg3[%c0_6, %c8] : memref<832x64xf32, #tpu.memory_space<vmem>>, vector<832x49xf32>
    %cst_7 = arith.constant 0xFF800000 : f32
    %51 = vector.shape_cast %44 : vector<1x49xi1> to vector<1x49xi1>
    %52 = vector.broadcast %51 : vector<1x49xi1> to vector<832x49xi1>
    %53 = vector.broadcast %cst_7 : f32 to vector<832x49xf32>
    %54 = arith.select %52, %53, %50 : vector<832x49xi1>, vector<832x49xf32>
    %55 = arith.maximumf %49, %2 : vector<832x49xf32>
    %56 = arith.maximumf %55, %54 : vector<832x49xf32>
    %c0_8 = arith.constant 0 : index
    %c7_9 = arith.constant 7 : index
    %57 = vector.load %arg3[%c0_8, %c7_9] : memref<832x64xf32, #tpu.memory_space<vmem>>, vector<832x49xf32>
    tpu.vector_store %arg3[%c0_8, %c7_9], %56 {strides = array<i32>} : memref<832x64xf32, #tpu.memory_space<vmem>>, vector<832x49xf32>,
    %c0_10 = arith.constant 0 : index
    %c0_11 = arith.constant 0 : index
    %58 = vector.load %arg3[%c0_10, %c0_11] : memref<832x64xf32, #tpu.memory_space<vmem>>, vector<832x49xf32>
    %c0_12 = arith.constant 0 : index
    %c14 = arith.constant 14 : index
    %59 = vector.load %arg3[%c0_12, %c14] : memref<832x64xf32, #tpu.memory_space<vmem>>, vector<832x49xf32>
    %60 = arith.maximumf %58, %56 : vector<832x49xf32>
    %61 = arith.maximumf %60, %59 : vector<832x49xf32>
    %c0_13 = arith.constant 0 : index
    %c0_14 = arith.constant 0 : index
    %62 = vector.load %arg1[%c0_13, %c0_14] : memref<128x832xf32, #tpu.memory_space<vmem>>, vector<128x832xf32>
    %63 = arith.truncf %62 : vector<128x832xf32> to vector<128x832xbf16>
    %64 = arith.truncf %61 : vector<832x49xf32> to vector<832x49xbf16>
    %cst_15 = arith.constant dense<0.000000e+00> : vector<128x49xf32>
    %65 = tpu.matmul %63, %64, %cst_15 {dimension_numbers = #tpu.dot_dimension_numbers<[1], [0], [0], [1], [0, 0, 1, 1], [], []>} : vector<128x832xbf16>, vector<832x49xbf16>, vector<128x49xf32> -> vector<128x49xf32>
    %c0_16 = arith.constant 0 : index
    %c0_17 = arith.constant 0 : index
    %66 = vector.load %arg2[%c0_16, %c0_17] : memref<128x49xf32, #tpu.memory_space<vmem>>, vector<128x49xf32>
    tpu.vector_store %arg2[%c0_16, %c0_17], %65 {strides = array<i32>} : memref<128x49xf32, #tpu.memory_space<vmem>>, vector<128x49xf32>,
    return
  }
}

</mosaic_0001>

<bundles_post_ra>
// kernel: maxpool3x3_conv1x1.1
= control target key start
LH: loop header
LB: loop body
LE: loop exit
PB: predicated region body
PF: predicated region fallthrough
CT: control target
= control target key end

     0   :  { %s4280_s15 = smov 7   ;;  %vm12_vm0 = vcmask 523264   ;;  %v4281_v24 = vmov -inf   ;;  %vm637_vm1 = vcmask 457784   ;;  %s4282_s29 = smov 122   ;;  %s8663_s0 = inlined_call_operand.vmem [shape: f32[832,49], index: 0, kind: input, shape index: {}]   ;;  %s8664_s1 = inlined_call_operand.vmem [shape: f32[128,832], index: 1, kind: input, shape index: {}]   ;;  %s8665_s2 = inlined_call_operand.vmem [shape: f32[128,49], index: 2, kind: output, shape index: {}]  }
   0x1   :  { %v121_v0 = vld [vmem:[%s8663_s0 + $0x20] sm:$0xff]  ;;  %v119_v1 = vld [vmem:[%s8663_s0 + $0x10] sm:$0xff]  ;;  %v122_v3 = vld [vmem:[%s8663_s0 + $0x28] sm:$0xff]  ;;  %17 = vst.msk [vmem:[#allocation2 + $0x20] sm:$0xff] %vm12_vm0, %v4281_v24  ;;  %s4283_s30 = smov 120   ;;  %s4285_s26 = smov 114  }
   0x2   :  { %v117_v2 = vld [vmem:[%s8663_s0] sm:$0xff]  ;;  %333 = vrot.lane.b32.xlu2 %v121_v0, %s4280_s15  ;;  %329 = vrot.lane.b32.xlu1 %v119_v1, %s4280_s15  ;;  %v120_v4 = vld [vmem:[%s8663_s0 + $0x18] sm:$0xff]  ;;  %13 = vst.msk [vmem:[#allocation2] sm:$0xff] %vm12_vm0, %v4281_v24 }
   0x3   :  { %325 = vrot.lane.b32.xlu0 %v117_v2, %s4280_s15  ;;  %v118_v5 = vld [vmem:[%s8663_s0 + $0x8] sm:$0xff]  ;;  %v125_v6 = vld [vmem:[%s8663_s0 + $0x40] sm:$0xff]  ;;  %v124_v7 = vld [vmem:[%s8663_s0 + $0x38] sm:$0xff]  ;;  %14 = vst.msk [vmem:[#allocation2 + $0x8] sm:$0xff] %vm12_vm0, %v4281_v24 }
   0x4   :  { %v123_v8 = vld [vmem:[%s8663_s0 + $0x30] sm:$0xff]  ;;  %v128_v9 = vld [vmem:[%s8663_s0 + $0x58] sm:$0xff]  ;;  %v126_v11 = vld [vmem:[%s8663_s0 + $0x48] sm:$0xff]  ;;  %15 = vst.msk [vmem:[#allocation2 + $0x10] sm:$0xff] %vm12_vm0, %v4281_v24 }
   0x5   :  { %v127_v10 = vld [vmem:[%s8663_s0 + $0x50] sm:$0xff]  ;;  %v130_v13 = vld [vmem:[%s8663_s0 + $0x68] sm:$0xff]  ;;  %v129_v14 = vld [vmem:[%s8663_s0 + $0x60] sm:$0xff]  ;;  %16 = vst.msk [vmem:[#allocation2 + $0x18] sm:$0xff] %vm12_vm0, %v4281_v24 }
   0x6   :  { %v131_v12 = vld [vmem:[%s8663_s0 + $0x70] sm:$0xff]  ;;  %v134_v15 = vld [vmem:[%s8663_s0 + $0x88] sm:$0xff]  ;;  %v133_v16 = vld [vmem:[%s8663_s0 + $0x80] sm:$0xff]  ;;  %18 = vst.msk [vmem:[#allocation2 + $0x28] sm:$0xff] %vm12_vm0, %v4281_v24 }
   0x7   :  { %v132_v17 = vld [vmem:[%s8663_s0 + $0x78] sm:$0xff]  ;;  %v137_v18 = vld [vmem:[%s8663_s0 + $0xa0] sm:$0xff]  ;;  %v135_v20 = vld [vmem:[%s8663_s0 + $0x90] sm:$0xff]  ;;  %19 = vst.msk [vmem:[#allocation2 + $0x30] sm:$0xff] %vm12_vm0, %v4281_v24 }
   0x8   :  { %v136_v19 = vld [vmem:[%s8663_s0 + $0x98] sm:$0xff]  ;;  %v139_v22 = vld [vmem:[%s8663_s0 + $0xb0] sm:$0xff]  ;;  %v138_v23 = vld [vmem:[%s8663_s0 + $0xa8] sm:$0xff]  ;;  %20 = vst.msk [vmem:[#allocation2 + $0x38] sm:$0xff] %vm12_vm0, %v4281_v24 }
   0x9   :  { %v140_v21 = vld [vmem:[%s8663_s0 + $0xb8] sm:$0xff]  ;;  %v143_v25 = vld [vmem:[%s8663_s0 + $0xd0] sm:$0xff]  ;;  %v142_v26 = vld [vmem:[%s8663_s0 + $0xc8] sm:$0xff]  ;;  %21 = vst.msk [vmem:[#allocation2 + $0x40] sm:$0xff] %vm12_vm0, %v4281_v24 }
   0xa   :  { %335 = vrot.lane.b32.xlu2 %v122_v3, %s4280_s15  ;;  %331 = vrot.lane.b32.xlu1 %v120_v4, %s4280_s15  ;;  %v141_v27 = vld [vmem:[%s8663_s0 + $0xc0] sm:$0xff]  ;;  %22 = vst.msk [vmem:[#allocation2 + $0x48] sm:$0xff] %vm12_vm0, %v4281_v24  ;;  %v146_v28 = vld [vmem:[%s8663_s0 + $0xe8] sm:$0xff] }
   0xb   :  { %327 = vrot.lane.b32.xlu0 %v118_v5, %s4280_s15  ;;  %23 = vst.msk [vmem:[#allocation2 + $0x50] sm:$0xff] %vm12_vm0, %v4281_v24  ;;  %v145_v29 = vld [vmem:[%s8663_s0 + $0xe0] sm:$0xff]  ;;  %v144_v30 = vld [vmem:[%s8663_s0 + $0xd8] sm:$0xff]  ;;  %v147_v33 = vld [vmem:[%s8663_s0 + $0xf0] sm:$0xff] }
   0xc   :  { %24 = vst.msk [vmem:[#allocation2 + $0x58] sm:$0xff] %vm12_vm0, %v4281_v24  ;;  %v149_v31 = vld [vmem:[%s8663_s0 + $0x100] sm:$0xff]  ;;  %v148_v32 = vld [vmem:[%s8663_s0 + $0xf8] sm:$0xff]  ;;  %v151_v35 = vld [vmem:[%s8663_s0 + $0x110] sm:$0xff] }
   0xd   :  { %25 = vst.msk [vmem:[#allocation2 + $0x60] sm:$0xff] %vm12_vm0, %v4281_v24  ;;  %v152_v34 = vld [vmem:[%s8663_s0 + $0x118] sm:$0xff]  ;;  %v150_v36 = vld [vmem:[%s8663_s0 + $0x108] sm:$0xff]  ;;  %v155_v38 = vld [vmem:[%s8663_s0 + $0x130] sm:$0xff] }
   0xe   :  { %26 = vst.msk [vmem:[#allocation2 + $0x68] sm:$0xff] %vm12_vm0, %v4281_v24  ;;  %v154_v39 = vld [vmem:[%s8663_s0 + $0x128] sm:$0xff]  ;;  %v153_v40 = vld [vmem:[%s8663_s0 + $0x120] sm:$0xff]  ;;  %v156_v44 = vld [vmem:[%s8663_s0 + $0x138] sm:$0xff] }
   0xf   :  { %27 = vst.msk [vmem:[#allocation2 + $0x70] sm:$0xff] %vm12_vm0, %v4281_v24  ;;  %v158_v42 = vld [vmem:[%s8663_s0 + $0x148] sm:$0xff]  ;;  %v157_v43 = vld [vmem:[%s8663_s0 + $0x140] sm:$0xff]  ;;  %v160_v47 = vld [vmem:[%s8663_s0 + $0x158] sm:$0xff] }
  0x10   :  { %28 = vst.msk [vmem:[#allocation2 + $0x78] sm:$0xff] %vm12_vm0, %v4281_v24  ;;  %v161_v46 = vld [vmem:[%s8663_s0 + $0x160] sm:$0xff]  ;;  %v159_v48 = vld [vmem:[%s8663_s0 + $0x150] sm:$0xff]  ;;  %v164_v52 = vld [vmem:[%s8663_s0 + $0x178] sm:$0xff] }
  0x11   :  { %29 = vst.msk [vmem:[#allocation2 + $0x80] sm:$0xff] %vm12_vm0, %v4281_v24  ;;  %v163_v53 = vld [vmem:[%s8663_s0 + $0x170] sm:$0xff]  ;;  %v162_v54 = vld [vmem:[%s8663_s0 + $0x168] sm:$0xff]  ;;  %v165_v60 = vld [vmem:[%s8663_s0 + $0x180] sm:$0xff] }
  0x12   :  { %341 = vrot.lane.b32.xlu2 %v125_v6, %s4280_s15  ;;  %339 = vrot.lane.b32.xlu1 %v124_v7, %s4280_s15  ;;  %30 = vst.msk [vmem:[#allocation2 + $0x88] sm:$0xff] %vm12_vm0, %v4281_v24  ;;  %v167_v58 = vld [vmem:[%s8663_s0 + $0x190] sm:$0xff]  ;;  %v166_v59 = vld [vmem:[%s8663_s0 + $0x188] sm:$0xff] }
  0x13   :  { %337 = vrot.lane.b32.xlu0 %v123_v8, %s4280_s15  ;;  %31 = vst.msk [vmem:[#allocation2 + $0x90] sm:$0xff] %vm12_vm0, %v4281_v24  ;;  %v170_v0 = vld [vmem:[%s8663_s0 + $0x1a8] sm:$0xff]  ;;  %v169_v1 = vld [vmem:[%s8663_s0 + $0x1a0] sm:$0xff]  ;;  %v168_v2 = vld [vmem:[%s8663_s0 + $0x198] sm:$0xff] }
  0x14   :  { %32 = vst.msk [vmem:[#allocation2 + $0x98] sm:$0xff] %vm12_vm0, %v4281_v24  ;;  %v173_v6 = vld [vmem:[%s8663_s0 + $0x1c0] sm:$0xff]  ;;  %v172_v7 = vld [vmem:[%s8663_s0 + $0x1b8] sm:$0xff]  ;;  %v171_v8 = vld [vmem:[%s8663_s0 + $0x1b0] sm:$0xff] }
  0x15   :  { %33 = vst.msk [vmem:[#allocation2 + $0xa0] sm:$0xff] %vm12_vm0, %v4281_v24 }
  0x16   :  { %34 = vst.msk [vmem:[#allocation2 + $0xa8] sm:$0xff] %vm12_vm0, %v4281_v24 }
  0x17   :  { %35 = vst.msk [vmem:[#allocation2 + $0xb0] sm:$0xff] %vm12_vm0, %v4281_v24 }
  0x18   :  { %36 = vst.msk [vmem:[#allocation2 + $0xb8] sm:$0xff] %vm12_vm0, %v4281_v24 }
  0x19   :  { %37 = vst.msk [vmem:[#allocation2 + $0xc0] sm:$0xff] %vm12_vm0, %v4281_v24 }
  0x1a   :  { %347 = vrot.lane.b32.xlu2 %v128_v9, %s4280_s15  ;;  %345 = vrot.lane.b32.xlu1 %v127_v10, %s4280_s15  ;;  %38 = vst.msk [vmem:[#allocation2 + $0xc8] sm:$0xff] %vm12_vm0, %v4281_v24 }
  0x1b   :  { %343 = vrot.lane.b32.xlu0 %v126_v11, %s4280_s15  ;;  %39 = vst.msk [vmem:[#allocation2 + $0xd0] sm:$0xff] %vm12_vm0, %v4281_v24 }
  0x1c   :  { %40 = vst.msk [vmem:[#allocation2 + $0xd8] sm:$0xff] %vm12_vm0, %v4281_v24 }
  0x1d   :  { %41 = vst.msk [vmem:[#allocation2 + $0xe0] sm:$0xff] %vm12_vm0, %v4281_v24 }
  0x1e   :  { %42 = vst.msk [vmem:[#allocation2 + $0xe8] sm:$0xff] %vm12_vm0, %v4281_v24 }
  0x1f   :  { %43 = vst.msk [vmem:[#allocation2 + $0xf0] sm:$0xff] %vm12_vm0, %v4281_v24 }
  0x20   :  { %44 = vst.msk [vmem:[#allocation2 + $0xf8] sm:$0xff] %vm12_vm0, %v4281_v24 }
  0x21   :  { %45 = vst.msk [vmem:[#allocation2 + $0x100] sm:$0xff] %vm12_vm0, %v4281_v24 }
  0x22   :  { %353 = vrot.lane.b32.xlu2 %v131_v12, %s4280_s15  ;;  %351 = vrot.lane.b32.xlu1 %v130_v13, %s4280_s15  ;;  %46 = vst.msk [vmem:[#allocation2 + $0x108] sm:$0xff] %vm12_vm0, %v4281_v24  ;;  %v176_v12 = vld [vmem:[%s8663_s0 + $0x1d8] sm:$0xff]  ;;  %v175_v13 = vld [vmem:[%s8663_s0 + $0x1d0] sm:$0xff] }
  0x23   :  { %349 = vrot.lane.b32.xlu0 %v129_v14, %s4280_s15  ;;  %47 = vst.msk [vmem:[#allocation2 + $0x110] sm:$0xff] %vm12_vm0, %v4281_v24  ;;  %v174_v14 = vld [vmem:[%s8663_s0 + $0x1c8] sm:$0xff] }
  0x24   :  { %48 = vst.msk [vmem:[#allocation2 + $0x118] sm:$0xff] %vm12_vm0, %v4281_v24 }
  0x25   :  { %49 = vst.msk [vmem:[#allocation2 + $0x120] sm:$0xff] %vm12_vm0, %v4281_v24 }
  0x26   :  { %50 = vst.msk [vmem:[#allocation2 + $0x128] sm:$0xff] %vm12_vm0, %v4281_v24 }
  0x27   :  { %51 = vst.msk [vmem:[#allocation2 + $0x130] sm:$0xff] %vm12_vm0, %v4281_v24 }
  0x28   :  { %52 = vst.msk [vmem:[#allocation2 + $0x138] sm:$0xff] %vm12_vm0, %v4281_v24 }
  0x29   :  { %53 = vst.msk [vmem:[#allocation2 + $0x140] sm:$0xff] %vm12_vm0, %v4281_v24 }
  0x2a   :  { %359 = vrot.lane.b32.xlu2 %v134_v15, %s4280_s15  ;;  %357 = vrot.lane.b32.xlu1 %v133_v16, %s4280_s15  ;;  %54 = vst.msk [vmem:[#allocation2 + $0x148] sm:$0xff] %vm12_vm0, %v4281_v24 }
  0x2b   :  { %355 = vrot.lane.b32.xlu0 %v132_v17, %s4280_s15  ;;  %55 = vst.msk [vmem:[#allocation2 + $0x150] sm:$0xff] %vm12_vm0, %v4281_v24 }
  0x2c   :  { %56 = vst.msk [vmem:[#allocation2 + $0x158] sm:$0xff] %vm12_vm0, %v4281_v24 }
  0x2d   :  { %57 = vst.msk [vmem:[#allocation2 + $0x160] sm:$0xff] %vm12_vm0, %v4281_v24 }
  0x2e   :  { %58 = vst.msk [vmem:[#allocation2 + $0x168] sm:$0xff] %vm12_vm0, %v4281_v24 }
  0x2f   :  { %59 = vst.msk [vmem:[#allocation2 + $0x170] sm:$0xff] %vm12_vm0, %v4281_v24 }
  0x30   :  { %60 = vst.msk [vmem:[#allocation2 + $0x178] sm:$0xff] %vm12_vm0, %v4281_v24 }
  0x31   :  { %61 = vst.msk [vmem:[#allocation2 + $0x180] sm:$0xff] %vm12_vm0, %v4281_v24 }
  0x32   :  { %365 = vrot.lane.b32.xlu2 %v137_v18, %s4280_s15  ;;  %363 = vrot.lane.b32.xlu1 %v136_v19, %s4280_s15  ;;  %62 = vst.msk [vmem:[#allocation2 + $0x188] sm:$0xff] %vm12_vm0, %v4281_v24  ;;  %v179_v18 = vld [vmem:[%s8663_s0 + $0x1f0] sm:$0xff]  ;;  %v178_v19 = vld [vmem:[%s8663_s0 + $0x1e8] sm:$0xff] }
  0x33   :  { %361 = vrot.lane.b32.xlu0 %v135_v20, %s4280_s15  ;;  %63 = vst.msk [vmem:[#allocation2 + $0x190] sm:$0xff] %vm12_vm0, %v4281_v24  ;;  %v177_v20 = vld [vmem:[%s8663_s0 + $0x1e0] sm:$0xff] }
  0x34   :  { %64 = vst.msk [vmem:[#allocation2 + $0x198] sm:$0xff] %vm12_vm0, %v4281_v24 }
  0x35   :  { %65 = vst.msk [vmem:[#allocation2 + $0x1a0] sm:$0xff] %vm12_vm0, %v4281_v24 }
  0x36   :  { %66 = vst.msk [vmem:[#allocation2 + $0x1a8] sm:$0xff] %vm12_vm0, %v4281_v24 }
  0x37   :  { %67 = vst.msk [vmem:[#allocation2 + $0x1b0] sm:$0xff] %vm12_vm0, %v4281_v24 }
  0x38   :  { %68 = vst.msk [vmem:[#allocation2 + $0x1b8] sm:$0xff] %vm12_vm0, %v4281_v24 }
  0x39   :  { %69 = vst.msk [vmem:[#allocation2 + $0x1c0] sm:$0xff] %vm12_vm0, %v4281_v24 }
  0x3a   :  { %371 = vrot.lane.b32.xlu2 %v140_v21, %s4280_s15  ;;  %369 = vrot.lane.b32.xlu1 %v139_v22, %s4280_s15  ;;  %70 = vst.msk [vmem:[#allocation2 + $0x1c8] sm:$0xff] %vm12_vm0, %v4281_v24 }
  0x3b   :  { %367 = vrot.lane.b32.xlu0 %v138_v23, %s4280_s15  ;;  %71 = vst.msk [vmem:[#allocation2 + $0x1d0] sm:$0xff] %vm12_vm0, %v4281_v24 }
  0x3c   :  { %72 = vst.msk [vmem:[#allocation2 + $0x1d8] sm:$0xff] %vm12_vm0, %v4281_v24 }
  0x3d   :  { %73 = vst.msk [vmem:[#allocation2 + $0x1e0] sm:$0xff] %vm12_vm0, %v4281_v24 }
  0x3e   :  { %74 = vst.msk [vmem:[#allocation2 + $0x1e8] sm:$0xff] %vm12_vm0, %v4281_v24 }
  0x3f   :  { %75 = vst.msk [vmem:[#allocation2 + $0x1f0] sm:$0xff] %vm12_vm0, %v4281_v24 }
  0x40   :  { %76 = vst.msk [vmem:[#allocation2 + $0x1f8] sm:$0xff] %vm12_vm0, %v4281_v24 }
  0x41   :  { %77 = vst.msk [vmem:[#allocation2 + $0x200] sm:$0xff] %vm12_vm0, %v4281_v24 }
  0x42   :  { %377 = vrot.lane.b32.xlu2 %v143_v25, %s4280_s15  ;;  %375 = vrot.lane.b32.xlu1 %v142_v26, %s4280_s15  ;;  %78 = vst.msk [vmem:[#allocation2 + $0x208] sm:$0xff] %vm12_vm0, %v4281_v24  ;;  %v181_v25 = vld [vmem:[%s8663_s0 + $0x200] sm:$0xff]  ;;  %v180_v26 = vld [vmem:[%s8663_s0 + $0x1f8] sm:$0xff] }
  0x43   :  { %373 = vrot.lane.b32.xlu0 %v141_v27, %s4280_s15  ;;  %79 = vst.msk [vmem:[#allocation2 + $0x210] sm:$0xff] %vm12_vm0, %v4281_v24 }
  0x44   :  { %80 = vst.msk [vmem:[#allocation2 + $0x218] sm:$0xff] %vm12_vm0, %v4281_v24 }
  0x45   :  { %81 = vst.msk [vmem:[#allocation2 + $0x220] sm:$0xff] %vm12_vm0, %v4281_v24 }
  0x46   :  { %82 = vst.msk [vmem:[#allocation2 + $0x228] sm:$0xff] %vm12_vm0, %v4281_v24 }
  0x47   :  { %83 = vst.msk [vmem:[#allocation2 + $0x230] sm:$0xff] %vm12_vm0, %v4281_v24 }
  0x48   :  { %84 = vst.msk [vmem:[#allocation2 + $0x238] sm:$0xff] %vm12_vm0, %v4281_v24 }
  0x49   :  { %85 = vst.msk [vmem:[#allocation2 + $0x240] sm:$0xff] %vm12_vm0, %v4281_v24 }
  0x4a   :  { %383 = vrot.lane.b32.xlu2 %v146_v28, %s4280_s15  ;;  %381 = vrot.lane.b32.xlu1 %v145_v29, %s4280_s15  ;;  %86 = vst.msk [vmem:[#allocation2 + $0x248] sm:$0xff] %vm12_vm0, %v4281_v24 }
  0x4b   :  { %379 = vrot.lane.b32.xlu0 %v144_v30, %s4280_s15  ;;  %87 = vst.msk [vmem:[#allocation2 + $0x250] sm:$0xff] %vm12_vm0, %v4281_v24  ;;  %v185_v30 = vld [vmem:[%s8663_s0 + $0x220] sm:$0xff] }
  0x4c   :  { %88 = vst.msk [vmem:[#allocation2 + $0x258] sm:$0xff] %vm12_vm0, %v4281_v24 }
  0x4d   :  { %89 = vst.msk [vmem:[#allocation2 + $0x260] sm:$0xff] %vm12_vm0, %v4281_v24 }
  0x4e   :  { %90 = vst.msk [vmem:[#allocation2 + $0x268] sm:$0xff] %vm12_vm0, %v4281_v24 }
  0x4f   :  { %91 = vst.msk [vmem:[#allocation2 + $0x270] sm:$0xff] %vm12_vm0, %v4281_v24 }
  0x50   :  { %92 = vst.msk [vmem:[#allocation2 + $0x278] sm:$0xff] %vm12_vm0, %v4281_v24 }
  0x51   :  { %93 = vst.msk [vmem:[#allocation2 + $0x280] sm:$0xff] %vm12_vm0, %v4281_v24 }
  0x52   :  { %389 = vrot.lane.b32.xlu2 %v149_v31, %s4280_s15  ;;  %387 = vrot.lane.b32.xlu1 %v148_v32, %s4280_s15  ;;  %94 = vst.msk [vmem:[#allocation2 + $0x288] sm:$0xff] %vm12_vm0, %v4281_v24  ;;  %v184_v31 = vld [vmem:[%s8663_s0 + $0x218] sm:$0xff]  ;;  %v183_v32 = vld [vmem:[%s8663_s0 + $0x210] sm:$0xff] }
  0x53   :  { %385 = vrot.lane.b32.xlu0 %v147_v33, %s4280_s15  ;;  %95 = vst.msk [vmem:[#allocation2 + $0x290] sm:$0xff] %vm12_vm0, %v4281_v24 }
  0x54   :  { %96 = vst.msk [vmem:[#allocation2 + $0x298] sm:$0xff] %vm12_vm0, %v4281_v24 }
  0x55   :  { %97 = vst.msk [vmem:[#allocation2 + $0x2a0] sm:$0xff] %vm12_vm0, %v4281_v24 }
  0x56   :  { %98 = vst.msk [vmem:[#allocation2 + $0x2a8] sm:$0xff] %vm12_vm0, %v4281_v24 }
  0x57   :  { %99 = vst.msk [vmem:[#allocation2 + $0x2b0] sm:$0xff] %vm12_vm0, %v4281_v24 }
  0x58   :  { %100 = vst.msk [vmem:[#allocation2 + $0x2b8] sm:$0xff] %vm12_vm0, %v4281_v24 }
  0x59   :  { %101 = vst.msk [vmem:[#allocation2 + $0x2c0] sm:$0xff] %vm12_vm0, %v4281_v24 }
  0x5a   :  { %395 = vrot.lane.b32.xlu2 %v152_v34, %s4280_s15  ;;  %393 = vrot.lane.b32.xlu1 %v151_v35, %s4280_s15  ;;  %102 = vst.msk [vmem:[#allocation2 + $0x2c8] sm:$0xff] %vm12_vm0, %v4281_v24 }
  0x5b   :  { %391 = vrot.lane.b32.xlu0 %v150_v36, %s4280_s15  ;;  %103 = vst.msk [vmem:[#allocation2 + $0x2d0] sm:$0xff] %vm12_vm0, %v4281_v24  ;;  %v188_v36 = vld [vmem:[%s8663_s0 + $0x238] sm:$0xff] }
  0x5c   :  { %v334_v37 = vpop.permute.xlu2 %333  ;;  %104 = vst.msk [vmem:[#allocation2 + $0x2d8] sm:$0xff] %vm12_vm0, %v4281_v24 }
  0x5d   :  { %642 = vst.msk [vmem:[#allocation2 + $0x20] sm:$0xff] %vm637_vm1, %v334_v37  ;;  %v187_v37 = vld [vmem:[%s8663_s0 + $0x230] sm:$0xff] }
  0x5e   :  { %105 = vst.msk [vmem:[#allocation2 + $0x2e0] sm:$0xff] %vm12_vm0, %v4281_v24 }
  0x5f   :  { %106 = vst.msk [vmem:[#allocation2 + $0x2e8] sm:$0xff] %vm12_vm0, %v4281_v24 }
  0x60   :  { %107 = vst.msk [vmem:[#allocation2 + $0x2f0] sm:$0xff] %vm12_vm0, %v4281_v24 }
  0x61   :  { %108 = vst.msk [vmem:[#allocation2 + $0x2f8] sm:$0xff] %vm12_vm0, %v4281_v24 }
  0x62   :  { %401 = vrot.lane.b32.xlu2 %v155_v38, %s4280_s15  ;;  %399 = vrot.lane.b32.xlu1 %v154_v39, %s4280_s15  ;;  %109 = vst.msk [vmem:[#allocation2 + $0x300] sm:$0xff] %vm12_vm0, %v4281_v24  ;;  %v186_v38 = vld [vmem:[%s8663_s0 + $0x228] sm:$0xff] }
  0x63   :  { %397 = vrot.lane.b32.xlu0 %v153_v40, %s4280_s15  ;;  %110 = vst.msk [vmem:[#allocation2 + $0x308] sm:$0xff] %vm12_vm0, %v4281_v24 }
  0x64   :  { %v4552_v41 = vpop.permute.xlu2 %335  ;;  %111 = vst.msk [vmem:[#allocation2 + $0x310] sm:$0xff] %vm12_vm0, %v4281_v24 }
  0x65   :  { %112 = vst.msk [vmem:[#allocation2 + $0x318] sm:$0xff] %vm12_vm0, %v4281_v24 }
  0x66   :  { %113 = vst.msk [vmem:[#allocation2 + $0x320] sm:$0xff] %vm12_vm0, %v4281_v24 }
  0x67   :  { %114 = vst.msk [vmem:[#allocation2 + $0x328] sm:$0xff] %vm12_vm0, %v4281_v24 }
  0x68   :  { %115 = vst.msk [vmem:[#allocation2 + $0x330] sm:$0xff] %vm12_vm0, %v4281_v24 }
  0x69   :  { %116 = vst.msk [vmem:[#allocation2 + $0x338] sm:$0xff] %vm12_vm0, %v4281_v24  ;;  %v182_v24 = vld [vmem:[%s8663_s0 + $0x208] sm:$0xff] }
  0x6a   :  { %407 = vrot.lane.b32.xlu2 %v158_v42, %s4280_s15  ;;  %405 = vrot.lane.b32.xlu1 %v157_v43, %s4280_s15  ;;  %643 = vst.msk [vmem:[#allocation2 + $0x28] sm:$0xff] %vm637_vm1, %v4552_v41  ;;  %v191_v42 = vld [vmem:[%s8663_s0 + $0x250] sm:$0xff]  ;;  %v190_v43 = vld [vmem:[%s8663_s0 + $0x248] sm:$0xff] }
  0x6b   :  { %403 = vrot.lane.b32.xlu0 %v156_v44, %s4280_s15  ;;  %v189_v44 = vld [vmem:[%s8663_s0 + $0x240] sm:$0xff] }
  0x6c   :  { %v4586_v45 = vpop.permute.xlu2 %341 }
  0x6d   :  { %646 = vst.msk [vmem:[#allocation2 + $0x40] sm:$0xff] %vm637_vm1, %v4586_v45 }
  0x72   :  { %413 = vrot.lane.b32.xlu2 %v161_v46, %s4280_s15  ;;  %411 = vrot.lane.b32.xlu1 %v160_v47, %s4280_s15 }
  0x73   :  { %409 = vrot.lane.b32.xlu0 %v159_v48, %s4280_s15  ;;  %v194_v48 = vld [vmem:[%s8663_s0 + $0x268] sm:$0xff] }
  0x74   :  { %v4620_v49 = vpop.permute.xlu2 %347  ;;  %v4624_v50 = vpop.permute.xlu1 %329 }
  0x75   :  { %v4640_v51 = vpop.permute.xlu0 %325  ;;  %649 = vst.msk [vmem:[#allocation2 + $0x58] sm:$0xff] %vm637_vm1, %v4620_v49  ;;  %v193_v49 = vld [vmem:[%s8663_s0 + $0x260] sm:$0xff] }
  0x76   :  { %640 = vst.msk [vmem:[#allocation2 + $0x10] sm:$0xff] %vm637_vm1, %v4624_v50  ;;  %v192_v50 = vld [vmem:[%s8663_s0 + $0x258] sm:$0xff] }
  0x77   :  { %638 = vst.msk [vmem:[#allocation2] sm:$0xff] %vm637_vm1, %v4640_v51 }
  0x7a   :  { %419 = vrot.lane.b32.xlu2 %v164_v52, %s4280_s15  ;;  %417 = vrot.lane.b32.xlu1 %v163_v53, %s4280_s15 }
  0x7b   :  { %415 = vrot.lane.b32.xlu0 %v162_v54, %s4280_s15  ;;  %v197_v54 = vld [vmem:[%s8663_s0 + $0x280] sm:$0xff] }
  0x7c   :  { %v4655_v55 = vpop.permute.xlu2 %353  ;;  %v4661_v56 = vpop.permute.xlu1 %331 }
  0x7d   :  { %v4674_v57 = vpop.permute.xlu0 %327  ;;  %652 = vst.msk [vmem:[#allocation2 + $0x70] sm:$0xff] %vm637_vm1, %v4655_v55  ;;  %v196_v55 = vld [vmem:[%s8663_s0 + $0x278] sm:$0xff] }
  0x7e   :  { %641 = vst.msk [vmem:[#allocation2 + $0x18] sm:$0xff] %vm637_vm1, %v4661_v56  ;;  %v195_v56 = vld [vmem:[%s8663_s0 + $0x270] sm:$0xff] }
  0x7f   :  { %639 = vst.msk [vmem:[#allocation2 + $0x8] sm:$0xff] %vm637_vm1, %v4674_v57 }
  0x82   :  { %425 = vrot.lane.b32.xlu2 %v167_v58, %s4280_s15  ;;  %423 = vrot.lane.b32.xlu1 %v166_v59, %s4280_s15 }
  0x83   :  { %421 = vrot.lane.b32.xlu0 %v165_v60, %s4280_s15  ;;  %v200_v60 = vld [vmem:[%s8663_s0 + $0x298] sm:$0xff] }
  0x84   :  { %v360_v61 = vpop.permute.xlu2 %359  ;;  %v340_v62 = vpop.permute.xlu1 %339 }
  0x85   :  { %v338_v63 = vpop.permute.xlu0 %337  ;;  %655 = vst.msk [vmem:[#allocation2 + $0x88] sm:$0xff] %vm637_vm1, %v360_v61  ;;  %v199_v61 = vld [vmem:[%s8663_s0 + $0x290] sm:$0xff] }
  0x86   :  { %645 = vst.msk [vmem:[#allocation2 + $0x38] sm:$0xff] %vm637_vm1, %v340_v62  ;;  %v198_v62 = vld [vmem:[%s8663_s0 + $0x288] sm:$0xff] }
  0x87   :  { %644 = vst.msk [vmem:[#allocation2 + $0x30] sm:$0xff] %vm637_vm1, %v338_v63 }
  0x8a   :  { %431 = vrot.lane.b32.xlu2 %v170_v0, %s4280_s15  ;;  %429 = vrot.lane.b32.xlu1 %v169_v1, %s4280_s15 }
  0x8b   :  { %427 = vrot.lane.b32.xlu0 %v168_v2, %s4280_s15  ;;  %v203_v2 = vld [vmem:[%s8663_s0 + $0x2b0] sm:$0xff] }
  0x8c   :  { %v366_v3 = vpop.permute.xlu2 %365  ;;  %v346_v4 = vpop.permute.xlu1 %345 }
  0x8d   :  { %v344_v5 = vpop.permute.xlu0 %343  ;;  %658 = vst.msk [vmem:[#allocation2 + $0xa0] sm:$0xff] %vm637_vm1, %v366_v3  ;;  %v202_v3 = vld [vmem:[%s8663_s0 + $0x2a8] sm:$0xff] }
  0x8e   :  { %648 = vst.msk [vmem:[#allocation2 + $0x50] sm:$0xff] %vm637_vm1, %v346_v4  ;;  %v201_v4 = vld [vmem:[%s8663_s0 + $0x2a0] sm:$0xff] }
  0x8f   :  { %647 = vst.msk [vmem:[#allocation2 + $0x48] sm:$0xff] %vm637_vm1, %v344_v5 }
  0x92   :  { %437 = vrot.lane.b32.xlu2 %v173_v6, %s4280_s15  ;;  %435 = vrot.lane.b32.xlu1 %v172_v7, %s4280_s15 }
  0x93   :  { %433 = vrot.lane.b32.xlu0 %v171_v8, %s4280_s15  ;;  %v206_v8 = vld [vmem:[%s8663_s0 + $0x2c8] sm:$0xff] }
  0x94   :  { %v372_v9 = vpop.permute.xlu2 %371  ;;  %v352_v10 = vpop.permute.xlu1 %351 }
  0x95   :  { %v350_v11 = vpop.permute.xlu0 %349  ;;  %661 = vst.msk [vmem:[#allocation2 + $0xb8] sm:$0xff] %vm637_vm1, %v372_v9  ;;  %v205_v9 = vld [vmem:[%s8663_s0 + $0x2c0] sm:$0xff] }
  0x96   :  { %651 = vst.msk [vmem:[#allocation2 + $0x68] sm:$0xff] %vm637_vm1, %v352_v10  ;;  %v204_v10 = vld [vmem:[%s8663_s0 + $0x2b8] sm:$0xff] }
  0x97   :  { %650 = vst.msk [vmem:[#allocation2 + $0x60] sm:$0xff] %vm637_vm1, %v350_v11 }
  0x9a   :  { %443 = vrot.lane.b32.xlu2 %v176_v12, %s4280_s15  ;;  %441 = vrot.lane.b32.xlu1 %v175_v13, %s4280_s15 }
  0x9b   :  { %439 = vrot.lane.b32.xlu0 %v174_v14, %s4280_s15  ;;  %v209_v14 = vld [vmem:[%s8663_s0 + $0x2e0] sm:$0xff] }
  0x9c   :  { %v378_v15 = vpop.permute.xlu2 %377  ;;  %v358_v16 = vpop.permute.xlu1 %357 }
  0x9d   :  { %v356_v17 = vpop.permute.xlu0 %355  ;;  %664 = vst.msk [vmem:[#allocation2 + $0xd0] sm:$0xff] %vm637_vm1, %v378_v15  ;;  %v208_v15 = vld [vmem:[%s8663_s0 + $0x2d8] sm:$0xff] }
  0x9e   :  { %654 = vst.msk [vmem:[#allocation2 + $0x80] sm:$0xff] %vm637_vm1, %v358_v16  ;;  %v207_v16 = vld [vmem:[%s8663_s0 + $0x2d0] sm:$0xff] }
  0x9f   :  { %653 = vst.msk [vmem:[#allocation2 + $0x78] sm:$0xff] %vm637_vm1, %v356_v17 }
  0xa2   :  { %449 = vrot.lane.b32.xlu2 %v179_v18, %s4280_s15  ;;  %447 = vrot.lane.b32.xlu1 %v178_v19, %s4280_s15 }
  0xa3   :  { %445 = vrot.lane.b32.xlu0 %v177_v20, %s4280_s15  ;;  %v212_v20 = vld [vmem:[%s8663_s0 + $0x2f8] sm:$0xff] }
  0xa4   :  { %v384_v21 = vpop.permute.xlu2 %383  ;;  %v364_v22 = vpop.permute.xlu1 %363 }
  0xa5   :  { %v362_v23 = vpop.permute.xlu0 %361  ;;  %667 = vst.msk [vmem:[#allocation2 + $0xe8] sm:$0xff] %vm637_vm1, %v384_v21  ;;  %v211_v21 = vld [vmem:[%s8663_s0 + $0x2f0] sm:$0xff] }
  0xa6   :  { %657 = vst.msk [vmem:[#allocation2 + $0x98] sm:$0xff] %vm637_vm1, %v364_v22  ;;  %v210_v22 = vld [vmem:[%s8663_s0 + $0x2e8] sm:$0xff] }
  0xa7   :  { %656 = vst.msk [vmem:[#allocation2 + $0x90] sm:$0xff] %vm637_vm1, %v362_v23 }
  0xaa   :  { %455 = vrot.lane.b32.xlu2 %v182_v24, %s4280_s15  ;;  %453 = vrot.lane.b32.xlu1 %v181_v25, %s4280_s15 }
  0xab   :  { %451 = vrot.lane.b32.xlu0 %v180_v26, %s4280_s15  ;;  %v215_v26 = vld [vmem:[%s8663_s0 + $0x310] sm:$0xff] }
  0xac   :  { %v390_v27 = vpop.permute.xlu2 %389  ;;  %v370_v28 = vpop.permute.xlu1 %369 }
  0xad   :  { %670 = vst.msk [vmem:[#allocation2 + $0x100] sm:$0xff] %vm637_vm1, %v390_v27  ;;  %v368_v29 = vpop.permute.xlu0 %367  ;;  %v214_v27 = vld [vmem:[%s8663_s0 + $0x308] sm:$0xff] }
  0xae   :  { %660 = vst.msk [vmem:[#allocation2 + $0xb0] sm:$0xff] %vm637_vm1, %v370_v28  ;;  %v213_v28 = vld [vmem:[%s8663_s0 + $0x300] sm:$0xff] }
  0xaf   :  { %659 = vst.msk [vmem:[#allocation2 + $0xa8] sm:$0xff] %vm637_vm1, %v368_v29 }
  0xb2   :  { %461 = vrot.lane.b32.xlu2 %v185_v30, %s4280_s15  ;;  %459 = vrot.lane.b32.xlu1 %v184_v31, %s4280_s15 }
  0xb3   :  { %457 = vrot.lane.b32.xlu0 %v183_v32, %s4280_s15  ;;  %v218_v32 = vld [vmem:[%s8663_s0 + $0x328] sm:$0xff] }
  0xb4   :  { %v396_v33 = vpop.permute.xlu2 %395  ;;  %v376_v34 = vpop.permute.xlu1 %375 }
  0xb5   :  { %673 = vst.msk [vmem:[#allocation2 + $0x118] sm:$0xff] %vm637_vm1, %v396_v33  ;;  %v374_v35 = vpop.permute.xlu0 %373  ;;  %v217_v33 = vld [vmem:[%s8663_s0 + $0x320] sm:$0xff] }
  0xb6   :  { %663 = vst.msk [vmem:[#allocation2 + $0xc8] sm:$0xff] %vm637_vm1, %v376_v34  ;;  %v216_v34 = vld [vmem:[%s8663_s0 + $0x318] sm:$0xff] }
  0xb7   :  { %662 = vst.msk [vmem:[#allocation2 + $0xc0] sm:$0xff] %vm637_vm1, %v374_v35 }
  0xba   :  { %467 = vrot.lane.b32.xlu2 %v188_v36, %s4280_s15  ;;  %465 = vrot.lane.b32.xlu1 %v187_v37, %s4280_s15 }
  0xbb   :  { %463 = vrot.lane.b32.xlu0 %v186_v38, %s4280_s15  ;;  %v220_v38 = vld [vmem:[%s8663_s0 + $0x338] sm:$0xff] }
  0xbc   :  { %v402_v39 = vpop.permute.xlu2 %401  ;;  %v382_v40 = vpop.permute.xlu1 %381 }
  0xbd   :  { %676 = vst.msk [vmem:[#allocation2 + $0x130] sm:$0xff] %vm637_vm1, %v402_v39  ;;  %v380_v41 = vpop.permute.xlu0 %379  ;;  %v219_v39 = vld [vmem:[%s8663_s0 + $0x330] sm:$0xff] }
  0xbe   :  { %666 = vst.msk [vmem:[#allocation2 + $0xe0] sm:$0xff] %vm637_vm1, %v382_v40  ;;  %v5010_v40 = vld [vmem:[#allocation2] sm:$0xff] }
  0xbf   :  { %665 = vst.msk [vmem:[#allocation2 + $0xd8] sm:$0xff] %vm637_vm1, %v380_v41 }
  0xc2   :  { %473 = vrot.lane.b32.xlu2 %v191_v42, %s4280_s15  ;;  %471 = vrot.lane.b32.xlu1 %v190_v43, %s4280_s15 }
  0xc3   :  { %469 = vrot.lane.b32.xlu0 %v189_v44, %s4280_s15  ;;  %v5019_v44 = vld [vmem:[#allocation2 + $0x10] sm:$0xff] }
  0xc4   :  { %v408_v45 = vpop.permute.xlu2 %407  ;;  %v388_v46 = vpop.permute.xlu1 %387 }
  0xc5   :  { %679 = vst.msk [vmem:[#allocation2 + $0x148] sm:$0xff] %vm637_vm1, %v408_v45  ;;  %v386_v47 = vpop.permute.xlu0 %385  ;;  %v5021_v45 = vld [vmem:[#allocation2 + $0x18] sm:$0xff] }
  0xc6   :  { %669 = vst.msk [vmem:[#allocation2 + $0xf8] sm:$0xff] %vm637_vm1, %v388_v46  ;;  %v5027_v46 = vld [vmem:[#allocation2 + $0x8] sm:$0xff] }
  0xc7   :  { %668 = vst.msk [vmem:[#allocation2 + $0xf0] sm:$0xff] %vm637_vm1, %v386_v47 }
  0xca   :  { %479 = vrot.lane.b32.xlu2 %v194_v48, %s4280_s15  ;;  %477 = vrot.lane.b32.xlu1 %v193_v49, %s4280_s15 }
  0xcb   :  { %475 = vrot.lane.b32.xlu0 %v192_v50, %s4280_s15  ;;  %v5034_v50 = vld [vmem:[#allocation2 + $0x28] sm:$0xff] }
  0xcc   :  { %v414_v51 = vpop.permute.xlu2 %413  ;;  %v394_v52 = vpop.permute.xlu1 %393 }
  0xcd   :  { %682 = vst.msk [vmem:[#allocation2 + $0x160] sm:$0xff] %vm637_vm1, %v414_v51  ;;  %v392_v53 = vpop.permute.xlu0 %391  ;;  %v5036_v51 = vld [vmem:[#allocation2 + $0x30] sm:$0xff] }
  0xce   :  { %672 = vst.msk [vmem:[#allocation2 + $0x110] sm:$0xff] %vm637_vm1, %v394_v52  ;;  %v5040_v52 = vld [vmem:[#allocation2 + $0x20] sm:$0xff] }
  0xcf   :  { %671 = vst.msk [vmem:[#allocation2 + $0x108] sm:$0xff] %vm637_vm1, %v392_v53 }
  0xd2   :  { %485 = vrot.lane.b32.xlu2 %v197_v54, %s4280_s15  ;;  %483 = vrot.lane.b32.xlu1 %v196_v55, %s4280_s15 }
  0xd3   :  { %481 = vrot.lane.b32.xlu0 %v195_v56, %s4280_s15  ;;  %v5049_v56 = vld [vmem:[#allocation2 + $0x40] sm:$0xff] }
  0xd4   :  { %v400_v57 = vpop.permute.xlu1 %399  ;;  %v420_v58 = vpop.permute.xlu2 %419 }
  0xd5   :  { %675 = vst.msk [vmem:[#allocation2 + $0x128] sm:$0xff] %vm637_vm1, %v400_v57  ;;  %v398_v59 = vpop.permute.xlu0 %397  ;;  %v5051_v57 = vld [vmem:[#allocation2 + $0x48] sm:$0xff] }
  0xd6   :  { %685 = vst.msk [vmem:[#allocation2 + $0x178] sm:$0xff] %vm637_vm1, %v420_v58  ;;  %v5055_v58 = vld [vmem:[#allocation2 + $0x38] sm:$0xff] }
  0xd7   :  { %674 = vst.msk [vmem:[#allocation2 + $0x120] sm:$0xff] %vm637_vm1, %v398_v59 }
  0xda   :  { %491 = vrot.lane.b32.xlu2 %v200_v60, %s4280_s15  ;;  %489 = vrot.lane.b32.xlu1 %v199_v61, %s4280_s15 }
  0xdb   :  { %487 = vrot.lane.b32.xlu0 %v198_v62, %s4280_s15  ;;  %v5064_v62 = vld [vmem:[#allocation2 + $0x58] sm:$0xff] }
  0xdc   :  { %v406_v63 = vpop.permute.xlu1 %405  ;;  %v426_v0 = vpop.permute.xlu2 %425 }
  0xdd   :  { %678 = vst.msk [vmem:[#allocation2 + $0x140] sm:$0xff] %vm637_vm1, %v406_v63  ;;  %v404_v1 = vpop.permute.xlu0 %403  ;;  %v5066_v63 = vld [vmem:[#allocation2 + $0x60] sm:$0xff] }
  0xde   :  { %688 = vst.msk [vmem:[#allocation2 + $0x190] sm:$0xff] %vm637_vm1, %v426_v0  ;;  %v5070_v0 = vld [vmem:[#allocation2 + $0x50] sm:$0xff] }
  0xdf   :  { %677 = vst.msk [vmem:[#allocation2 + $0x138] sm:$0xff] %vm637_vm1, %v404_v1 }
  0xe2   :  { %497 = vrot.lane.b32.xlu2 %v203_v2, %s4280_s15  ;;  %495 = vrot.lane.b32.xlu1 %v202_v3, %s4280_s15 }
  0xe3   :  { %493 = vrot.lane.b32.xlu0 %v201_v4, %s4280_s15  ;;  %v5079_v4 = vld [vmem:[#allocation2 + $0x70] sm:$0xff] }
  0xe4   :  { %v412_v5 = vpop.permute.xlu1 %411  ;;  %v432_v6 = vpop.permute.xlu2 %431 }
  0xe5   :  { %681 = vst.msk [vmem:[#allocation2 + $0x158] sm:$0xff] %vm637_vm1, %v412_v5  ;;  %v410_v7 = vpop.permute.xlu0 %409  ;;  %v5081_v5 = vld [vmem:[#allocation2 + $0x78] sm:$0xff] }
  0xe6   :  { %691 = vst.msk [vmem:[#allocation2 + $0x1a8] sm:$0xff] %vm637_vm1, %v432_v6  ;;  %v5085_v6 = vld [vmem:[#allocation2 + $0x68] sm:$0xff] }
  0xe7   :  { %680 = vst.msk [vmem:[#allocation2 + $0x150] sm:$0xff] %vm637_vm1, %v410_v7 }
  0xea   :  { %503 = vrot.lane.b32.xlu2 %v206_v8, %s4280_s15  ;;  %501 = vrot.lane.b32.xlu1 %v205_v9, %s4280_s15 }
  0xeb   :  { %499 = vrot.lane.b32.xlu0 %v204_v10, %s4280_s15  ;;  %v5094_v10 = vld [vmem:[#allocation2 + $0x88] sm:$0xff] }
  0xec   :  { %v438_v11 = vpop.permute.xlu2 %437  ;;  %v418_v12 = vpop.permute.xlu1 %417 }
  0xed   :  { %694 = vst.msk [vmem:[#allocation2 + $0x1c0] sm:$0xff] %vm637_vm1, %v438_v11  ;;  %v416_v13 = vpop.permute.xlu0 %415  ;;  %v5096_v11 = vld [vmem:[#allocation2 + $0x90] sm:$0xff] }
  0xee   :  { %684 = vst.msk [vmem:[#allocation2 + $0x170] sm:$0xff] %vm637_vm1, %v418_v12  ;;  %v5100_v12 = vld [vmem:[#allocation2 + $0x80] sm:$0xff] }
  0xef   :  { %683 = vst.msk [vmem:[#allocation2 + $0x168] sm:$0xff] %vm637_vm1, %v416_v13 }
  0xf2   :  { %509 = vrot.lane.b32.xlu2 %v209_v14, %s4280_s15  ;;  %507 = vrot.lane.b32.xlu1 %v208_v15, %s4280_s15 }
  0xf3   :  { %505 = vrot.lane.b32.xlu0 %v207_v16, %s4280_s15  ;;  %v5109_v16 = vld [vmem:[#allocation2 + $0xa0] sm:$0xff] }
  0xf4   :  { %v444_v17 = vpop.permute.xlu2 %443  ;;  %v424_v18 = vpop.permute.xlu1 %423 }
  0xf5   :  { %697 = vst.msk [vmem:[#allocation2 + $0x1d8] sm:$0xff] %vm637_vm1, %v444_v17  ;;  %v422_v19 = vpop.permute.xlu0 %421  ;;  %v5111_v17 = vld [vmem:[#allocation2 + $0xa8] sm:$0xff] }
  0xf6   :  { %687 = vst.msk [vmem:[#allocation2 + $0x188] sm:$0xff] %vm637_vm1, %v424_v18  ;;  %v5115_v18 = vld [vmem:[#allocation2 + $0x98] sm:$0xff] }
  0xf7   :  { %686 = vst.msk [vmem:[#allocation2 + $0x180] sm:$0xff] %vm637_vm1, %v422_v19 }
  0xfa   :  { %515 = vrot.lane.b32.xlu2 %v212_v20, %s4280_s15  ;;  %513 = vrot.lane.b32.xlu1 %v211_v21, %s4280_s15 }
  0xfb   :  { %511 = vrot.lane.b32.xlu0 %v210_v22, %s4280_s15  ;;  %v5124_v22 = vld [vmem:[#allocation2 + $0xb8] sm:$0xff] }
  0xfc   :  { %v450_v23 = vpop.permute.xlu2 %449  ;;  %v430_v24 = vpop.permute.xlu1 %429 }
  0xfd   :  { %700 = vst.msk [vmem:[#allocation2 + $0x1f0] sm:$0xff] %vm637_vm1, %v450_v23  ;;  %v428_v25 = vpop.permute.xlu0 %427  ;;  %v5126_v23 = vld [vmem:[#allocation2 + $0xc0] sm:$0xff] }
  0xfe   :  { %690 = vst.msk [vmem:[#allocation2 + $0x1a0] sm:$0xff] %vm637_vm1, %v430_v24  ;;  %v5130_v24 = vld [vmem:[#allocation2 + $0xb0] sm:$0xff] }
  0xff   :  { %689 = vst.msk [vmem:[#allocation2 + $0x198] sm:$0xff] %vm637_vm1, %v428_v25 }
 0x102   :  { %521 = vrot.lane.b32.xlu2 %v215_v26, %s4280_s15  ;;  %519 = vrot.lane.b32.xlu1 %v214_v27, %s4280_s15 }
 0x103   :  { %517 = vrot.lane.b32.xlu0 %v213_v28, %s4280_s15  ;;  %v5139_v28 = vld [vmem:[#allocation2 + $0xd0] sm:$0xff] }
 0x104   :  { %v456_v29 = vpop.permute.xlu2 %455  ;;  %v436_v30 = vpop.permute.xlu1 %435 }
 0x105   :  { %703 = vst.msk [vmem:[#allocation2 + $0x208] sm:$0xff] %vm637_vm1, %v456_v29  ;;  %v434_v31 = vpop.permute.xlu0 %433  ;;  %v5141_v29 = vld [vmem:[#allocation2 + $0xd8] sm:$0xff] }
 0x106   :  { %693 = vst.msk [vmem:[#allocation2 + $0x1b8] sm:$0xff] %vm637_vm1, %v436_v30  ;;  %v5145_v30 = vld [vmem:[#allocation2 + $0xc8] sm:$0xff] }
 0x107   :  { %692 = vst.msk [vmem:[#allocation2 + $0x1b0] sm:$0xff] %vm637_vm1, %v434_v31 }
 0x10a   :  { %527 = vrot.lane.b32.xlu2 %v218_v32, %s4280_s15  ;;  %525 = vrot.lane.b32.xlu1 %v217_v33, %s4280_s15 }
 0x10b   :  { %523 = vrot.lane.b32.xlu0 %v216_v34, %s4280_s15  ;;  %v5154_v34 = vld [vmem:[#allocation2 + $0xe8] sm:$0xff] }
 0x10c   :  { %v462_v35 = vpop.permute.xlu2 %461  ;;  %v442_v36 = vpop.permute.xlu1 %441 }
 0x10d   :  { %706 = vst.msk [vmem:[#allocation2 + $0x220] sm:$0xff] %vm637_vm1, %v462_v35  ;;  %v440_v37 = vpop.permute.xlu0 %439  ;;  %v5156_v35 = vld [vmem:[#allocation2 + $0xf0] sm:$0xff] }
 0x10e   :  { %696 = vst.msk [vmem:[#allocation2 + $0x1d0] sm:$0xff] %vm637_vm1, %v442_v36  ;;  %v5160_v36 = vld [vmem:[#allocation2 + $0xe0] sm:$0xff] }
 0x10f   :  { %695 = vst.msk [vmem:[#allocation2 + $0x1c8] sm:$0xff] %vm637_vm1, %v440_v37 }
 0x112   :  { %531 = vrot.lane.b32.xlu1 %v220_v38, %s4280_s15  ;;  %980 = vrot.lane.b32.xlu2 %v5010_v40, %s4282_s29 }
 0x113   :  { %529 = vrot.lane.b32.xlu0 %v219_v39, %s4280_s15 }
 0x114   :  { %v468_v41 = vpop.permute.xlu2 %467  ;;  %v448_v42 = vpop.permute.xlu1 %447 }
 0x115   :  { %709 = vst.msk [vmem:[#allocation2 + $0x238] sm:$0xff] %vm637_vm1, %v468_v41  ;;  %v446_v43 = vpop.permute.xlu0 %445  ;;  %v5169_v41 = vld [vmem:[#allocation2 + $0x100] sm:$0xff] }
 0x116   :  { %699 = vst.msk [vmem:[#allocation2 + $0x1e8] sm:$0xff] %vm637_vm1, %v448_v42  ;;  %v5171_v42 = vld [vmem:[#allocation2 + $0x108] sm:$0xff] }
 0x117   :  { %698 = vst.msk [vmem:[#allocation2 + $0x1e0] sm:$0xff] %vm637_vm1, %v446_v43  ;;  %v5175_v43 = vld [vmem:[#allocation2 + $0xf8] sm:$0xff] }
 0x11a   :  { %984 = vrot.lane.b32.xlu1 %v5019_v44, %s4282_s29  ;;  %986 = vrot.lane.b32.xlu2 %v5021_v45, %s4282_s29 }
 0x11b   :  { %982 = vrot.lane.b32.xlu0 %v5027_v46, %s4282_s29 }
 0x11c   :  { %v474_v47 = vpop.permute.xlu2 %473  ;;  %v454_v48 = vpop.permute.xlu1 %453 }
 0x11d   :  { %712 = vst.msk [vmem:[#allocation2 + $0x250] sm:$0xff] %vm637_vm1, %v474_v47  ;;  %v452_v49 = vpop.permute.xlu0 %451 }
 0x11e   :  { %702 = vst.msk [vmem:[#allocation2 + $0x200] sm:$0xff] %vm637_vm1, %v454_v48 }
 0x11f   :  { %701 = vst.msk [vmem:[#allocation2 + $0x1f8] sm:$0xff] %vm637_vm1, %v452_v49 }
 0x122   :  { %990 = vrot.lane.b32.xlu1 %v5034_v50, %s4282_s29  ;;  %992 = vrot.lane.b32.xlu2 %v5036_v51, %s4282_s29 }
 0x123   :  { %988 = vrot.lane.b32.xlu0 %v5040_v52, %s4282_s29 }
 0x124   :  { %v480_v53 = vpop.permute.xlu2 %479  ;;  %v460_v54 = vpop.permute.xlu1 %459 }
 0x125   :  { %715 = vst.msk [vmem:[#allocation2 + $0x268] sm:$0xff] %vm637_vm1, %v480_v53  ;;  %v458_v55 = vpop.permute.xlu0 %457  ;;  %v5185_v53 = vld [vmem:[#allocation2 + $0x118] sm:$0xff] }
 0x126   :  { %705 = vst.msk [vmem:[#allocation2 + $0x218] sm:$0xff] %vm637_vm1, %v460_v54  ;;  %v5187_v54 = vld [vmem:[#allocation2 + $0x120] sm:$0xff] }
 0x127   :  { %704 = vst.msk [vmem:[#allocation2 + $0x210] sm:$0xff] %vm637_vm1, %v458_v55  ;;  %v5191_v55 = vld [vmem:[#allocation2 + $0x110] sm:$0xff] }
 0x12a   :  { %996 = vrot.lane.b32.xlu1 %v5049_v56, %s4282_s29  ;;  %998 = vrot.lane.b32.xlu2 %v5051_v57, %s4282_s29 }
 0x12b   :  { %994 = vrot.lane.b32.xlu0 %v5055_v58, %s4282_s29 }
 0x12c   :  { %v486_v59 = vpop.permute.xlu2 %485  ;;  %v466_v60 = vpop.permute.xlu1 %465 }
 0x12d   :  { %718 = vst.msk [vmem:[#allocation2 + $0x280] sm:$0xff] %vm637_vm1, %v486_v59  ;;  %v464_v61 = vpop.permute.xlu0 %463 }
 0x12e   :  { %708 = vst.msk [vmem:[#allocation2 + $0x230] sm:$0xff] %vm637_vm1, %v466_v60 }
 0x12f   :  { %707 = vst.msk [vmem:[#allocation2 + $0x228] sm:$0xff] %vm637_vm1, %v464_v61 }
 0x132   :  { %1002 = vrot.lane.b32.xlu1 %v5064_v62, %s4282_s29  ;;  %1004 = vrot.lane.b32.xlu2 %v5066_v63, %s4282_s29 }
 0x133   :  { %1000 = vrot.lane.b32.xlu0 %v5070_v0, %s4282_s29 }
 0x134   :  { %v492_v1 = vpop.permute.xlu2 %491  ;;  %v472_v2 = vpop.permute.xlu1 %471 }
 0x135   :  { %721 = vst.msk [vmem:[#allocation2 + $0x298] sm:$0xff] %vm637_vm1, %v492_v1  ;;  %v470_v3 = vpop.permute.xlu0 %469  ;;  %v5201_v1 = vld [vmem:[#allocation2 + $0x130] sm:$0xff] }
 0x136   :  { %711 = vst.msk [vmem:[#allocation2 + $0x248] sm:$0xff] %vm637_vm1, %v472_v2  ;;  %v5203_v2 = vld [vmem:[#allocation2 + $0x138] sm:$0xff] }
 0x137   :  { %710 = vst.msk [vmem:[#allocation2 + $0x240] sm:$0xff] %vm637_vm1, %v470_v3  ;;  %v5207_v3 = vld [vmem:[#allocation2 + $0x128] sm:$0xff] }
 0x13a   :  { %1008 = vrot.lane.b32.xlu1 %v5079_v4, %s4282_s29  ;;  %1010 = vrot.lane.b32.xlu2 %v5081_v5, %s4282_s29 }
 0x13b   :  { %1006 = vrot.lane.b32.xlu0 %v5085_v6, %s4282_s29 }
 0x13c   :  { %v498_v7 = vpop.permute.xlu2 %497  ;;  %v478_v8 = vpop.permute.xlu1 %477 }
 0x13d   :  { %724 = vst.msk [vmem:[#allocation2 + $0x2b0] sm:$0xff] %vm637_vm1, %v498_v7  ;;  %v476_v9 = vpop.permute.xlu0 %475 }
 0x13e   :  { %714 = vst.msk [vmem:[#allocation2 + $0x260] sm:$0xff] %vm637_vm1, %v478_v8 }
 0x13f   :  { %713 = vst.msk [vmem:[#allocation2 + $0x258] sm:$0xff] %vm637_vm1, %v476_v9 }
 0x142   :  { %1014 = vrot.lane.b32.xlu1 %v5094_v10, %s4282_s29  ;;  %1016 = vrot.lane.b32.xlu2 %v5096_v11, %s4282_s29 }
 0x143   :  { %1012 = vrot.lane.b32.xlu0 %v5100_v12, %s4282_s29 }
 0x144   :  { %v504_v13 = vpop.permute.xlu2 %503  ;;  %v484_v14 = vpop.permute.xlu1 %483 }
 0x145   :  { %727 = vst.msk [vmem:[#allocation2 + $0x2c8] sm:$0xff] %vm637_vm1, %v504_v13  ;;  %v482_v15 = vpop.permute.xlu0 %481  ;;  %v5217_v13 = vld [vmem:[#allocation2 + $0x148] sm:$0xff] }
 0x146   :  { %717 = vst.msk [vmem:[#allocation2 + $0x278] sm:$0xff] %vm637_vm1, %v484_v14  ;;  %v5219_v14 = vld [vmem:[#allocation2 + $0x150] sm:$0xff] }
 0x147   :  { %716 = vst.msk [vmem:[#allocation2 + $0x270] sm:$0xff] %vm637_vm1, %v482_v15  ;;  %v5223_v15 = vld [vmem:[#allocation2 + $0x140] sm:$0xff] }
 0x14a   :  { %1020 = vrot.lane.b32.xlu1 %v5109_v16, %s4282_s29  ;;  %1022 = vrot.lane.b32.xlu2 %v5111_v17, %s4282_s29 }
 0x14b   :  { %1018 = vrot.lane.b32.xlu0 %v5115_v18, %s4282_s29 }
 0x14c   :  { %v510_v19 = vpop.permute.xlu2 %509  ;;  %v490_v20 = vpop.permute.xlu1 %489 }
 0x14d   :  { %730 = vst.msk [vmem:[#allocation2 + $0x2e0] sm:$0xff] %vm637_vm1, %v510_v19  ;;  %v488_v21 = vpop.permute.xlu0 %487 }
 0x14e   :  { %720 = vst.msk [vmem:[#allocation2 + $0x290] sm:$0xff] %vm637_vm1, %v490_v20 }
 0x14f   :  { %719 = vst.msk [vmem:[#allocation2 + $0x288] sm:$0xff] %vm637_vm1, %v488_v21 }
 0x152   :  { %1026 = vrot.lane.b32.xlu1 %v5124_v22, %s4282_s29  ;;  %1028 = vrot.lane.b32.xlu2 %v5126_v23, %s4282_s29 }
 0x153   :  { %1024 = vrot.lane.b32.xlu0 %v5130_v24, %s4282_s29 }
 0x154   :  { %v516_v25 = vpop.permute.xlu2 %515  ;;  %v496_v26 = vpop.permute.xlu1 %495 }
 0x155   :  { %733 = vst.msk [vmem:[#allocation2 + $0x2f8] sm:$0xff] %vm637_vm1, %v516_v25  ;;  %v494_v27 = vpop.permute.xlu0 %493  ;;  %v5233_v25 = vld [vmem:[#allocation2 + $0x160] sm:$0xff] }
 0x156   :  { %723 = vst.msk [vmem:[#allocation2 + $0x2a8] sm:$0xff] %vm637_vm1, %v496_v26  ;;  %v5235_v26 = vld [vmem:[#allocation2 + $0x168] sm:$0xff] }
 0x157   :  { %722 = vst.msk [vmem:[#allocation2 + $0x2a0] sm:$0xff] %vm637_vm1, %v494_v27  ;;  %v5239_v27 = vld [vmem:[#allocation2 + $0x158] sm:$0xff] }
 0x15a   :  { %1032 = vrot.lane.b32.xlu1 %v5139_v28, %s4282_s29  ;;  %1034 = vrot.lane.b32.xlu2 %v5141_v29, %s4282_s29 }
 0x15b   :  { %1030 = vrot.lane.b32.xlu0 %v5145_v30, %s4282_s29 }
 0x15c   :  { %v522_v31 = vpop.permute.xlu2 %521  ;;  %v502_v32 = vpop.permute.xlu1 %501 }
 0x15d   :  { %736 = vst.msk [vmem:[#allocation2 + $0x310] sm:$0xff] %vm637_vm1, %v522_v31  ;;  %v500_v33 = vpop.permute.xlu0 %499 }
 0x15e   :  { %726 = vst.msk [vmem:[#allocation2 + $0x2c0] sm:$0xff] %vm637_vm1, %v502_v32 }
 0x15f   :  { %725 = vst.msk [vmem:[#allocation2 + $0x2b8] sm:$0xff] %vm637_vm1, %v500_v33 }
 0x162   :  { %1038 = vrot.lane.b32.xlu1 %v5154_v34, %s4282_s29  ;;  %1040 = vrot.lane.b32.xlu2 %v5156_v35, %s4282_s29 }
 0x163   :  { %1036 = vrot.lane.b32.xlu0 %v5160_v36, %s4282_s29 }
 0x164   :  { %v528_v37 = vpop.permute.xlu2 %527  ;;  %v508_v38 = vpop.permute.xlu1 %507 }
 0x165   :  { %739 = vst.msk [vmem:[#allocation2 + $0x328] sm:$0xff] %vm637_vm1, %v528_v37  ;;  %v506_v39 = vpop.permute.xlu0 %505  ;;  %v5251_v37 = vld [vmem:[#allocation2 + $0x178] sm:$0xff] }
 0x166   :  { %729 = vst.msk [vmem:[#allocation2 + $0x2d8] sm:$0xff] %vm637_vm1, %v508_v38  ;;  %v5253_v38 = vld [vmem:[#allocation2 + $0x180] sm:$0xff] }
 0x167   :  { %728 = vst.msk [vmem:[#allocation2 + $0x2d0] sm:$0xff] %vm637_vm1, %v506_v39  ;;  %v5257_v39 = vld [vmem:[#allocation2 + $0x170] sm:$0xff] }
 0x16a   :  { %1044 = vrot.lane.b32.xlu1 %v5169_v41, %s4282_s29  ;;  %1046 = vrot.lane.b32.xlu2 %v5171_v42, %s4282_s29 }
 0x16b   :  { %1042 = vrot.lane.b32.xlu0 %v5175_v43, %s4282_s29 }
 0x16c   :  { %v514_v47 = vpop.permute.xlu1 %513  ;;  %v5181_v48 = vpop.permute.xlu2 %980 }
 0x16d   :  { %8822 = vst [vmem:[#allocation3_spill] sm:$0xff] %v5181_v48  ;;  %v512_v49 = vpop.permute.xlu0 %511  ;;  %v5323_v48 = vld [vmem:[#allocation2 + $0x1d8] sm:$0xff] }
 0x16e   :  { %732 = vst.msk [vmem:[#allocation2 + $0x2f0] sm:$0xff] %vm637_vm1, %v514_v47 }
 0x16f   :  { %731 = vst.msk [vmem:[#allocation2 + $0x2e8] sm:$0xff] %vm637_vm1, %v512_v49 }
 0x170   :  { %8843 = vst [vmem:[#allocation24_spill] sm:$0xff] %v5323_v48 }
 0x172   :  { %1050 = vrot.lane.b32.xlu1 %v5185_v53, %s4282_s29  ;;  %1052 = vrot.lane.b32.xlu2 %v5187_v54, %s4282_s29 }
 0x173   :  { %1048 = vrot.lane.b32.xlu0 %v5191_v55, %s4282_s29 }
 0x174   :  { %v520_v59 = vpop.permute.xlu1 %519  ;;  %v5197_v60 = vpop.permute.xlu2 %986 }
 0x175   :  { %8823 = vst [vmem:[#allocation4_spill] sm:$0xff] %v5197_v60  ;;  %v518_v61 = vpop.permute.xlu0 %517  ;;  %v5305_v60 = vld [vmem:[#allocation2 + $0x1c0] sm:$0xff] }
 0x176   :  { %735 = vst.msk [vmem:[#allocation2 + $0x308] sm:$0xff] %vm637_vm1, %v520_v59 }
 0x177   :  { %734 = vst.msk [vmem:[#allocation2 + $0x300] sm:$0xff] %vm637_vm1, %v518_v61  ;;  %v5269_v61 = vld [vmem:[#allocation2 + $0x190] sm:$0xff] }
 0x178   :  { %8838 = vst [vmem:[#allocation19_spill] sm:$0xff] %v5305_v60 }
 0x17a   :  { %1056 = vrot.lane.b32.xlu1 %v5201_v1, %s4282_s29  ;;  %1058 = vrot.lane.b32.xlu2 %v5203_v2, %s4282_s29 }
 0x17b   :  { %1054 = vrot.lane.b32.xlu0 %v5207_v3, %s4282_s29 }
 0x17c   :  { %v526_v7 = vpop.permute.xlu1 %525  ;;  %v5213_v8 = vpop.permute.xlu2 %992 }
 0x17d   :  { %8824 = vst [vmem:[#allocation5_spill] sm:$0xff] %v5213_v8  ;;  %v524_v9 = vpop.permute.xlu0 %523  ;;  %v5293_v8 = vld [vmem:[#allocation2 + $0x1a0] sm:$0xff] }
 0x17e   :  { %738 = vst.msk [vmem:[#allocation2 + $0x320] sm:$0xff] %vm637_vm1, %v526_v7  ;;  %v5271_v7 = vld [vmem:[#allocation2 + $0x198] sm:$0xff] }
 0x17f   :  { %737 = vst.msk [vmem:[#allocation2 + $0x318] sm:$0xff] %vm637_vm1, %v524_v9  ;;  %v5275_v9 = vld [vmem:[#allocation2 + $0x188] sm:$0xff] }
 0x182   :  { %1062 = vrot.lane.b32.xlu1 %v5217_v13, %s4282_s29  ;;  %1064 = vrot.lane.b32.xlu2 %v5219_v14, %s4282_s29 }
 0x183   :  { %1060 = vrot.lane.b32.xlu0 %v5223_v15, %s4282_s29 }
 0x184   :  { %v532_v19 = vpop.permute.xlu1 %531  ;;  %v5229_v20 = vpop.permute.xlu2 %998 }
 0x185   :  { %8825 = vst [vmem:[#allocation6_spill] sm:$0xff] %v5229_v20  ;;  %v530_v21 = vpop.permute.xlu0 %529  ;;  %v5289_v20 = vld [vmem:[#allocation2 + $0x1b0] sm:$0xff] }
 0x186   :  { %741 = vst.msk [vmem:[#allocation2 + $0x338] sm:$0xff] %vm637_vm1, %v532_v19 }
 0x187   :  { %740 = vst.msk [vmem:[#allocation2 + $0x330] sm:$0xff] %vm637_vm1, %v530_v21 }
 0x18a   :  { %1068 = vrot.lane.b32.xlu1 %v5233_v25, %s4282_s29  ;;  %1070 = vrot.lane.b32.xlu2 %v5235_v26, %s4282_s29 }
 0x18b   :  { %1066 = vrot.lane.b32.xlu0 %v5239_v27, %s4282_s29 }
 0x18c   :  { %v5245_v31 = vpop.permute.xlu1 %984  ;;  %v5247_v32 = vpop.permute.xlu2 %1004 }
 0x18d   :  { %8826 = vst [vmem:[#allocation7_spill] sm:$0xff] %v5245_v31  ;;  %v5249_v33 = vpop.permute.xlu0 %982  ;;  %v5329_v31 = vld [vmem:[#allocation2 + $0x1d0] sm:$0xff] }
 0x18e   :  { %8827 = vst [vmem:[#allocation8_spill] sm:$0xff] %v5247_v32  ;;  %v5287_v32 = vld [vmem:[#allocation2 + $0x1a8] sm:$0xff] }
 0x18f   :  { %8828 = vst [vmem:[#allocation9_spill] sm:$0xff] %v5249_v33  ;;  %v5325_v33 = vld [vmem:[#allocation2 + $0x1e0] sm:$0xff] }
 0x190   :  { %8844 = vst [vmem:[#allocation25_spill] sm:$0xff] %v5325_v33 }
 0x191   :  { %8845 = vst [vmem:[#allocation26_spill] sm:$0xff] %v5329_v31 }
 0x192   :  { %1074 = vrot.lane.b32.xlu1 %v5251_v37, %s4282_s29  ;;  %1076 = vrot.lane.b32.xlu2 %v5253_v38, %s4282_s29 }
 0x193   :  { %1072 = vrot.lane.b32.xlu0 %v5257_v39, %s4282_s29 }
 0x194   :  { %v5263_v47 = vpop.permute.xlu1 %990  ;;  %v5265_v49 = vpop.permute.xlu2 %1010 }
 0x195   :  { %8829 = vst [vmem:[#allocation10_spill] sm:$0xff] %v5263_v47  ;;  %v5267_v59 = vpop.permute.xlu0 %988  ;;  %v5311_v47 = vld [vmem:[#allocation2 + $0x1b8] sm:$0xff] }
 0x196   :  { %8830 = vst [vmem:[#allocation11_spill] sm:$0xff] %v5265_v49 }
 0x197   :  { %8831 = vst [vmem:[#allocation12_spill] sm:$0xff] %v5267_v59  ;;  %v5307_v59 = vld [vmem:[#allocation2 + $0x1c8] sm:$0xff] }
 0x198   :  { %8839 = vst [vmem:[#allocation20_spill] sm:$0xff] %v5307_v59 }
 0x19a   :  { %1080 = vrot.lane.b32.xlu1 %v5269_v61, %s4282_s29  ;;  %1082 = vrot.lane.b32.xlu2 %v5271_v7, %s4282_s29 }
 0x19b   :  { %1078 = vrot.lane.b32.xlu0 %v5275_v9, %s4282_s29 }
 0x19c   :  { %v5281_v19 = vpop.permute.xlu1 %996  ;;  %v5283_v21 = vpop.permute.xlu2 %1016 }
 0x19d   :  { %8832 = vst [vmem:[#allocation13_spill] sm:$0xff] %v5281_v19  ;;  %v5285_v49 = vpop.permute.xlu0 %994 }
 0x19e   :  { %8833 = vst [vmem:[#allocation14_spill] sm:$0xff] %v5283_v21 }
 0x19f   :  { %8834 = vst [vmem:[#allocation15_spill] sm:$0xff] %v5285_v49 }
 0x1a2   :  { %1086 = vrot.lane.b32.xlu1 %v5287_v32, %s4282_s29  ;;  %1088 = vrot.lane.b32.xlu2 %v5289_v20, %s4282_s29 }
 0x1a3   :  { %1084 = vrot.lane.b32.xlu0 %v5293_v8, %s4282_s29 }
 0x1a4   :  { %v5299_v19 = vpop.permute.xlu1 %1002  ;;  %v5301_v21 = vpop.permute.xlu2 %1022 }
 0x1a5   :  { %8835 = vst [vmem:[#allocation16_spill] sm:$0xff] %v5299_v19  ;;  %v5303_v49 = vpop.permute.xlu0 %1000 }
 0x1a6   :  { %8836 = vst [vmem:[#allocation17_spill] sm:$0xff] %v5301_v21 }
 0x1a7   :  { %8837 = vst [vmem:[#allocation18_spill] sm:$0xff] %v5303_v49 }
 0x1aa   :  { %1092 = vrot.lane.b32.xlu1 %v5305_v60, %s4282_s29  ;;  %1094 = vrot.lane.b32.xlu2 %v5307_v59, %s4282_s29  ;;  %v5341_v60 = vld [vmem:[#allocation2 + $0x1f0] sm:$0xff]  ;;  %v5343_v59 = vld [vmem:[#allocation2 + $0x1f8] sm:$0xff] }
 0x1ab   :  { %1090 = vrot.lane.b32.xlu0 %v5311_v47, %s4282_s29  ;;  %8849 = vst [vmem:[#allocation30_spill] sm:$0xff] %v5341_v60 }
 0x1ac   :  { %v5317_v19 = vpop.permute.xlu1 %1008  ;;  %v5319_v21 = vpop.permute.xlu2 %1028  ;;  %8850 = vst [vmem:[#allocation31_spill] sm:$0xff] %v5343_v59 }
 0x1ad   :  { %8840 = vst [vmem:[#allocation21_spill] sm:$0xff] %v5317_v19  ;;  %v5321_v49 = vpop.permute.xlu0 %1006 }
 0x1ae   :  { %8841 = vst [vmem:[#allocation22_spill] sm:$0xff] %v5319_v21 }
 0x1af   :  { %8842 = vst [vmem:[#allocation23_spill] sm:$0xff] %v5321_v49 }
 0x1b2   :  { %1098 = vrot.lane.b32.xlu1 %v5323_v48, %s4282_s29  ;;  %1100 = vrot.lane.b32.xlu2 %v5325_v33, %s4282_s29  ;;  %v5347_v48 = vld [vmem:[#allocation2 + $0x1e8] sm:$0xff] }
 0x1b3   :  { %1096 = vrot.lane.b32.xlu0 %v5329_v31, %s4282_s29  ;;  %8851 = vst [vmem:[#allocation32_spill] sm:$0xff] %v5347_v48  ;;  %v5359_v33 = vld [vmem:[#allocation2 + $0x208] sm:$0xff]  ;;  %v5361_v31 = vld [vmem:[#allocation2 + $0x210] sm:$0xff] }
 0x1b4   :  { %v5335_v19 = vpop.permute.xlu1 %1014  ;;  %v5337_v21 = vpop.permute.xlu2 %1034  ;;  %8855 = vst [vmem:[#allocation36_spill] sm:$0xff] %v5359_v33 }
 0x1b5   :  { %8846 = vst [vmem:[#allocation27_spill] sm:$0xff] %v5335_v19  ;;  %v5339_v49 = vpop.permute.xlu0 %1012 }
 0x1b6   :  { %8847 = vst [vmem:[#allocation28_spill] sm:$0xff] %v5337_v21 }
 0x1b7   :  { %8848 = vst [vmem:[#allocation29_spill] sm:$0xff] %v5339_v49 }
 0x1b8   :  { %8856 = vst [vmem:[#allocation37_spill] sm:$0xff] %v5361_v31 }
 0x1ba   :  { %1104 = vrot.lane.b32.xlu1 %v5341_v60, %s4282_s29  ;;  %1106 = vrot.lane.b32.xlu2 %v5343_v59, %s4282_s29  ;;  %v5365_v60 = vld [vmem:[#allocation2 + $0x200] sm:$0xff] }
 0x1bb   :  { %1102 = vrot.lane.b32.xlu0 %v5347_v48, %s4282_s29  ;;  %8857 = vst [vmem:[#allocation38_spill] sm:$0xff] %v5365_v60  ;;  %v5377_v59 = vld [vmem:[#allocation2 + $0x220] sm:$0xff]  ;;  %v5379_v48 = vld [vmem:[#allocation2 + $0x228] sm:$0xff] }
 0x1bc   :  { %v5353_v19 = vpop.permute.xlu1 %1020  ;;  %v5355_v21 = vpop.permute.xlu2 %1040  ;;  %8861 = vst [vmem:[#allocation42_spill] sm:$0xff] %v5377_v59 }
 0x1bd   :  { %8852 = vst [vmem:[#allocation33_spill] sm:$0xff] %v5353_v19  ;;  %v5357_v49 = vpop.permute.xlu0 %1018 }
 0x1be   :  { %8853 = vst [vmem:[#allocation34_spill] sm:$0xff] %v5355_v21 }
 0x1bf   :  { %8854 = vst [vmem:[#allocation35_spill] sm:$0xff] %v5357_v49 }
 0x1c0   :  { %8862 = vst [vmem:[#allocation43_spill] sm:$0xff] %v5379_v48 }
 0x1c2   :  { %1110 = vrot.lane.b32.xlu1 %v5359_v33, %s4282_s29  ;;  %1112 = vrot.lane.b32.xlu2 %v5361_v31, %s4282_s29  ;;  %v5383_v33 = vld [vmem:[#allocation2 + $0x218] sm:$0xff] }
 0x1c3   :  { %1108 = vrot.lane.b32.xlu0 %v5365_v60, %s4282_s29  ;;  %8863 = vst [vmem:[#allocation44_spill] sm:$0xff] %v5383_v33  ;;  %v5395_v31 = vld [vmem:[#allocation2 + $0x238] sm:$0xff]  ;;  %v5397_v60 = vld [vmem:[#allocation2 + $0x240] sm:$0xff] }
 0x1c4   :  { %v5371_v19 = vpop.permute.xlu1 %1026  ;;  %v5373_v21 = vpop.permute.xlu2 %1046  ;;  %8867 = vst [vmem:[#allocation48_spill] sm:$0xff] %v5395_v31 }
 0x1c5   :  { %8858 = vst [vmem:[#allocation39_spill] sm:$0xff] %v5371_v19  ;;  %v5375_v49 = vpop.permute.xlu0 %1024 }
 0x1c6   :  { %8859 = vst [vmem:[#allocation40_spill] sm:$0xff] %v5373_v21 }
 0x1c7   :  { %8860 = vst [vmem:[#allocation41_spill] sm:$0xff] %v5375_v49 }
 0x1c8   :  { %8868 = vst [vmem:[#allocation49_spill] sm:$0xff] %v5397_v60 }
 0x1ca   :  { %1116 = vrot.lane.b32.xlu1 %v5377_v59, %s4282_s29  ;;  %1118 = vrot.lane.b32.xlu2 %v5379_v48, %s4282_s29  ;;  %v5401_v59 = vld [vmem:[#allocation2 + $0x230] sm:$0xff] }
 0x1cb   :  { %1114 = vrot.lane.b32.xlu0 %v5383_v33, %s4282_s29  ;;  %8869 = vst [vmem:[#allocation50_spill] sm:$0xff] %v5401_v59  ;;  %v5413_v48 = vld [vmem:[#allocation2 + $0x250] sm:$0xff]  ;;  %v5415_v33 = vld [vmem:[#allocation2 + $0x258] sm:$0xff] }
 0x1cc   :  { %v5389_v19 = vpop.permute.xlu1 %1032  ;;  %v5391_v21 = vpop.permute.xlu2 %1052  ;;  %8873 = vst [vmem:[#allocation54_spill] sm:$0xff] %v5413_v48 }
 0x1cd   :  { %8864 = vst [vmem:[#allocation45_spill] sm:$0xff] %v5389_v19  ;;  %v5393_v49 = vpop.permute.xlu0 %1030 }
 0x1ce   :  { %8865 = vst [vmem:[#allocation46_spill] sm:$0xff] %v5391_v21 }
 0x1cf   :  { %8866 = vst [vmem:[#allocation47_spill] sm:$0xff] %v5393_v49 }
 0x1d0   :  { %8874 = vst [vmem:[#allocation55_spill] sm:$0xff] %v5415_v33 }
 0x1d2   :  { %1122 = vrot.lane.b32.xlu1 %v5395_v31, %s4282_s29  ;;  %1124 = vrot.lane.b32.xlu2 %v5397_v60, %s4282_s29  ;;  %v5419_v31 = vld [vmem:[#allocation2 + $0x248] sm:$0xff] }
 0x1d3   :  { %1120 = vrot.lane.b32.xlu0 %v5401_v59, %s4282_s29  ;;  %8875 = vst [vmem:[#allocation56_spill] sm:$0xff] %v5419_v31  ;;  %v5431_v60 = vld [vmem:[#allocation2 + $0x268] sm:$0xff]  ;;  %v5433_v59 = vld [vmem:[#allocation2 + $0x270] sm:$0xff] }
 0x1d4   :  { %v5407_v19 = vpop.permute.xlu1 %1038  ;;  %v5409_v21 = vpop.permute.xlu2 %1058  ;;  %8879 = vst [vmem:[#allocation60_spill] sm:$0xff] %v5431_v60 }
 0x1d5   :  { %8870 = vst [vmem:[#allocation51_spill] sm:$0xff] %v5407_v19  ;;  %v5411_v49 = vpop.permute.xlu0 %1036 }
 0x1d6   :  { %8871 = vst [vmem:[#allocation52_spill] sm:$0xff] %v5409_v21 }
 0x1d7   :  { %8872 = vst [vmem:[#allocation53_spill] sm:$0xff] %v5411_v49 }
 0x1d8   :  { %8880 = vst [vmem:[#allocation61_spill] sm:$0xff] %v5433_v59 }
 0x1da   :  { %1128 = vrot.lane.b32.xlu1 %v5413_v48, %s4282_s29  ;;  %1130 = vrot.lane.b32.xlu2 %v5415_v33, %s4282_s29  ;;  %v5437_v48 = vld [vmem:[#allocation2 + $0x260] sm:$0xff] }
 0x1db   :  { %1126 = vrot.lane.b32.xlu0 %v5419_v31, %s4282_s29  ;;  %8881 = vst [vmem:[#allocation62_spill] sm:$0xff] %v5437_v48  ;;  %v5449_v33 = vld [vmem:[#allocation2 + $0x280] sm:$0xff]  ;;  %v5451_v31 = vld [vmem:[#allocation2 + $0x288] sm:$0xff] }
 0x1dc   :  { %v5425_v19 = vpop.permute.xlu1 %1044  ;;  %v5427_v21 = vpop.permute.xlu2 %1064  ;;  %8885 = vst [vmem:[#allocation66_spill] sm:$0xff] %v5449_v33 }
 0x1dd   :  { %8876 = vst [vmem:[#allocation57_spill] sm:$0xff] %v5425_v19  ;;  %v5429_v49 = vpop.permute.xlu0 %1042 }
 0x1de   :  { %8877 = vst [vmem:[#allocation58_spill] sm:$0xff] %v5427_v21 }
 0x1df   :  { %8878 = vst [vmem:[#allocation59_spill] sm:$0xff] %v5429_v49 }
 0x1e0   :  { %8886 = vst [vmem:[#allocation67_spill] sm:$0xff] %v5451_v31 }
 0x1e2   :  { %1134 = vrot.lane.b32.xlu1 %v5431_v60, %s4282_s29  ;;  %1136 = vrot.lane.b32.xlu2 %v5433_v59, %s4282_s29  ;;  %v5455_v60 = vld [vmem:[#allocation2 + $0x278] sm:$0xff] }
 0x1e3   :  { %1132 = vrot.lane.b32.xlu0 %v5437_v48, %s4282_s29  ;;  %8887 = vst [vmem:[#allocation68_spill] sm:$0xff] %v5455_v60  ;;  %v5467_v59 = vld [vmem:[#allocation2 + $0x298] sm:$0xff]  ;;  %v5469_v48 = vld [vmem:[#allocation2 + $0x2a0] sm:$0xff] }
 0x1e4   :  { %v5443_v19 = vpop.permute.xlu1 %1050  ;;  %v5445_v21 = vpop.permute.xlu2 %1070  ;;  %8891 = vst [vmem:[#allocation72_spill] sm:$0xff] %v5467_v59 }
 0x1e5   :  { %8882 = vst [vmem:[#allocation63_spill] sm:$0xff] %v5443_v19  ;;  %v5447_v49 = vpop.permute.xlu0 %1048 }
 0x1e6   :  { %8883 = vst [vmem:[#allocation64_spill] sm:$0xff] %v5445_v21 }
 0x1e7   :  { %8884 = vst [vmem:[#allocation65_spill] sm:$0xff] %v5447_v49 }
 0x1e8   :  { %8892 = vst [vmem:[#allocation73_spill] sm:$0xff] %v5469_v48 }
 0x1ea   :  { %1140 = vrot.lane.b32.xlu1 %v5449_v33, %s4282_s29  ;;  %1142 = vrot.lane.b32.xlu2 %v5451_v31, %s4282_s29  ;;  %v5473_v33 = vld [vmem:[#allocation2 + $0x290] sm:$0xff] }
 0x1eb   :  { %1138 = vrot.lane.b32.xlu0 %v5455_v60, %s4282_s29  ;;  %8893 = vst [vmem:[#allocation74_spill] sm:$0xff] %v5473_v33  ;;  %v5485_v31 = vld [vmem:[#allocation2 + $0x2b0] sm:$0xff]  ;;  %v5487_v60 = vld [vmem:[#allocation2 + $0x2b8] sm:$0xff] }
 0x1ec   :  { %v5461_v19 = vpop.permute.xlu1 %1056  ;;  %v5463_v21 = vpop.permute.xlu2 %1076  ;;  %8897 = vst [vmem:[#allocation78_spill] sm:$0xff] %v5485_v31 }
 0x1ed   :  { %8888 = vst [vmem:[#allocation69_spill] sm:$0xff] %v5461_v19  ;;  %v5465_v49 = vpop.permute.xlu0 %1054 }
 0x1ee   :  { %8889 = vst [vmem:[#allocation70_spill] sm:$0xff] %v5463_v21 }
 0x1ef   :  { %8890 = vst [vmem:[#allocation71_spill] sm:$0xff] %v5465_v49 }
 0x1f0   :  { %8898 = vst [vmem:[#allocation79_spill] sm:$0xff] %v5487_v60 }
 0x1f2   :  { %1146 = vrot.lane.b32.xlu1 %v5467_v59, %s4282_s29  ;;  %1148 = vrot.lane.b32.xlu2 %v5469_v48, %s4282_s29  ;;  %v5491_v59 = vld [vmem:[#allocation2 + $0x2a8] sm:$0xff] }
 0x1f3   :  { %1144 = vrot.lane.b32.xlu0 %v5473_v33, %s4282_s29  ;;  %8899 = vst [vmem:[#allocation80_spill] sm:$0xff] %v5491_v59  ;;  %v5503_v48 = vld [vmem:[#allocation2 + $0x2c8] sm:$0xff]  ;;  %v5505_v33 = vld [vmem:[#allocation2 + $0x2d0] sm:$0xff] }
 0x1f4   :  { %v5479_v19 = vpop.permute.xlu1 %1062  ;;  %v5481_v21 = vpop.permute.xlu2 %1082  ;;  %8903 = vst [vmem:[#allocation84_spill] sm:$0xff] %v5503_v48 }
 0x1f5   :  { %8894 = vst [vmem:[#allocation75_spill] sm:$0xff] %v5479_v19  ;;  %v5483_v49 = vpop.permute.xlu0 %1060 }
 0x1f6   :  { %8895 = vst [vmem:[#allocation76_spill] sm:$0xff] %v5481_v21 }
 0x1f7   :  { %8896 = vst [vmem:[#allocation77_spill] sm:$0xff] %v5483_v49 }
 0x1f8   :  { %8904 = vst [vmem:[#allocation85_spill] sm:$0xff] %v5505_v33 }
 0x1fa   :  { %1152 = vrot.lane.b32.xlu1 %v5485_v31, %s4282_s29  ;;  %1154 = vrot.lane.b32.xlu2 %v5487_v60, %s4282_s29  ;;  %v5509_v31 = vld [vmem:[#allocation2 + $0x2c0] sm:$0xff] }
 0x1fb   :  { %1150 = vrot.lane.b32.xlu0 %v5491_v59, %s4282_s29  ;;  %8905 = vst [vmem:[#allocation86_spill] sm:$0xff] %v5509_v31  ;;  %v5521_v60 = vld [vmem:[#allocation2 + $0x2e0] sm:$0xff]  ;;  %v5523_v59 = vld [vmem:[#allocation2 + $0x2e8] sm:$0xff] }
 0x1fc   :  { %v5497_v19 = vpop.permute.xlu1 %1068  ;;  %v5499_v21 = vpop.permute.xlu2 %1088  ;;  %8909 = vst [vmem:[#allocation90_spill] sm:$0xff] %v5521_v60 }
 0x1fd   :  { %8900 = vst [vmem:[#allocation81_spill] sm:$0xff] %v5497_v19  ;;  %v5501_v49 = vpop.permute.xlu0 %1066 }
 0x1fe   :  { %8901 = vst [vmem:[#allocation82_spill] sm:$0xff] %v5499_v21 }
 0x1ff   :  { %8902 = vst [vmem:[#allocation83_spill] sm:$0xff] %v5501_v49 }
 0x200   :  { %8910 = vst [vmem:[#allocation91_spill] sm:$0xff] %v5523_v59 }
 0x202   :  { %1158 = vrot.lane.b32.xlu1 %v5503_v48, %s4282_s29  ;;  %1160 = vrot.lane.b32.xlu2 %v5505_v33, %s4282_s29  ;;  %v5527_v48 = vld [vmem:[#allocation2 + $0x2d8] sm:$0xff] }
 0x203   :  { %1156 = vrot.lane.b32.xlu0 %v5509_v31, %s4282_s29  ;;  %8911 = vst [vmem:[#allocation92_spill] sm:$0xff] %v5527_v48  ;;  %v5539_v33 = vld [vmem:[#allocation2 + $0x2f8] sm:$0xff]  ;;  %v5541_v31 = vld [vmem:[#allocation2 + $0x300] sm:$0xff] }
 0x204   :  { %v5515_v19 = vpop.permute.xlu1 %1074  ;;  %v5517_v21 = vpop.permute.xlu2 %1094  ;;  %8915 = vst [vmem:[#allocation96_spill] sm:$0xff] %v5539_v33 }
 0x205   :  { %8906 = vst [vmem:[#allocation87_spill] sm:$0xff] %v5515_v19  ;;  %v5519_v49 = vpop.permute.xlu0 %1072 }
 0x206   :  { %8907 = vst [vmem:[#allocation88_spill] sm:$0xff] %v5517_v21 }
 0x207   :  { %8908 = vst [vmem:[#allocation89_spill] sm:$0xff] %v5519_v49 }
 0x208   :  { %8916 = vst [vmem:[#allocation97_spill] sm:$0xff] %v5541_v31 }
 0x20a   :  { %1164 = vrot.lane.b32.xlu1 %v5521_v60, %s4282_s29  ;;  %1166 = vrot.lane.b32.xlu2 %v5523_v59, %s4282_s29  ;;  %v5545_v60 = vld [vmem:[#allocation2 + $0x2f0] sm:$0xff] }
 0x20b   :  { %1162 = vrot.lane.b32.xlu0 %v5527_v48, %s4282_s29  ;;  %8917 = vst [vmem:[#allocation98_spill] sm:$0xff] %v5545_v60  ;;  %v5557_v59 = vld [vmem:[#allocation2 + $0x310] sm:$0xff]  ;;  %v5559_v48 = vld [vmem:[#allocation2 + $0x318] sm:$0xff] }
 0x20c   :  { %v5533_v19 = vpop.permute.xlu1 %1080  ;;  %v5535_v21 = vpop.permute.xlu2 %1100  ;;  %8921 = vst [vmem:[#allocation102_spill] sm:$0xff] %v5557_v59 }
 0x20d   :  { %8912 = vst [vmem:[#allocation93_spill] sm:$0xff] %v5533_v19  ;;  %v5537_v49 = vpop.permute.xlu0 %1078 }
 0x20e   :  { %8913 = vst [vmem:[#allocation94_spill] sm:$0xff] %v5535_v21 }
 0x20f   :  { %8914 = vst [vmem:[#allocation95_spill] sm:$0xff] %v5537_v49 }
 0x210   :  { %8922 = vst [vmem:[#allocation103_spill] sm:$0xff] %v5559_v48 }
 0x212   :  { %1170 = vrot.lane.b32.xlu1 %v5539_v33, %s4282_s29  ;;  %1172 = vrot.lane.b32.xlu2 %v5541_v31, %s4282_s29  ;;  %v5563_v33 = vld [vmem:[#allocation2 + $0x308] sm:$0xff] }
 0x213   :  { %1168 = vrot.lane.b32.xlu0 %v5545_v60, %s4282_s29  ;;  %v5575_v31 = vld [vmem:[#allocation2 + $0x328] sm:$0xff]  ;;  %v5577_v60 = vld [vmem:[#allocation2 + $0x330] sm:$0xff] }
 0x214   :  { %v5551_v19 = vpop.permute.xlu1 %1086  ;;  %v5553_v21 = vpop.permute.xlu2 %1106  ;;  %8926 = vst [vmem:[#allocation107_spill] sm:$0xff] %v5575_v31 }
 0x215   :  { %8918 = vst [vmem:[#allocation99_spill] sm:$0xff] %v5551_v19  ;;  %v5555_v49 = vpop.permute.xlu0 %1084 }
 0x216   :  { %8919 = vst [vmem:[#allocation100_spill] sm:$0xff] %v5553_v21 }
 0x217   :  { %8920 = vst [vmem:[#allocation101_spill] sm:$0xff] %v5555_v49 }
 0x218   :  { %8927 = vst [vmem:[#allocation108_spill] sm:$0xff] %v5577_v60 }
 0x21a   :  { %1176 = vrot.lane.b32.xlu1 %v5557_v59, %s4282_s29  ;;  %1178 = vrot.lane.b32.xlu2 %v5559_v48, %s4282_s29  ;;  %v5581_v59 = vld [vmem:[#allocation2 + $0x320] sm:$0xff]  ;;  %v5595_v48 = vld [vmem:[#allocation2 + $0x338] sm:$0xff] }
 0x21b   :  { %1174 = vrot.lane.b32.xlu0 %v5563_v33, %s4282_s29 }
 0x21c   :  { %v5569_v19 = vpop.permute.xlu1 %1092  ;;  %v5571_v21 = vpop.permute.xlu2 %1112 }
 0x21d   :  { %8923 = vst [vmem:[#allocation104_spill] sm:$0xff] %v5569_v19  ;;  %v5573_v49 = vpop.permute.xlu0 %1090 }
 0x21e   :  { %8924 = vst [vmem:[#allocation105_spill] sm:$0xff] %v5571_v21 }
 0x21f   :  { %8925 = vst [vmem:[#allocation106_spill] sm:$0xff] %v5573_v49 }
 0x222   :  { %1182 = vrot.lane.b32.xlu1 %v5575_v31, %s4282_s29  ;;  %1184 = vrot.lane.b32.xlu2 %v5577_v60, %s4282_s29 }
 0x223   :  { %1180 = vrot.lane.b32.xlu0 %v5581_v59, %s4282_s29 }
 0x224   :  { %v5587_v19 = vpop.permute.xlu1 %1098  ;;  %v5589_v21 = vpop.permute.xlu2 %1118 }
 0x225   :  { %8928 = vst [vmem:[#allocation109_spill] sm:$0xff] %v5587_v19  ;;  %v5591_v49 = vpop.permute.xlu0 %1096 }
 0x226   :  { %8929 = vst [vmem:[#allocation110_spill] sm:$0xff] %v5589_v21 }
 0x227   :  { %8930 = vst [vmem:[#allocation111_spill] sm:$0xff] %v5591_v49  ;;  %v4284_v49 = vmov 0  }
 0x22a   :  { %1398 = vrot.lane.b32.xlu1 %v5010_v40, %s4283_s30  ;;  %1400 = vrot.lane.b32.xlu2 %v5027_v46, %s4283_s30 }
 0x22b   :  { %1186 = vrot.lane.b32.xlu0 %v5595_v48, %s4282_s29 }
 0x22c   :  { %v5601_v31 = vpop.permute.xlu1 %1104  ;;  %v5603_v60 = vpop.permute.xlu2 %1124 }
 0x22d   :  { %8931 = vst [vmem:[#allocation112_spill] sm:$0xff] %v5601_v31  ;;  %v5605_v19 = vpop.permute.xlu0 %1102 }
 0x22e   :  { %8932 = vst [vmem:[#allocation113_spill] sm:$0xff] %v5603_v60 }
 0x22f   :  { %8933 = vst [vmem:[#allocation114_spill] sm:$0xff] %v5605_v19  ;;  %v9011_v19 = vld [vmem:[#allocation91_spill] sm:$0xff] }
 0x232   :  { %1404 = vrot.lane.b32.xlu1 %v5021_v45, %s4283_s30  ;;  %1406 = vrot.lane.b32.xlu2 %v5040_v52, %s4283_s30 }
 0x233   :  { %1402 = vrot.lane.b32.xlu0 %v5019_v44, %s4283_s30 }
 0x234   :  { %v5613_v40 = vpop.permute.xlu1 %1110  ;;  %v5615_v46 = vpop.permute.xlu2 %1130 }
 0x235   :  { %8934 = vst [vmem:[#allocation115_spill] sm:$0xff] %v5613_v40  ;;  %v5617_v21 = vpop.permute.xlu0 %1108 }
 0x236   :  { %8935 = vst [vmem:[#allocation116_spill] sm:$0xff] %v5615_v46  ;;  %v742_v46 = vlaneseq }
 0x237   :  { %8936 = vst [vmem:[#allocation117_spill] sm:$0xff] %v5617_v21 }
 0x23a   :  { %1410 = vrot.lane.b32.xlu1 %v5036_v51, %s4283_s30  ;;  %1412 = vrot.lane.b32.xlu2 %v5055_v58, %s4283_s30 }
 0x23b   :  { %1408 = vrot.lane.b32.xlu0 %v5034_v50, %s4283_s30 }
 0x23c   :  { %v5625_v45 = vpop.permute.xlu1 %1116  ;;  %v5627_v52 = vpop.permute.xlu2 %1136 }
 0x23d   :  { %8937 = vst [vmem:[#allocation118_spill] sm:$0xff] %v5625_v45  ;;  %v5629_v44 = vpop.permute.xlu0 %1114  ;;  %v8995_v45 = vld [vmem:[#allocation67_spill] sm:$0xff] }
 0x23e   :  { %8938 = vst [vmem:[#allocation119_spill] sm:$0xff] %v5627_v52 }
 0x23f   :  { %8939 = vst [vmem:[#allocation120_spill] sm:$0xff] %v5629_v44  ;;  %v8981_v44 = vld [vmem:[#allocation44_spill] sm:$0xff] }
 0x242   :  { %1416 = vrot.lane.b32.xlu1 %v5051_v57, %s4283_s30  ;;  %1418 = vrot.lane.b32.xlu2 %v5070_v0, %s4283_s30 }
 0x243   :  { %1414 = vrot.lane.b32.xlu0 %v5049_v56, %s4283_s30 }
 0x244   :  { %v5637_v51 = vpop.permute.xlu1 %1122  ;;  %v5639_v58 = vpop.permute.xlu2 %1142 }
 0x245   :  { %8940 = vst [vmem:[#allocation121_spill] sm:$0xff] %v5637_v51  ;;  %v5641_v50 = vpop.permute.xlu0 %1120  ;;  %v8990_v51 = vld [vmem:[#allocation62_spill] sm:$0xff] }
 0x246   :  { %8941 = vst [vmem:[#allocation122_spill] sm:$0xff] %v5639_v58  ;;  %v8971_v58 = vld [vmem:[#allocation20_spill] sm:$0xff] }
 0x247   :  { %8942 = vst [vmem:[#allocation123_spill] sm:$0xff] %v5641_v50  ;;  %v8999_v50 = vld [vmem:[#allocation80_spill] sm:$0xff] }
 0x24a   :  { %1422 = vrot.lane.b32.xlu1 %v5066_v63, %s4283_s30  ;;  %1424 = vrot.lane.b32.xlu2 %v5085_v6, %s4283_s30 }
 0x24b   :  { %1420 = vrot.lane.b32.xlu0 %v5064_v62, %s4283_s30 }
 0x24c   :  { %v5649_v57 = vpop.permute.xlu1 %1128  ;;  %v5651_v0 = vpop.permute.xlu2 %1148 }
 0x24d   :  { %8943 = vst [vmem:[#allocation124_spill] sm:$0xff] %v5649_v57  ;;  %v5653_v56 = vpop.permute.xlu0 %1126  ;;  %v8986_v57 = vld [vmem:[#allocation49_spill] sm:$0xff] }
 0x24e   :  { %8944 = vst [vmem:[#allocation125_spill] sm:$0xff] %v5651_v0  ;;  %v8975_v0 = vld [vmem:[#allocation32_spill] sm:$0xff] }
 0x24f   :  { %8945 = vst [vmem:[#allocation126_spill] sm:$0xff] %v5653_v56 }
 0x252   :  { %1428 = vrot.lane.b32.xlu1 %v5081_v5, %s4283_s30  ;;  %1430 = vrot.lane.b32.xlu2 %v5100_v12, %s4283_s30 }
 0x253   :  { %1426 = vrot.lane.b32.xlu0 %v5079_v4, %s4283_s30 }
 0x254   :  { %v5661_v63 = vpop.permute.xlu1 %1134  ;;  %v5663_v6 = vpop.permute.xlu2 %1154 }
 0x255   :  { %8946 = vst [vmem:[#allocation127_spill] sm:$0xff] %v5661_v63  ;;  %v5665_v62 = vpop.permute.xlu0 %1132  ;;  %v8989_v63 = vld [vmem:[#allocation55_spill] sm:$0xff] }
 0x256   :  { %8947 = vst [vmem:[#allocation128_spill] sm:$0xff] %v5663_v6 }
 0x257   :  { %8948 = vst [vmem:[#allocation129_spill] sm:$0xff] %v5665_v62  ;;  %v9002_v62 = vld [vmem:[#allocation79_spill] sm:$0xff] }
 0x25a   :  { %1434 = vrot.lane.b32.xlu1 %v5096_v11, %s4283_s30  ;;  %1436 = vrot.lane.b32.xlu2 %v5115_v18, %s4283_s30 }
 0x25b   :  { %1432 = vrot.lane.b32.xlu0 %v5094_v10, %s4283_s30 }
 0x25c   :  { %v5673_v5 = vpop.permute.xlu1 %1140  ;;  %v5675_v12 = vpop.permute.xlu2 %1160 }
 0x25d   :  { %8949 = vst [vmem:[#allocation130_spill] sm:$0xff] %v5673_v5  ;;  %v5677_v4 = vpop.permute.xlu0 %1138  ;;  %v8977_v5 = vld [vmem:[#allocation31_spill] sm:$0xff] }
 0x25e   :  { %8950 = vst [vmem:[#allocation131_spill] sm:$0xff] %v5675_v12  ;;  %v8996_v12 = vld [vmem:[#allocation74_spill] sm:$0xff] }
 0x25f   :  { %8951 = vst [vmem:[#allocation132_spill] sm:$0xff] %v5677_v4  ;;  %v9003_v4 = vld [vmem:[#allocation86_spill] sm:$0xff] }
 0x262   :  { %1440 = vrot.lane.b32.xlu1 %v5111_v17, %s4283_s30  ;;  %1442 = vrot.lane.b32.xlu2 %v5130_v24, %s4283_s30 }
 0x263   :  { %1438 = vrot.lane.b32.xlu0 %v5109_v16, %s4283_s30 }
 0x264   :  { %v5685_v11 = vpop.permute.xlu1 %1146  ;;  %v5687_v18 = vpop.permute.xlu2 %1166 }
 0x265   :  { %8952 = vst [vmem:[#allocation133_spill] sm:$0xff] %v5685_v11  ;;  %v5689_v10 = vpop.permute.xlu0 %1144  ;;  %v8987_v11 = vld [vmem:[#allocation56_spill] sm:$0xff] }
 0x266   :  { %8953 = vst [vmem:[#allocation134_spill] sm:$0xff] %v5687_v18  ;;  %v8998_v18 = vld [vmem:[#allocation73_spill] sm:$0xff] }
 0x267   :  { %8954 = vst [vmem:[#allocation135_spill] sm:$0xff] %v5689_v10 }
 0x26a   :  { %1446 = vrot.lane.b32.xlu1 %v5126_v23, %s4283_s30  ;;  %1448 = vrot.lane.b32.xlu2 %v5145_v30, %s4283_s30 }
 0x26b   :  { %1444 = vrot.lane.b32.xlu0 %v5124_v22, %s4283_s30 }
 0x26c   :  { %v5697_v17 = vpop.permute.xlu1 %1152  ;;  %v5699_v24 = vpop.permute.xlu2 %1172 }
 0x26d   :  { %8955 = vst [vmem:[#allocation136_spill] sm:$0xff] %v5697_v17  ;;  %v5701_v16 = vpop.permute.xlu0 %1150  ;;  %v8978_v17 = vld [vmem:[#allocation38_spill] sm:$0xff] }
 0x26e   :  { %8956 = vst [vmem:[#allocation137_spill] sm:$0xff] %v5699_v24 }
 0x26f   :  { %8957 = vst [vmem:[#allocation138_spill] sm:$0xff] %v5701_v16  ;;  %v8992_v16 = vld [vmem:[#allocation61_spill] sm:$0xff] }
 0x272   :  { %1452 = vrot.lane.b32.xlu1 %v5141_v29, %s4283_s30  ;;  %1454 = vrot.lane.b32.xlu2 %v5160_v36, %s4283_s30 }
 0x273   :  { %1450 = vrot.lane.b32.xlu0 %v5139_v28, %s4283_s30 }
 0x274   :  { %v5709_v23 = vpop.permute.xlu1 %1158  ;;  %v5711_v30 = vpop.permute.xlu2 %1178 }
 0x275   :  { %8958 = vst [vmem:[#allocation139_spill] sm:$0xff] %v5709_v23  ;;  %v5713_v22 = vpop.permute.xlu0 %1156 }
 0x276   :  { %8959 = vst [vmem:[#allocation140_spill] sm:$0xff] %v5711_v30  ;;  %v8974_v30 = vld [vmem:[#allocation25_spill] sm:$0xff] }
 0x277   :  { %8960 = vst [vmem:[#allocation141_spill] sm:$0xff] %v5713_v22 }
 0x27a   :  { %1458 = vrot.lane.b32.xlu1 %v5156_v35, %s4283_s30  ;;  %1460 = vrot.lane.b32.xlu2 %v5175_v43, %s4283_s30 }
 0x27b   :  { %1456 = vrot.lane.b32.xlu0 %v5154_v34, %s4283_s30 }
 0x27c   :  { %v5721_v29 = vpop.permute.xlu1 %1164  ;;  %v5723_v36 = vpop.permute.xlu2 %1184 }
 0x27d   :  { %8961 = vst [vmem:[#allocation142_spill] sm:$0xff] %v5721_v29  ;;  %v5725_v28 = vpop.permute.xlu0 %1162  ;;  %v9006_v29 = vld [vmem:[#allocation85_spill] sm:$0xff] }
 0x27e   :  { %8962 = vst [vmem:[#allocation143_spill] sm:$0xff] %v5723_v36  ;;  %v8993_v36 = vld [vmem:[#allocation68_spill] sm:$0xff] }
 0x27f   :  { %8963 = vst [vmem:[#allocation144_spill] sm:$0xff] %v5725_v28  ;;  %v8984_v28 = vld [vmem:[#allocation50_spill] sm:$0xff] }
 0x282   :  { %1464 = vrot.lane.b32.xlu1 %v5171_v42, %s4283_s30  ;;  %1466 = vrot.lane.b32.xlu2 %v5191_v55, %s4283_s30 }
 0x283   :  { %1462 = vrot.lane.b32.xlu0 %v5169_v41, %s4283_s30 }
 0x284   :  { %v5733_v35 = vpop.permute.xlu1 %1170  ;;  %v5735_v43 = vpop.permute.xlu2 %1400 }
 0x285   :  { %8964 = vst [vmem:[#allocation145_spill] sm:$0xff] %v5733_v35  ;;  %v5737_v34 = vpop.permute.xlu0 %1168  ;;  %v9007_v35 = vld [vmem:[#allocation92_spill] sm:$0xff] }
 0x286   :  { %8965 = vst [vmem:[#allocation146_spill] sm:$0xff] %v5737_v34 }
 0x28a   :  { %1470 = vrot.lane.b32.xlu1 %v5187_v54, %s4283_s30  ;;  %1472 = vrot.lane.b32.xlu2 %v5207_v3, %s4283_s30 }
 0x28b   :  { %1468 = vrot.lane.b32.xlu0 %v5185_v53, %s4283_s30 }
 0x28c   :  { %v5745_v42 = vpop.permute.xlu1 %1176  ;;  %v5747_v55 = vpop.permute.xlu2 %1406 }
 0x28d   :  { %8966 = vst [vmem:[#allocation147_spill] sm:$0xff] %v5745_v42  ;;  %v5749_v41 = vpop.permute.xlu0 %1174  ;;  %v8983_v42 = vld [vmem:[#allocation43_spill] sm:$0xff] }
 0x28e   :  { %8967 = vst [vmem:[#allocation148_spill] sm:$0xff] %v5749_v41  ;;  %v8972_v41 = vld [vmem:[#allocation26_spill] sm:$0xff] }
 0x292   :  { %1476 = vrot.lane.b32.xlu1 %v5203_v2, %s4283_s30  ;;  %1478 = vrot.lane.b32.xlu2 %v5223_v15, %s4283_s30 }
 0x293   :  { %1474 = vrot.lane.b32.xlu0 %v5201_v1, %s4283_s30 }
 0x294   :  { %v5757_v54 = vpop.permute.xlu1 %1182  ;;  %v5759_v3 = vpop.permute.xlu2 %1412 }
 0x295   :  { %8968 = vst [vmem:[#allocation149_spill] sm:$0xff] %v5757_v54  ;;  %v5761_v53 = vpop.permute.xlu0 %1180 }
 0x296   :  { %8969 = vst [vmem:[#allocation150_spill] sm:$0xff] %v5761_v53 }
 0x29a   :  { %1482 = vrot.lane.b32.xlu1 %v5219_v14, %s4283_s30  ;;  %1484 = vrot.lane.b32.xlu2 %v5239_v27, %s4283_s30 }
 0x29b   :  { %1480 = vrot.lane.b32.xlu0 %v5217_v13, %s4283_s30 }
 0x29c   :  { %v5769_v2 = vpop.permute.xlu1 %1398  ;;  %v5771_v15 = vpop.permute.xlu2 %1418 }
 0x29d   :  { %v5773_v1 = vpop.permute.xlu0 %1186 }
 0x29e   :  { %8970 = vst [vmem:[#allocation151_spill] sm:$0xff] %v5773_v1  ;;  %v8980_v1 = vld [vmem:[#allocation37_spill] sm:$0xff] }
 0x2a2   :  { %1488 = vrot.lane.b32.xlu1 %v5235_v26, %s4283_s30  ;;  %1490 = vrot.lane.b32.xlu2 %v5257_v39, %s4283_s30 }
 0x2a3   :  { %1486 = vrot.lane.b32.xlu0 %v5233_v25, %s4283_s30 }
 0x2a4   :  { %v5781_v14 = vpop.permute.xlu1 %1404  ;;  %v5783_v27 = vpop.permute.xlu2 %1424 }
 0x2a5   :  { %v5785_v13 = vpop.permute.xlu0 %1402 }
 0x2aa   :  { %1494 = vrot.lane.b32.xlu1 %v5253_v38, %s4283_s30  ;;  %1496 = vrot.lane.b32.xlu2 %v5275_v9, %s4283_s30 }
 0x2ab   :  { %1492 = vrot.lane.b32.xlu0 %v5251_v37, %s4283_s30 }
 0x2ac   :  { %v5793_v26 = vpop.permute.xlu1 %1410  ;;  %v5795_v39 = vpop.permute.xlu2 %1430 }
 0x2ad   :  { %v5797_v25 = vpop.permute.xlu0 %1408 }
 0x2b2   :  { %1500 = vrot.lane.b32.xlu1 %v5271_v7, %s4283_s30  ;;  %1502 = vrot.lane.b32.xlu2 %v5293_v8, %s4283_s30 }
 0x2b3   :  { %1498 = vrot.lane.b32.xlu0 %v5269_v61, %s4283_s30 }
 0x2b4   :  { %v5805_v38 = vpop.permute.xlu1 %1416  ;;  %v5807_v9 = vpop.permute.xlu2 %1436 }
 0x2b5   :  { %v5809_v37 = vpop.permute.xlu0 %1414 }
 0x2ba   :  { %1506 = vrot.lane.b32.xlu1 %v5289_v20, %s4283_s30  ;;  %1508 = vrot.lane.b32.xlu2 %v5311_v47, %s4283_s30  ;;  %v8973_v20 = vld [vmem:[#allocation19_spill] sm:$0xff] }
 0x2bb   :  { %1504 = vrot.lane.b32.xlu0 %v5287_v32, %s4283_s30 }
 0x2bc   :  { %v5817_v7 = vpop.permute.xlu1 %1422  ;;  %v5819_v8 = vpop.permute.xlu2 %1442 }
 0x2bd   :  { %v5821_v61 = vpop.permute.xlu0 %1420 }
 0x2c2   :  { %1512 = vrot.lane.b32.xlu1 %v8971_v58, %s4283_s30  ;;  %1514 = vrot.lane.b32.xlu2 %v8972_v41, %s4283_s30  ;;  %v8976_v58 = vld [vmem:[#allocation24_spill] sm:$0xff] }
 0x2c3   :  { %1510 = vrot.lane.b32.xlu0 %v8973_v20, %s4283_s30 }
 0x2c4   :  { %v5829_v10 = vpop.permute.xlu1 %1428  ;;  %v5831_v47 = vpop.permute.xlu2 %1448 }
 0x2c5   :  { %v5833_v32 = vpop.permute.xlu0 %1426 }
 0x2ca   :  { %1518 = vrot.lane.b32.xlu1 %v8974_v30, %s4283_s30  ;;  %1520 = vrot.lane.b32.xlu2 %v8975_v0, %s4283_s30  ;;  %v8979_v30 = vld [vmem:[#allocation30_spill] sm:$0xff] }
 0x2cb   :  { %1516 = vrot.lane.b32.xlu0 %v8976_v58, %s4283_s30 }
 0x2cc   :  { %v5841_v54 = vpop.permute.xlu1 %1434  ;;  %v5843_v41 = vpop.permute.xlu2 %1454 }
 0x2cd   :  { %v5845_v20 = vpop.permute.xlu0 %1432 }
 0x2d2   :  { %1524 = vrot.lane.b32.xlu1 %v8977_v5, %s4283_s30  ;;  %1526 = vrot.lane.b32.xlu2 %v8978_v17, %s4283_s30  ;;  %v8982_v5 = vld [vmem:[#allocation36_spill] sm:$0xff] }
 0x2d3   :  { %1522 = vrot.lane.b32.xlu0 %v8979_v30, %s4283_s30 }
 0x2d4   :  { %v5853_v24 = vpop.permute.xlu1 %1440  ;;  %v5855_v0 = vpop.permute.xlu2 %1460 }
 0x2d5   :  { %v5857_v58 = vpop.permute.xlu0 %1438 }
 0x2da   :  { %1530 = vrot.lane.b32.xlu1 %v8980_v1, %s4283_s30  ;;  %1532 = vrot.lane.b32.xlu2 %v8981_v44, %s4283_s30  ;;  %v8985_v1 = vld [vmem:[#allocation42_spill] sm:$0xff] }
 0x2db   :  { %1528 = vrot.lane.b32.xlu0 %v8982_v5, %s4283_s30 }
 0x2dc   :  { %v5865_v22 = vpop.permute.xlu1 %1446  ;;  %v5867_v17 = vpop.permute.xlu2 %1466 }
 0x2dd   :  { %v5869_v30 = vpop.permute.xlu0 %1444 }
 0x2e2   :  { %1536 = vrot.lane.b32.xlu1 %v8983_v42, %s4283_s30  ;;  %1538 = vrot.lane.b32.xlu2 %v8984_v28, %s4283_s30  ;;  %v8988_v42 = vld [vmem:[#allocation48_spill] sm:$0xff] }
 0x2e3   :  { %1534 = vrot.lane.b32.xlu0 %v8985_v1, %s4283_s30 }
 0x2e4   :  { %v5877_v40 = vpop.permute.xlu1 %1452  ;;  %v5879_v44 = vpop.permute.xlu2 %1472 }
 0x2e5   :  { %v5881_v5 = vpop.permute.xlu0 %1450 }
 0x2ea   :  { %1542 = vrot.lane.b32.xlu1 %v8986_v57, %s4283_s30  ;;  %1544 = vrot.lane.b32.xlu2 %v8987_v11, %s4283_s30  ;;  %v8991_v57 = vld [vmem:[#allocation54_spill] sm:$0xff] }
 0x2eb   :  { %1540 = vrot.lane.b32.xlu0 %v8988_v42, %s4283_s30 }
 0x2ec   :  { %v5889_v53 = vpop.permute.xlu1 %1458  ;;  %v5891_v28 = vpop.permute.xlu2 %1478 }
 0x2ed   :  { %v5893_v1 = vpop.permute.xlu0 %1456 }
 0x2f2   :  { %1548 = vrot.lane.b32.xlu1 %v8989_v63, %s4283_s30  ;;  %1550 = vrot.lane.b32.xlu2 %v8990_v51, %s4283_s30  ;;  %v8994_v63 = vld [vmem:[#allocation60_spill] sm:$0xff] }
 0x2f3   :  { %1546 = vrot.lane.b32.xlu0 %v8991_v57, %s4283_s30 }
 0x2f4   :  { %v5901_v34 = vpop.permute.xlu1 %1464  ;;  %v5903_v11 = vpop.permute.xlu2 %1484 }
 0x2f5   :  { %v5905_v42 = vpop.permute.xlu0 %1462 }
 0x2fa   :  { %1554 = vrot.lane.b32.xlu1 %v8992_v16, %s4283_s30  ;;  %1556 = vrot.lane.b32.xlu2 %v8993_v36, %s4283_s30  ;;  %v8997_v16 = vld [vmem:[#allocation66_spill] sm:$0xff] }
 0x2fb   :  { %1552 = vrot.lane.b32.xlu0 %v8994_v63, %s4283_s30 }
 0x2fc   :  { %v5913_v56 = vpop.permute.xlu1 %1470  ;;  %v5915_v51 = vpop.permute.xlu2 %1490 }
 0x2fd   :  { %v5917_v57 = vpop.permute.xlu0 %1468 }
 0x302   :  { %1560 = vrot.lane.b32.xlu1 %v8995_v45, %s4283_s30  ;;  %1562 = vrot.lane.b32.xlu2 %v8996_v12, %s4283_s30  ;;  %v9000_v45 = vld [vmem:[#allocation72_spill] sm:$0xff] }
 0x303   :  { %1558 = vrot.lane.b32.xlu0 %v8997_v16, %s4283_s30 }
 0x304   :  { %v5925_v6 = vpop.permute.xlu1 %1476  ;;  %v5927_v36 = vpop.permute.xlu2 %1496 }
 0x305   :  { %v5929_v63 = vpop.permute.xlu0 %1474 }
 0x30a   :  { %1566 = vrot.lane.b32.xlu1 %v8998_v18, %s4283_s30  ;;  %1568 = vrot.lane.b32.xlu2 %v8999_v50, %s4283_s30  ;;  %v9004_v18 = vld [vmem:[#allocation78_spill] sm:$0xff] }
 0x30b   :  { %1564 = vrot.lane.b32.xlu0 %v9000_v45, %s4283_s30 }
 0x30c   :  { %v5937_v23 = vpop.permute.xlu1 %1482  ;;  %v5939_v12 = vpop.permute.xlu2 %1502 }
 0x30d   :  { %9001 = vst [vmem:[#allocation20_spill] sm:$0xff] %v5939_v12  ;;  %v5941_v16 = vpop.permute.xlu0 %1480 }
 0x312   :  { %1572 = vrot.lane.b32.xlu1 %v9002_v62, %s4283_s30  ;;  %1574 = vrot.lane.b32.xlu2 %v9003_v4, %s4283_s30  ;;  %v9008_v62 = vld [vmem:[#allocation84_spill] sm:$0xff] }
 0x313   :  { %1570 = vrot.lane.b32.xlu0 %v9004_v18, %s4283_s30  ;;  %v743_v18 = vand.u32 127, %v742_v46 }
 0x314   :  { %v5949_v60 = vpop.permute.xlu1 %1488  ;;  %v5951_v50 = vpop.permute.xlu2 %1508 }
 0x315   :  { %9005 = vst [vmem:[#allocation26_spill] sm:$0xff] %v5951_v50  ;;  %v5953_v45 = vpop.permute.xlu0 %1486  ;;  %vm744_vm2 = vcmp.eq.s32.totalorder %v743_v18, 0  ;;  %vm746_vm3 = vcmp.eq.s32.totalorder %v743_v18, 7  ;;  %vm745_vm4 = vcmp.eq.s32.totalorder %v743_v18, 6  ;;  %vm748_vm5 = vcmp.eq.s32.totalorder %v743_v18, 13 }
 0x316   :  { %vm747_vm6 = vmor %vm744_vm2, %vm746_vm3  ;;  %vm750_vm7 = vcmp.eq.s32.totalorder %v743_v18, 14  ;;  %vm752_vm9 = vcmp.eq.s32.totalorder %v743_v18, 20  ;;  %vm754_vm11 = vcmp.eq.s32.totalorder %v743_v18, 21  ;;  %vm756_vm13 = vcmp.eq.s32.totalorder %v743_v18, 27 }
 0x317   :  { %vm749_vm8 = vmor %vm745_vm4, %vm748_vm5  ;;  %vm758_vm15 = vcmp.eq.s32.totalorder %v743_v18, 28  ;;  %vm760_vm3 = vcmp.eq.s32.totalorder %v743_v18, 34  ;;  %vm762_vm5 = vcmp.eq.s32.totalorder %v743_v18, 35 }
 0x318   :  { %vm751_vm10 = vmor %vm747_vm6, %vm750_vm7  ;;  %vm764_vm7 = vcmp.eq.s32.totalorder %v743_v18, 41 }
 0x319   :  { %vm753_vm12 = vmor %vm749_vm8, %vm752_vm9  ;;  %vm766_vm9 = vcmp.eq.s32.totalorder %v743_v18, 42 }
 0x31a   :  { %1578 = vrot.lane.b32.xlu1 %v9006_v29, %s4283_s30  ;;  %1580 = vrot.lane.b32.xlu2 %v9007_v35, %s4283_s30  ;;  %v9012_v29 = vld [vmem:[#allocation98_spill] sm:$0xff]  ;;  %vm755_vm14 = vmor %vm751_vm10, %vm754_vm11  ;;  %vm768_vm11 = vcmp.eq.s32.totalorder %v743_v18, 48 }
 0x31b   :  { %1576 = vrot.lane.b32.xlu0 %v9008_v62, %s4283_s30  ;;  %v9013_v35 = vld [vmem:[#allocation90_spill] sm:$0xff]  ;;  %vm757_vm2 = vmor %vm753_vm12, %vm756_vm13 }
 0x31c   :  { %v5961_v4 = vpop.permute.xlu1 %1494  ;;  %v5963_v52 = vpop.permute.xlu2 %1514  ;;  %vm759_vm4 = vmor %vm755_vm14, %vm758_vm15 }
 0x31d   :  { %9009 = vst [vmem:[#allocation19_spill] sm:$0xff] %v5961_v4  ;;  %v5965_v21 = vpop.permute.xlu0 %1492  ;;  %vm761_vm6 = vmor %vm757_vm2, %vm760_vm3 }
 0x31e   :  { %9010 = vst [vmem:[#allocation25_spill] sm:$0xff] %v5963_v52  ;;  %vm763_vm8 = vmor %vm759_vm4, %vm762_vm5 }
 0x31f   :  { %vm765_vm10 = vmor %vm761_vm6, %vm764_vm7 }
 0x320   :  { %vm767_vm12 = vmor %vm763_vm8, %vm766_vm9 }
 0x321   :  { %vm769_vm13 = vmor %vm765_vm10, %vm768_vm11 }
 0x322   :  { %1584 = vrot.lane.b32.xlu1 %v9011_v19, %s4283_s30  ;;  %1586 = vrot.lane.b32.xlu2 %v9012_v29, %s4283_s30  ;;  %v9017_v19 = vld [vmem:[#allocation97_spill] sm:$0xff]  ;;  %v9018_v29 = vld [vmem:[#allocation96_spill] sm:$0xff]  ;;  %v6003_v50 = vsel %vm769_vm13, 1, %v4284_v49 }
 0x323   :  { %1582 = vrot.lane.b32.xlu0 %v9013_v35, %s4283_s30  ;;  %vm1397_vm15 = vcmp.eq.s32.totalorder %v6003_v50, 1 }
 0x324   :  { %v5973_v62 = vpop.permute.xlu1 %1500  ;;  %v5975_v46 = vpop.permute.xlu2 %1520 }
 0x325   :  { %9014 = vst [vmem:[#allocation32_spill] sm:$0xff] %v5973_v62  ;;  %v5977_v31 = vpop.permute.xlu0 %1498 }
 0x326   :  { %9015 = vst [vmem:[#allocation24_spill] sm:$0xff] %v5975_v46 }
 0x327   :  { %9016 = vst [vmem:[#allocation31_spill] sm:$0xff] %v5977_v31 }
 0x32a   :  { %1590 = vrot.lane.b32.xlu1 %v9017_v19, %s4283_s30  ;;  %1592 = vrot.lane.b32.xlu2 %v5563_v33, %s4283_s30  ;;  %v9022_v33 = vld [vmem:[#allocation103_spill] sm:$0xff]  ;;  %v9023_v19 = vld [vmem:[#allocation102_spill] sm:$0xff] }
 0x32b   :  { %1588 = vrot.lane.b32.xlu0 %v9018_v29, %s4283_s30 }
 0x32c   :  { %v5985_v35 = vpop.permute.xlu1 %1506  ;;  %v5987_v46 = vpop.permute.xlu2 %1526 }
 0x32d   :  { %9019 = vst [vmem:[#allocation38_spill] sm:$0xff] %v5985_v35  ;;  %v5989_v52 = vpop.permute.xlu0 %1504  ;;  %v6001_v35 = vsel %vm767_vm12, 1, %v4284_v49 }
 0x32e   :  { %9020 = vst [vmem:[#allocation30_spill] sm:$0xff] %v5987_v46  ;;  %vm875_vm14 = vcmp.eq.s32.totalorder %v6001_v35, 1 }
 0x32f   :  { %9021 = vst [vmem:[#allocation37_spill] sm:$0xff] %v5989_v52 }
 0x332   :  { %1596 = vrot.lane.b32.xlu1 %v9022_v33, %s4283_s30  ;;  %1598 = vrot.lane.b32.xlu2 %v5581_v59, %s4283_s30  ;;  %v9027_v59 = vld [vmem:[#allocation108_spill] sm:$0xff]  ;;  %v9028_v33 = vld [vmem:[#allocation7_spill] sm:$0xff] }
 0x333   :  { %1594 = vrot.lane.b32.xlu0 %v9023_v19, %s4283_s30  ;;  %v1294_v19 = vsel %vm875_vm14, -inf, %v9028_v33  ;;  %v1712_v33 = vsel %vm1397_vm15, -inf, %v5785_v13 }
 0x334   :  { %v5997_v29 = vpop.permute.xlu1 %1512  ;;  %v5999_v46 = vpop.permute.xlu2 %1532 }
 0x335   :  { %9024 = vst [vmem:[#allocation44_spill] sm:$0xff] %v5997_v29  ;;  %v6005_v18 = vpop.permute.xlu0 %1510  ;;  %v9030_v29 = vld [vmem:[#allocation107_spill] sm:$0xff] }
 0x336   :  { %9025 = vst [vmem:[#allocation36_spill] sm:$0xff] %v5999_v46  ;;  %v9029_v46 = vld [vmem:[#allocation9_spill] sm:$0xff] }
 0x337   :  { %9026 = vst [vmem:[#allocation43_spill] sm:$0xff] %v6005_v18  ;;  %v1293_v49 = vsel %vm875_vm14, -inf, %v9029_v46  ;;  %v9031_v18 = vld [vmem:[#allocation3_spill] sm:$0xff]  ;;  %v4176_v46 = vld [vmem:[%s8663_s0 + $0x10] sm:$0xff] }
 0x338   :  { %v1292_v62 = vsel %vm875_vm14, -inf, %v9031_v18  ;;  %v4177_v18 = vld [vmem:[%s8663_s0 + $0x8] sm:$0xff] }
 0x33a   :  { %1602 = vrot.lane.b32.xlu1 %v9027_v59, %s4283_s30  ;;  %1604 = vrot.lane.b32.xlu2 %v5595_v48, %s4283_s30  ;;  %v1711_v48 = vsel %vm1397_vm15, -inf, %v5735_v43  ;;  %v4178_v43 = vld [vmem:[%s8663_s0] sm:$0xff] }
 0x33b   :  { %1600 = vrot.lane.b32.xlu0 %v9030_v29, %s4283_s30  ;;  %v1816_v29 = vmax.f32 %v1294_v19, %v4176_v46  ;;  %v1814_v12 = vmax.f32 %v1292_v62, %v4178_v43  ;;  %v9038_v46 = vld [vmem:[#allocation12_spill] sm:$0xff] }
 0x33c   :  { %v6024_v52 = vpop.permute.xlu1 %1518  ;;  %v6026_v59 = vpop.permute.xlu2 %1538  ;;  %v1296_v62 = vsel %vm875_vm14, -inf, %v9038_v46 }
 0x33d   :  { %9032 = vst [vmem:[#allocation50_spill] sm:$0xff] %v6024_v52  ;;  %v1815_v52 = vmax.f32 %v1293_v49, %v4177_v18  ;;  %v6046_v13 = vpop.permute.xlu0 %1516  ;;  %v6050_v31 = vmax.f32 %v1816_v29, %v1712_v33  ;;  %v1714_v33 = vsel %vm1397_vm15, -inf, %v5747_v55  ;;  %v1715_v29 = vsel %vm1397_vm15, -inf, %v5797_v25  ;;  %v4179_v18 = vld [vmem:[%s8663_s0 + $0x28] sm:$0xff]  ;;  %v4181_v55 = vld [vmem:[%s8663_s0 + $0x18] sm:$0xff] }
 0x33e   :  { %9033 = vst [vmem:[#allocation42_spill] sm:$0xff] %v6026_v59  ;;  %v1710_v59 = vsel %vm1397_vm15, -inf, %v5769_v2  ;;  %v9037_v2 = vld [vmem:[#allocation10_spill] sm:$0xff] }
 0x33f   :  { %v6048_v4 = vmax.f32 %v1815_v52, %v1711_v48  ;;  %9035 = vst [vmem:[#allocation56_spill] sm:$0xff] %v6050_v31  ;;  %v6052_v19 = vmax.f32 %v1814_v12, %v1710_v59  ;;  %v1297_v49 = vsel %vm875_vm14, -inf, %v9037_v2  ;;  %v9039_v52 = vld [vmem:[#allocation4_spill] sm:$0xff]  ;;  %v4180_v2 = vld [vmem:[%s8663_s0 + $0x20] sm:$0xff] }
 0x340   :  { %v1295_v12 = vsel %vm875_vm14, -inf, %v9039_v52  ;;  %v1819_v43 = vmax.f32 %v1297_v49, %v4179_v18  ;;  %v1818_v46 = vmax.f32 %v1296_v62, %v4180_v2  ;;  %v1713_v52 = vsel %vm1397_vm15, -inf, %v5781_v14  ;;  %v9044_v14 = vld [vmem:[#allocation13_spill] sm:$0xff]  ;;  %v9045_v18 = vld [vmem:[#allocation15_spill] sm:$0xff] }
 0x341   :  { %9034 = vst [vmem:[#allocation49_spill] sm:$0xff] %v6048_v4  ;;  %v1300_v62 = vsel %vm875_vm14, -inf, %v9044_v14  ;;  %v1717_v2 = vsel %vm1397_vm15, -inf, %v5759_v3  ;;  %v4183_v14 = vld [vmem:[%s8663_s0 + $0x38] sm:$0xff]  ;;  %v4184_v3 = vld [vmem:[%s8663_s0 + $0x30] sm:$0xff] }
 0x342   :  { %9036 = vst [vmem:[#allocation48_spill] sm:$0xff] %v6052_v19  ;;  %2128 = vrot.lane.b32.xlu1 %v6048_v4, %s4280_s15  ;;  %2130 = vrot.lane.b32.xlu2 %v6050_v31, %s4280_s15  ;;  %v1817_v4 = vmax.f32 %v1295_v12, %v4181_v55  ;;  %v6095_v31 = vmax.f32 %v1819_v43, %v1715_v29  ;;  %v1299_v12 = vsel %vm875_vm14, -inf, %v9045_v18 }
 0x343   :  { %2126 = vrot.lane.b32.xlu0 %v6052_v19, %s4280_s15  ;;  %v6093_v19 = vmax.f32 %v1818_v46, %v1714_v33  ;;  %v9046_v33 = vld [vmem:[#allocation5_spill] sm:$0xff]  ;;  %v1718_v46 = vsel %vm1397_vm15, -inf, %v5809_v37  ;;  %v1821_v18 = vmax.f32 %v1299_v12, %v4183_v14  ;;  %v1720_v14 = vsel %vm1397_vm15, -inf, %v5771_v15  ;;  %v4187_v15 = vld [vmem:[%s8663_s0 + $0x48] sm:$0xff] }
 0x344   :  { %v6069_v59 = vpop.permute.xlu1 %1524  ;;  %v6071_v48 = vpop.permute.xlu2 %1544  ;;  %9042 = vst [vmem:[#allocation54_spill] sm:$0xff] %v6095_v31  ;;  %v6097_v49 = vmax.f32 %v1817_v4, %v1713_v52  ;;  %v1298_v4 = vsel %vm875_vm14, -inf, %v9046_v33  ;;  %v4182_v52 = vld [vmem:[%s8663_s0 + $0x40] sm:$0xff]  ;;  %v1716_v33 = vsel %vm1397_vm15, -inf, %v5793_v26  ;;  %v9049_v26 = vld [vmem:[#allocation16_spill] sm:$0xff] }
 0x345   :  { %9040 = vst [vmem:[#allocation55_spill] sm:$0xff] %v6071_v48  ;;  %v6091_v25 = vpop.permute.xlu0 %1522  ;;  %v1822_v55 = vmax.f32 %v1300_v62, %v4182_v52  ;;  %v1303_v12 = vsel %vm875_vm14, -inf, %v9049_v26  ;;  %v9050_v52 = vld [vmem:[#allocation18_spill] sm:$0xff]  ;;  %v4186_v26 = vld [vmem:[%s8663_s0 + $0x50] sm:$0xff] }
 0x346   :  { %9041 = vst [vmem:[#allocation62_spill] sm:$0xff] %v6093_v19 }
 0x347   :  { %9043 = vst [vmem:[#allocation61_spill] sm:$0xff] %v6097_v49 }
 0x34a   :  { %2134 = vrot.lane.b32.xlu1 %v6093_v19, %s4280_s15  ;;  %2136 = vrot.lane.b32.xlu2 %v6095_v31, %s4280_s15  ;;  %v6140_v19 = vmax.f32 %v1822_v55, %v1718_v46 }
 0x34b   :  { %2132 = vrot.lane.b32.xlu0 %v6097_v49, %s4280_s15  ;;  %v6138_v49 = vmax.f32 %v1821_v18, %v1717_v2  ;;  %v9051_v2 = vld [vmem:[#allocation6_spill] sm:$0xff]  ;;  %v1721_v18 = vsel %vm1397_vm15, -inf, %v5821_v61 }
 0x34c   :  { %v6114_v29 = vpop.permute.xlu1 %1530  ;;  %v6116_v43 = vpop.permute.xlu2 %1550 }
 0x34d   :  { %9047 = vst [vmem:[#allocation68_spill] sm:$0xff] %v6114_v29  ;;  %v1820_v29 = vmax.f32 %v1298_v4, %v4184_v3  ;;  %v6136_v37 = vpop.permute.xlu0 %1528  ;;  %v1302_v4 = vsel %vm875_vm14, -inf, %v9050_v52 }
 0x34e   :  { %9048 = vst [vmem:[#allocation60_spill] sm:$0xff] %v6136_v37  ;;  %v1824_v52 = vmax.f32 %v1302_v4, %v4186_v26  ;;  %v1723_v26 = vsel %vm1397_vm15, -inf, %v5783_v27  ;;  %v4190_v27 = vld [vmem:[%s8663_s0 + $0x60] sm:$0xff] }
 0x34f   :  { %v6142_v62 = vmax.f32 %v1820_v29, %v1716_v33  ;;  %v1301_v29 = vsel %vm875_vm14, -inf, %v9051_v2  ;;  %v4185_v33 = vld [vmem:[%s8663_s0 + $0x58] sm:$0xff]  ;;  %v1719_v2 = vsel %vm1397_vm15, -inf, %v5805_v38  ;;  %v9054_v38 = vld [vmem:[#allocation21_spill] sm:$0xff] }
 0x350   :  { %v1825_v3 = vmax.f32 %v1303_v12, %v4185_v33  ;;  %v1823_v37 = vmax.f32 %v1301_v29, %v4187_v15  ;;  %v1306_v4 = vsel %vm875_vm14, -inf, %v9054_v38  ;;  %v9055_v33 = vld [vmem:[#allocation23_spill] sm:$0xff]  ;;  %v4189_v38 = vld [vmem:[%s8663_s0 + $0x68] sm:$0xff] }
 0x351   :  { %v1305_v29 = vsel %vm875_vm14, -inf, %v9055_v33 }
 0x352   :  { %2140 = vrot.lane.b32.xlu1 %v6138_v49, %s4280_s15  ;;  %2142 = vrot.lane.b32.xlu2 %v6140_v19, %s4280_s15  ;;  %v6185_v31 = vmax.f32 %v1825_v3, %v1721_v18  ;;  %v6187_v12 = vmax.f32 %v1823_v37, %v1719_v2  ;;  %v4188_v2 = vld [vmem:[%s8663_s0 + $0x70] sm:$0xff]  ;;  %v1827_v33 = vmax.f32 %v1305_v29, %v4189_v38  ;;  %v1726_v38 = vsel %vm1397_vm15, -inf, %v5795_v39  ;;  %v4193_v39 = vld [vmem:[%s8663_s0 + $0x78] sm:$0xff] }
 0x353   :  { %2138 = vrot.lane.b32.xlu0 %v6142_v62, %s4280_s15  ;;  %v1828_v15 = vmax.f32 %v1306_v4, %v4188_v2  ;;  %v9061_v2 = vld [vmem:[#allocation29_spill] sm:$0xff] }
 0x354   :  { %v6159_v46 = vpop.permute.xlu1 %1536  ;;  %v6161_v55 = vpop.permute.xlu2 %1556 }
 0x355   :  { %9052 = vst [vmem:[#allocation67_spill] sm:$0xff] %v6159_v46  ;;  %v6181_v61 = vpop.permute.xlu0 %1534  ;;  %v6183_v46 = vmax.f32 %v1824_v52, %v1720_v14  ;;  %v9056_v14 = vld [vmem:[#allocation8_spill] sm:$0xff]  ;;  %v1724_v52 = vsel %vm1397_vm15, -inf, %v5833_v32 }
 0x356   :  { %9053 = vst [vmem:[#allocation74_spill] sm:$0xff] %v6181_v61  ;;  %v1304_v37 = vsel %vm875_vm14, -inf, %v9056_v14  ;;  %v1722_v14 = vsel %vm1397_vm15, -inf, %v5817_v7  ;;  %v6228_v61 = vmax.f32 %v1827_v33, %v1723_v26  ;;  %v6230_v48 = vmax.f32 %v1828_v15, %v1724_v52  ;;  %v9060_v7 = vld [vmem:[#allocation27_spill] sm:$0xff] }
 0x357   :  { %v1309_v29 = vsel %vm875_vm14, -inf, %v9060_v7  ;;  %v9062_v26 = vld [vmem:[#allocation11_spill] sm:$0xff]  ;;  %v1727_v33 = vsel %vm1397_vm15, -inf, %v5845_v20 }
 0x358   :  { %9059 = vst [vmem:[#allocation80_spill] sm:$0xff] %v6228_v61  ;;  %v4192_v7 = vld [vmem:[%s8663_s0 + $0x80] sm:$0xff] }
 0x35a   :  { %2146 = vrot.lane.b32.xlu1 %v6183_v46, %s4280_s15  ;;  %2148 = vrot.lane.b32.xlu2 %v6185_v31, %s4280_s15 }
 0x35b   :  { %2144 = vrot.lane.b32.xlu0 %v6187_v12, %s4280_s15 }
 0x35c   :  { %v6204_v18 = vpop.permute.xlu1 %1542  ;;  %v6206_v3 = vpop.permute.xlu2 %1562 }
 0x35d   :  { %9057 = vst [vmem:[#allocation66_spill] sm:$0xff] %v6206_v3  ;;  %v1826_v3 = vmax.f32 %v1304_v37, %v4190_v27  ;;  %v6226_v32 = vpop.permute.xlu0 %1540  ;;  %v1308_v37 = vsel %vm875_vm14, -inf, %v9061_v2 }
 0x35e   :  { %9058 = vst [vmem:[#allocation73_spill] sm:$0xff] %v6226_v32  ;;  %v1830_v2 = vmax.f32 %v1308_v37, %v4192_v7  ;;  %v1729_v7 = vsel %vm1397_vm15, -inf, %v5807_v9  ;;  %v4196_v9 = vld [vmem:[%s8663_s0 + $0x90] sm:$0xff] }
 0x35f   :  { %v6232_v4 = vmax.f32 %v1826_v3, %v1722_v14  ;;  %v1307_v3 = vsel %vm875_vm14, -inf, %v9062_v26  ;;  %v4191_v14 = vld [vmem:[%s8663_s0 + $0x88] sm:$0xff]  ;;  %v1725_v26 = vsel %vm1397_vm15, -inf, %v5829_v10  ;;  %v9066_v10 = vld [vmem:[#allocation33_spill] sm:$0xff] }
 0x360   :  { %v1831_v27 = vmax.f32 %v1309_v29, %v4191_v14  ;;  %v1829_v32 = vmax.f32 %v1307_v3, %v4193_v39  ;;  %v1312_v37 = vsel %vm875_vm14, -inf, %v9066_v10  ;;  %v9067_v14 = vld [vmem:[#allocation35_spill] sm:$0xff]  ;;  %v4195_v10 = vld [vmem:[%s8663_s0 + $0x98] sm:$0xff] }
 0x361   :  { %v1311_v3 = vsel %vm875_vm14, -inf, %v9067_v14 }
 0x362   :  { %2152 = vrot.lane.b32.xlu1 %v6228_v61, %s4280_s15  ;;  %2154 = vrot.lane.b32.xlu2 %v6230_v48, %s4280_s15  ;;  %v6275_v61 = vmax.f32 %v1831_v27, %v1727_v33  ;;  %v6277_v29 = vmax.f32 %v1829_v32, %v1725_v26  ;;  %v4194_v26 = vld [vmem:[%s8663_s0 + $0xa0] sm:$0xff]  ;;  %v1833_v14 = vmax.f32 %v1311_v3, %v4195_v10  ;;  %v1732_v10 = vsel %vm1397_vm15, -inf, %v5819_v8  ;;  %v4199_v8 = vld [vmem:[%s8663_s0 + $0xa8] sm:$0xff] }
 0x363   :  { %2150 = vrot.lane.b32.xlu0 %v6232_v4, %s4280_s15  ;;  %v1834_v39 = vmax.f32 %v1312_v37, %v4194_v26  ;;  %v9072_v26 = vld [vmem:[#allocation41_spill] sm:$0xff] }
 0x364   :  { %v6249_v52 = vpop.permute.xlu1 %1548  ;;  %v6251_v15 = vpop.permute.xlu2 %1568  ;;  %9065 = vst [vmem:[#allocation86_spill] sm:$0xff] %v6275_v61 }
 0x365   :  { %9063 = vst [vmem:[#allocation72_spill] sm:$0xff] %v6251_v15  ;;  %v6271_v20 = vpop.permute.xlu0 %1546  ;;  %v6273_v15 = vmax.f32 %v1830_v2, %v1726_v38  ;;  %v9068_v38 = vld [vmem:[#allocation14_spill] sm:$0xff]  ;;  %v1730_v2 = vsel %vm1397_vm15, -inf, %v5857_v58 }
 0x366   :  { %v1310_v32 = vsel %vm875_vm14, -inf, %v9068_v38  ;;  %v1728_v38 = vsel %vm1397_vm15, -inf, %v5841_v54  ;;  %v9071_v54 = vld [vmem:[#allocation39_spill] sm:$0xff] }
 0x367   :  { %9064 = vst [vmem:[#allocation79_spill] sm:$0xff] %v6273_v15  ;;  %v1315_v3 = vsel %vm875_vm14, -inf, %v9071_v54  ;;  %v4198_v54 = vld [vmem:[%s8663_s0 + $0xb0] sm:$0xff] }
 0x36a   :  { %2158 = vrot.lane.b32.xlu1 %v6273_v15, %s4280_s15  ;;  %2160 = vrot.lane.b32.xlu2 %v6275_v61, %s4280_s15  ;;  %v1832_v61 = vmax.f32 %v1310_v32, %v4196_v9  ;;  %v6318_v15 = vmax.f32 %v1833_v14, %v1729_v7  ;;  %v1314_v32 = vsel %vm875_vm14, -inf, %v9072_v26  ;;  %v9073_v7 = vld [vmem:[#allocation17_spill] sm:$0xff]  ;;  %v1733_v14 = vsel %vm1397_vm15, -inf, %v5869_v30 }
 0x36b   :  { %2156 = vrot.lane.b32.xlu0 %v6277_v29, %s4280_s15  ;;  %v1836_v26 = vmax.f32 %v1314_v32, %v4198_v54  ;;  %v1735_v54 = vsel %vm1397_vm15, -inf, %v5831_v47  ;;  %v4202_v47 = vld [vmem:[%s8663_s0 + $0xc0] sm:$0xff] }
 0x36c   :  { %v6294_v33 = vpop.permute.xlu1 %1554  ;;  %v6296_v27 = vpop.permute.xlu2 %1574  ;;  %v6322_v37 = vmax.f32 %v1832_v61, %v1728_v38  ;;  %v1313_v61 = vsel %vm875_vm14, -inf, %v9073_v7  ;;  %v4197_v38 = vld [vmem:[%s8663_s0 + $0xb8] sm:$0xff]  ;;  %v1731_v7 = vsel %vm1397_vm15, -inf, %v5853_v24  ;;  %v9080_v24 = vld [vmem:[#allocation45_spill] sm:$0xff] }
 0x36d   :  { %9069 = vst [vmem:[#allocation78_spill] sm:$0xff] %v6296_v27  ;;  %v6316_v58 = vpop.permute.xlu0 %1552  ;;  %v6320_v27 = vmax.f32 %v1834_v39, %v1730_v2  ;;  %v1837_v9 = vmax.f32 %v1315_v3, %v4197_v38  ;;  %v1318_v32 = vsel %vm875_vm14, -inf, %v9080_v24  ;;  %v9081_v38 = vld [vmem:[#allocation47_spill] sm:$0xff]  ;;  %v4201_v24 = vld [vmem:[%s8663_s0 + $0xc8] sm:$0xff] }
 0x36f   :  { %9070 = vst [vmem:[#allocation85_spill] sm:$0xff] %v6320_v27 }
 0x372   :  { %2164 = vrot.lane.b32.xlu1 %v6318_v15, %s4280_s15  ;;  %2166 = vrot.lane.b32.xlu2 %v6320_v27, %s4280_s15  ;;  %v6363_v27 = vmax.f32 %v1836_v26, %v1732_v10  ;;  %v9082_v10 = vld [vmem:[#allocation22_spill] sm:$0xff]  ;;  %v1736_v26 = vsel %vm1397_vm15, -inf, %v5881_v5 }
 0x373   :  { %2162 = vrot.lane.b32.xlu0 %v6322_v37, %s4280_s15 }
 0x374   :  { %v6339_v2 = vpop.permute.xlu1 %1560  ;;  %v6341_v39 = vpop.permute.xlu2 %1580  ;;  %9077 = vst [vmem:[#allocation98_spill] sm:$0xff] %v6363_v27 }
 0x375   :  { %9074 = vst [vmem:[#allocation92_spill] sm:$0xff] %v6339_v2  ;;  %v1835_v2 = vmax.f32 %v1313_v61, %v4199_v8  ;;  %v6361_v30 = vpop.permute.xlu0 %1558  ;;  %v1317_v61 = vsel %vm875_vm14, -inf, %v9081_v38 }
 0x376   :  { %9075 = vst [vmem:[#allocation84_spill] sm:$0xff] %v6341_v39  ;;  %v6365_v39 = vmax.f32 %v1837_v9, %v1733_v14  ;;  %v1839_v38 = vmax.f32 %v1317_v61, %v4201_v24  ;;  %v1738_v24 = vsel %vm1397_vm15, -inf, %v5843_v41  ;;  %v4205_v41 = vld [vmem:[%s8663_s0 + $0xd8] sm:$0xff] }
 0x377   :  { %9076 = vst [vmem:[#allocation91_spill] sm:$0xff] %v6361_v30  ;;  %v6367_v3 = vmax.f32 %v1835_v2, %v1731_v7  ;;  %v1316_v2 = vsel %vm875_vm14, -inf, %v9082_v10  ;;  %v4200_v7 = vld [vmem:[%s8663_s0 + $0xd0] sm:$0xff]  ;;  %v1734_v10 = vsel %vm1397_vm15, -inf, %v5865_v22  ;;  %v9087_v22 = vld [vmem:[#allocation51_spill] sm:$0xff] }
 0x378   :  { %9078 = vst [vmem:[#allocation90_spill] sm:$0xff] %v6365_v39  ;;  %v1840_v8 = vmax.f32 %v1318_v32, %v4200_v7  ;;  %v1321_v61 = vsel %vm875_vm14, -inf, %v9087_v22  ;;  %v9088_v7 = vld [vmem:[#allocation53_spill] sm:$0xff]  ;;  %v4204_v22 = vld [vmem:[%s8663_s0 + $0xe0] sm:$0xff] }
 0x379   :  { %9079 = vst [vmem:[#allocation97_spill] sm:$0xff] %v6367_v3 }
 0x37a   :  { %2170 = vrot.lane.b32.xlu1 %v6363_v27, %s4280_s15  ;;  %2172 = vrot.lane.b32.xlu2 %v6365_v39, %s4280_s15  ;;  %v6410_v39 = vmax.f32 %v1840_v8, %v1736_v26 }
 0x37b   :  { %2168 = vrot.lane.b32.xlu0 %v6367_v3, %s4280_s15  ;;  %v6408_v3 = vmax.f32 %v1839_v38, %v1735_v54  ;;  %v9089_v54 = vld [vmem:[#allocation28_spill] sm:$0xff]  ;;  %v1739_v38 = vsel %vm1397_vm15, -inf, %v5893_v1 }
 0x37c   :  { %v6384_v14 = vpop.permute.xlu1 %1566  ;;  %v6386_v9 = vpop.permute.xlu2 %1586  ;;  %9085 = vst [vmem:[#allocation102_spill] sm:$0xff] %v6410_v39 }
 0x37d   :  { %9083 = vst [vmem:[#allocation96_spill] sm:$0xff] %v6384_v14  ;;  %v1838_v14 = vmax.f32 %v1316_v2, %v4202_v47  ;;  %v6406_v5 = vpop.permute.xlu0 %1564  ;;  %v1320_v2 = vsel %vm875_vm14, -inf, %v9088_v7 }
 0x37e   :  { %9084 = vst [vmem:[#allocation103_spill] sm:$0xff] %v6408_v3  ;;  %v1842_v7 = vmax.f32 %v1320_v2, %v4204_v22  ;;  %v1741_v22 = vsel %vm1397_vm15, -inf, %v5855_v0  ;;  %v4208_v0 = vld [vmem:[%s8663_s0 + $0xf0] sm:$0xff] }
 0x37f   :  { %v6412_v32 = vmax.f32 %v1838_v14, %v1734_v10  ;;  %v1319_v14 = vsel %vm875_vm14, -inf, %v9089_v54  ;;  %v4203_v10 = vld [vmem:[%s8663_s0 + $0xe8] sm:$0xff]  ;;  %v1737_v54 = vsel %vm1397_vm15, -inf, %v5877_v40  ;;  %v9095_v40 = vld [vmem:[#allocation57_spill] sm:$0xff] }
 0x380   :  { %v1843_v47 = vmax.f32 %v1321_v61, %v4203_v10  ;;  %v6453_v27 = vmax.f32 %v1842_v7, %v1738_v24  ;;  %v1324_v2 = vsel %vm875_vm14, -inf, %v9095_v40  ;;  %v9096_v10 = vld [vmem:[#allocation59_spill] sm:$0xff]  ;;  %v9097_v24 = vld [vmem:[#allocation34_spill] sm:$0xff]  ;;  %v1742_v7 = vsel %vm1397_vm15, -inf, %v5905_v42 }
 0x381   :  { %9086 = vst [vmem:[#allocation108_spill] sm:$0xff] %v6412_v32  ;;  %v4207_v40 = vld [vmem:[%s8663_s0 + $0xf8] sm:$0xff] }
 0x382   :  { %2176 = vrot.lane.b32.xlu1 %v6408_v3, %s4280_s15  ;;  %2178 = vrot.lane.b32.xlu2 %v6410_v39, %s4280_s15  ;;  %9092 = vst [vmem:[#allocation107_spill] sm:$0xff] %v6453_v27  ;;  %v6455_v30 = vmax.f32 %v1843_v47, %v1739_v38 }
 0x383   :  { %2174 = vrot.lane.b32.xlu0 %v6412_v32, %s4280_s15 }
 0x384   :  { %v6429_v26 = vpop.permute.xlu1 %1572  ;;  %v6431_v8 = vpop.permute.xlu2 %1592  ;;  %9093 = vst [vmem:[#allocation3_spill] sm:$0xff] %v6455_v30 }
 0x385   :  { %9090 = vst [vmem:[#allocation7_spill] sm:$0xff] %v6431_v8  ;;  %v1841_v8 = vmax.f32 %v1319_v14, %v4205_v41  ;;  %v6451_v1 = vpop.permute.xlu0 %1570  ;;  %v1323_v14 = vsel %vm875_vm14, -inf, %v9096_v10 }
 0x386   :  { %9091 = vst [vmem:[#allocation9_spill] sm:$0xff] %v6451_v1  ;;  %v1845_v10 = vmax.f32 %v1323_v14, %v4207_v40  ;;  %v1744_v40 = vsel %vm1397_vm15, -inf, %v5867_v17  ;;  %v4211_v17 = vld [vmem:[%s8663_s0 + $0x108] sm:$0xff] }
 0x387   :  { %v6457_v61 = vmax.f32 %v1841_v8, %v1737_v54  ;;  %v1322_v8 = vsel %vm875_vm14, -inf, %v9097_v24  ;;  %v4206_v54 = vld [vmem:[%s8663_s0 + $0x100] sm:$0xff]  ;;  %v1740_v24 = vsel %vm1397_vm15, -inf, %v5889_v53 }
 0x388   :  { %v1846_v41 = vmax.f32 %v1324_v2, %v4206_v54  ;;  %v1844_v1 = vmax.f32 %v1322_v8, %v4208_v0  ;;  %v6498_v3 = vmax.f32 %v1845_v10, %v1741_v22  ;;  %v9099_v53 = vld [vmem:[#allocation63_spill] sm:$0xff]  ;;  %v9100_v54 = vld [vmem:[#allocation65_spill] sm:$0xff]  ;;  %v9101_v22 = vld [vmem:[#allocation40_spill] sm:$0xff]  ;;  %v1745_v10 = vsel %vm1397_vm15, -inf, %v5917_v57 }
 0x389   :  { %9094 = vst [vmem:[#allocation10_spill] sm:$0xff] %v6457_v61  ;;  %v1327_v14 = vsel %vm875_vm14, -inf, %v9099_v53  ;;  %v1326_v8 = vsel %vm875_vm14, -inf, %v9100_v54  ;;  %v4210_v53 = vld [vmem:[%s8663_s0 + $0x110] sm:$0xff] }
 0x38a   :  { %2182 = vrot.lane.b32.xlu1 %v6453_v27, %s4280_s15  ;;  %2184 = vrot.lane.b32.xlu2 %v6455_v30, %s4280_s15  ;;  %v6500_v32 = vmax.f32 %v1846_v41, %v1742_v7  ;;  %v6502_v2 = vmax.f32 %v1844_v1, %v1740_v24  ;;  %v1325_v1 = vsel %vm875_vm14, -inf, %v9101_v22  ;;  %v4209_v24 = vld [vmem:[%s8663_s0 + $0x118] sm:$0xff]  ;;  %v1848_v54 = vmax.f32 %v1326_v8, %v4210_v53 }
 0x38b   :  { %2180 = vrot.lane.b32.xlu0 %v6457_v61, %s4280_s15  ;;  %v1849_v0 = vmax.f32 %v1327_v14, %v4209_v24  ;;  %v1743_v22 = vsel %vm1397_vm15, -inf, %v5901_v34  ;;  %v9106_v34 = vld [vmem:[#allocation69_spill] sm:$0xff]  ;;  %v9107_v24 = vld [vmem:[#allocation71_spill] sm:$0xff]  ;;  %v1747_v53 = vsel %vm1397_vm15, -inf, %v5879_v44  ;;  %v1746_v44 = vsel %vm1397_vm15, -inf, %v5913_v56 }
 0x38c   :  { %v6474_v38 = vpop.permute.xlu1 %1578  ;;  %v6476_v47 = vpop.permute.xlu2 %1598  ;;  %9098 = vst [vmem:[#allocation12_spill] sm:$0xff] %v6500_v32  ;;  %v1330_v8 = vsel %vm875_vm14, -inf, %v9106_v34  ;;  %v4213_v34 = vld [vmem:[%s8663_s0 + $0x128] sm:$0xff]  ;;  %v9113_v56 = vld [vmem:[#allocation75_spill] sm:$0xff] }
 0x38d   :  { %v6496_v42 = vpop.permute.xlu0 %1576  ;;  %v6545_v61 = vmax.f32 %v1849_v0, %v1745_v10 }
 0x38f   :  { %9104 = vst [vmem:[#allocation15_spill] sm:$0xff] %v6545_v61 }
 0x392   :  { %2188 = vrot.lane.b32.xlu1 %v6498_v3, %s4280_s15  ;;  %2190 = vrot.lane.b32.xlu2 %v6500_v32, %s4280_s15  ;;  %v1847_v32 = vmax.f32 %v1325_v1, %v4211_v17  ;;  %v1329_v1 = vsel %vm875_vm14, -inf, %v9107_v24 }
 0x393   :  { %2186 = vrot.lane.b32.xlu0 %v6502_v2, %s4280_s15  ;;  %v1851_v24 = vmax.f32 %v1329_v1, %v4213_v34  ;;  %v1333_v1 = vsel %vm875_vm14, -inf, %v9113_v56  ;;  %v4216_v56 = vld [vmem:[%s8663_s0 + $0x140] sm:$0xff] }
 0x394   :  { %v6519_v7 = vpop.permute.xlu1 %1584  ;;  %v6521_v41 = vpop.permute.xlu2 %1604  ;;  %v6547_v14 = vmax.f32 %v1847_v32, %v1743_v22  ;;  %v4212_v22 = vld [vmem:[%s8663_s0 + $0x130] sm:$0xff] }
 0x395   :  { %9102 = vst [vmem:[#allocation4_spill] sm:$0xff] %v6521_v41  ;;  %v6541_v57 = vpop.permute.xlu0 %1582  ;;  %v6543_v41 = vmax.f32 %v1848_v54, %v1744_v40  ;;  %v9108_v40 = vld [vmem:[#allocation46_spill] sm:$0xff]  ;;  %v1748_v54 = vsel %vm1397_vm15, -inf, %v5929_v63  ;;  %v1852_v17 = vmax.f32 %v1330_v8, %v4212_v22  ;;  %v4214_v63 = vld [vmem:[%s8663_s0 + $0x120] sm:$0xff]  ;;  %v9114_v22 = vld [vmem:[#allocation77_spill] sm:$0xff] }
 0x396   :  { %9105 = vst [vmem:[#allocation5_spill] sm:$0xff] %v6547_v14  ;;  %v1328_v32 = vsel %vm875_vm14, -inf, %v9108_v40 }
 0x397   :  { %9103 = vst [vmem:[#allocation13_spill] sm:$0xff] %v6543_v41  ;;  %v1850_v40 = vmax.f32 %v1328_v32, %v4214_v63  ;;  %v1332_v32 = vsel %vm875_vm14, -inf, %v9114_v22  ;;  %v4215_v63 = vld [vmem:[%s8663_s0 + $0x148] sm:$0xff] }
 0x398   :  { %v1854_v22 = vmax.f32 %v1332_v32, %v4216_v56 }
 0x399   :  { %v6591_v8 = vmax.f32 %v1850_v40, %v1746_v44  ;;  %v1751_v44 = vsel %vm1397_vm15, -inf, %v5941_v16  ;;  %v1855_v40 = vmax.f32 %v1333_v1, %v4215_v63  ;;  %v4217_v16 = vld [vmem:[%s8663_s0 + $0x138] sm:$0xff]  ;;  %v9121_v63 = vld [vmem:[#allocation83_spill] sm:$0xff] }
 0x39a   :  { %2194 = vrot.lane.b32.xlu1 %v6543_v41, %s4280_s15  ;;  %2196 = vrot.lane.b32.xlu2 %v6545_v61, %s4280_s15  ;;  %v6587_v61 = vmax.f32 %v1851_v24, %v1747_v53  ;;  %v6589_v41 = vmax.f32 %v1852_v17, %v1748_v54  ;;  %v9115_v53 = vld [vmem:[#allocation52_spill] sm:$0xff]  ;;  %v1750_v24 = vsel %vm1397_vm15, -inf, %v5891_v28  ;;  %v1749_v28 = vsel %vm1397_vm15, -inf, %v5925_v6  ;;  %v9120_v6 = vld [vmem:[#allocation81_spill] sm:$0xff] }
 0x39b   :  { %2192 = vrot.lane.b32.xlu0 %v6547_v14, %s4280_s15  ;;  %9112 = vst [vmem:[#allocation21_spill] sm:$0xff] %v6591_v8  ;;  %v1331_v54 = vsel %vm875_vm14, -inf, %v9115_v53  ;;  %v1336_v32 = vsel %vm875_vm14, -inf, %v9120_v6  ;;  %v4219_v6 = vld [vmem:[%s8663_s0 + $0x158] sm:$0xff] }
 0x39c   :  { %v6564_v10 = vpop.permute.xlu1 %1590  ;;  %v2131_v0 = vpop.permute.xlu2 %2130  ;;  %9110 = vst [vmem:[#allocation18_spill] sm:$0xff] %v6587_v61  ;;  %v1853_v53 = vmax.f32 %v1331_v54, %v4217_v16  ;;  %v1335_v54 = vsel %vm875_vm14, -inf, %v9121_v63  ;;  %v4218_v16 = vld [vmem:[%s8663_s0 + $0x160] sm:$0xff] }
 0x39d   :  { %9109 = vst [vmem:[#allocation16_spill] sm:$0xff] %v6564_v10  ;;  %v1857_v63 = vmax.f32 %v1335_v54, %v4219_v6 }
 0x39e   :  { %2440 = vst.msk [vmem:[#allocation2 + $0x10] sm:$0xff] %vm637_vm1, %v2131_v0  ;;  %v6585_v0 = vpop.permute.xlu0 %1588  ;;  %v6635_v1 = vmax.f32 %v1853_v53, %v1749_v28  ;;  %v1754_v28 = vsel %vm1397_vm15, -inf, %v5953_v45  ;;  %v1858_v53 = vmax.f32 %v1336_v32, %v4218_v16  ;;  %v4220_v45 = vld [vmem:[%s8663_s0 + $0x150] sm:$0xff] }
 0x39f   :  { %9111 = vst [vmem:[#allocation6_spill] sm:$0xff] %v6589_v41  ;;  %v9128_v16 = vld [vmem:[#allocation89_spill] sm:$0xff] }
 0x3a0   :  { %9119 = vst [vmem:[#allocation29_spill] sm:$0xff] %v6635_v1 }
 0x3a2   :  { %2200 = vrot.lane.b32.xlu1 %v6587_v61, %s4280_s15  ;;  %2202 = vrot.lane.b32.xlu2 %v6589_v41, %s4280_s15  ;;  %v6631_v61 = vmax.f32 %v1854_v22, %v1750_v24  ;;  %v9122_v24 = vld [vmem:[#allocation58_spill] sm:$0xff]  ;;  %v1753_v22 = vsel %vm1397_vm15, -inf, %v5903_v11  ;;  %v1752_v11 = vsel %vm1397_vm15, -inf, %v5937_v23  ;;  %v6677_v41 = vmax.f32 %v1858_v53, %v1754_v28  ;;  %v9127_v23 = vld [vmem:[#allocation87_spill] sm:$0xff] }
 0x3a3   :  { %2198 = vrot.lane.b32.xlu0 %v6591_v8, %s4280_s15  ;;  %v6633_v8 = vmax.f32 %v1855_v40, %v1751_v44  ;;  %v1334_v44 = vsel %vm875_vm14, -inf, %v9122_v24  ;;  %v1339_v54 = vsel %vm875_vm14, -inf, %v9127_v23  ;;  %v4222_v23 = vld [vmem:[%s8663_s0 + $0x170] sm:$0xff] }
 0x3a4   :  { %v6608_v17 = vpop.permute.xlu1 %1596  ;;  %v2137_v34 = vpop.permute.xlu2 %2136  ;;  %9117 = vst [vmem:[#allocation8_spill] sm:$0xff] %v6631_v61  ;;  %v1856_v24 = vmax.f32 %v1334_v44, %v4220_v45  ;;  %v1338_v44 = vsel %vm875_vm14, -inf, %v9128_v16  ;;  %v4221_v45 = vld [vmem:[%s8663_s0 + $0x178] sm:$0xff] }
 0x3a5   :  { %9116 = vst [vmem:[#allocation23_spill] sm:$0xff] %v6608_v17  ;;  %v1860_v16 = vmax.f32 %v1338_v44, %v4222_v23 }
 0x3a6   :  { %2443 = vst.msk [vmem:[#allocation2 + $0x28] sm:$0xff] %vm637_vm1, %v2137_v34  ;;  %v6629_v34 = vpop.permute.xlu0 %1594  ;;  %v6679_v32 = vmax.f32 %v1856_v24, %v1752_v11  ;;  %v1757_v11 = vsel %vm1397_vm15, -inf, %v5965_v21  ;;  %v1861_v24 = vmax.f32 %v1339_v54, %v4221_v45  ;;  %v4223_v21 = vld [vmem:[%s8663_s0 + $0x168] sm:$0xff] }
 0x3a7   :  { %9118 = vst [vmem:[#allocation27_spill] sm:$0xff] %v6633_v8 }
 0x3a8   :  { %9125 = vst [vmem:[#allocation35_spill] sm:$0xff] %v6677_v41  ;;  %v6718_v54 = vmax.f32 %v1861_v24, %v1757_v11 }
 0x3a9   :  { %9126 = vst [vmem:[#allocation14_spill] sm:$0xff] %v6679_v32 }
 0x3aa   :  { %2206 = vrot.lane.b32.xlu1 %v6631_v61, %s4280_s15  ;;  %2208 = vrot.lane.b32.xlu2 %v6633_v8, %s4280_s15  ;;  %9131 = vst [vmem:[#allocation41_spill] sm:$0xff] %v6718_v54 }
 0x3ab   :  { %2204 = vrot.lane.b32.xlu0 %v6635_v1, %s4280_s15  ;;  %v6675_v1 = vmax.f32 %v1857_v63, %v1753_v22  ;;  %v9129_v22 = vld [vmem:[#allocation64_spill] sm:$0xff]  ;;  %v1756_v63 = vsel %vm1397_vm15, -inf, %v5915_v51  ;;  %v1755_v51 = vsel %vm1397_vm15, -inf, %v5949_v60  ;;  %v9133_v60 = vld [vmem:[#allocation93_spill] sm:$0xff] }
 0x3ac   :  { %v6652_v40 = vpop.permute.xlu1 %1602  ;;  %v2143_v56 = vpop.permute.xlu2 %2142  ;;  %v1337_v28 = vsel %vm875_vm14, -inf, %v9129_v22  ;;  %v6716_v8 = vmax.f32 %v1860_v16, %v1756_v63  ;;  %v1342_v44 = vsel %vm875_vm14, -inf, %v9133_v60  ;;  %v9135_v63 = vld [vmem:[#allocation70_spill] sm:$0xff]  ;;  %v1759_v16 = vsel %vm1397_vm15, -inf, %v5927_v36  ;;  %v4225_v60 = vld [vmem:[%s8663_s0 + $0x188] sm:$0xff] }
 0x3ad   :  { %2446 = vst.msk [vmem:[#allocation2 + $0x40] sm:$0xff] %vm637_vm1, %v2143_v56  ;;  %v1859_v22 = vmax.f32 %v1337_v28, %v4223_v21  ;;  %v9134_v28 = vld [vmem:[#allocation95_spill] sm:$0xff]  ;;  %v1340_v11 = vsel %vm875_vm14, -inf, %v9135_v63 }
 0x3ae   :  { %v6673_v56 = vpop.permute.xlu0 %1600  ;;  %9124 = vst [vmem:[#allocation33_spill] sm:$0xff] %v6675_v1  ;;  %v9137_v63 = vld [vmem:[#allocation19_spill] sm:$0xff] }
 0x3af   :  { %9123 = vst [vmem:[#allocation11_spill] sm:$0xff] %v6673_v56  ;;  %v6721_v45 = vmax.f32 %v1859_v22, %v1755_v51  ;;  %v9136_v51 = vld [vmem:[#allocation31_spill] sm:$0xff]  ;;  %v4224_v22 = vld [vmem:[%s8663_s0 + $0x190] sm:$0xff]  ;;  %v1758_v36 = vsel %vm1397_vm15, -inf, %v9137_v63 }
 0x3b0   :  { %9130 = vst [vmem:[#allocation39_spill] sm:$0xff] %v6716_v8  ;;  %v1760_v21 = vsel %vm1397_vm15, -inf, %v9136_v51 }
 0x3b1   :  { %9132 = vst [vmem:[#allocation17_spill] sm:$0xff] %v6721_v45 }
 0x3b2   :  { %2212 = vrot.lane.b32.xlu1 %v6675_v1, %s4280_s15  ;;  %2214 = vrot.lane.b32.xlu2 %v6677_v41, %s4280_s15 }
 0x3b3   :  { %2210 = vrot.lane.b32.xlu0 %v6679_v32, %s4280_s15  ;;  %v7030_v32 = vld [vmem:[#allocation2 + $0x10] sm:$0xff] }
 0x3b4   :  { %v2129_v53 = vpop.permute.xlu1 %2128  ;;  %v2149_v6 = vpop.permute.xlu2 %2148 }
 0x3b5   :  { %2439 = vst.msk [vmem:[#allocation2 + $0x8] sm:$0xff] %vm637_vm1, %v2129_v53 }
 0x3b6   :  { %2449 = vst.msk [vmem:[#allocation2 + $0x58] sm:$0xff] %vm637_vm1, %v2149_v6  ;;  %v2127_v53 = vpop.permute.xlu0 %2126  ;;  %v1341_v6 = vsel %vm875_vm14, -inf, %v9134_v28 }
 0x3b7   :  { %2438 = vst.msk [vmem:[#allocation2] sm:$0xff] %vm637_vm1, %v2127_v53  ;;  %v1864_v53 = vmax.f32 %v1342_v44, %v4224_v22  ;;  %v1863_v28 = vmax.f32 %v1341_v6, %v4225_v60  ;;  %v9141_v6 = vld [vmem:[#allocation99_spill] sm:$0xff] }
 0x3b9   :  { %v6758_v17 = vmax.f32 %v1863_v28, %v1759_v16  ;;  %v6760_v44 = vmax.f32 %v1864_v53, %v1760_v21  ;;  %v9144_v28 = vld [vmem:[#allocation20_spill] sm:$0xff] }
 0x3ba   :  { %2218 = vrot.lane.b32.xlu1 %v6716_v8, %s4280_s15  ;;  %2220 = vrot.lane.b32.xlu2 %v6718_v54, %s4280_s15  ;;  %v1762_v63 = vsel %vm1397_vm15, -inf, %v9144_v28 }
 0x3bb   :  { %2216 = vrot.lane.b32.xlu0 %v6721_v45, %s4280_s15  ;;  %9138 = vst [vmem:[#allocation45_spill] sm:$0xff] %v6758_v17 }
 0x3bc   :  { %v2135_v24 = vpop.permute.xlu1 %2134  ;;  %v2155_v23 = vpop.permute.xlu2 %2154  ;;  %9139 = vst [vmem:[#allocation47_spill] sm:$0xff] %v6760_v44  ;;  %v7044_v41 = vld [vmem:[#allocation2 + $0x8] sm:$0xff] }
 0x3bd   :  { %2442 = vst.msk [vmem:[#allocation2 + $0x20] sm:$0xff] %vm637_vm1, %v2135_v24  ;;  %v4226_v24 = vld [vmem:[%s8663_s0 + $0x180] sm:$0xff] }
 0x3be   :  { %2452 = vst.msk [vmem:[#allocation2 + $0x70] sm:$0xff] %vm637_vm1, %v2155_v23  ;;  %v1862_v51 = vmax.f32 %v1340_v11, %v4226_v24  ;;  %v2133_v61 = vpop.permute.xlu0 %2132  ;;  %v1345_v23 = vsel %vm875_vm14, -inf, %v9141_v6  ;;  %v9142_v11 = vld [vmem:[#allocation101_spill] sm:$0xff]  ;;  %v7042_v45 = vld [vmem:[#allocation2] sm:$0xff] }
 0x3bf   :  { %2441 = vst.msk [vmem:[#allocation2 + $0x18] sm:$0xff] %vm637_vm1, %v2133_v61  ;;  %v1344_v16 = vsel %vm875_vm14, -inf, %v9142_v11  ;;  %v9143_v61 = vld [vmem:[#allocation76_spill] sm:$0xff]  ;;  %v4228_v11 = vld [vmem:[%s8663_s0 + $0x1a0] sm:$0xff] }
 0x3c0   :  { %v6763_v22 = vmax.f32 %v1862_v51, %v1758_v36  ;;  %v1343_v21 = vsel %vm875_vm14, -inf, %v9143_v61  ;;  %v9145_v36 = vld [vmem:[#allocation37_spill] sm:$0xff]  ;;  %v4227_v51 = vld [vmem:[%s8663_s0 + $0x1a8] sm:$0xff]  ;;  %v1866_v61 = vmax.f32 %v1344_v16, %v4228_v11  ;;  %v9153_v11 = vld [vmem:[#allocation26_spill] sm:$0xff] }
 0x3c1   :  { %v1763_v24 = vsel %vm1397_vm15, -inf, %v9145_v36  ;;  %v1867_v6 = vmax.f32 %v1345_v23, %v4227_v51 }
 0x3c2   :  { %9140 = vst [vmem:[#allocation22_spill] sm:$0xff] %v6763_v22  ;;  %2224 = vrot.lane.b32.xlu1 %v6758_v17, %s4280_s15  ;;  %2226 = vrot.lane.b32.xlu2 %v6760_v44, %s4280_s15  ;;  %v9146_v17 = vld [vmem:[#allocation32_spill] sm:$0xff]  ;;  %v6800_v44 = vmax.f32 %v1866_v61, %v1762_v63  ;;  %v1765_v61 = vsel %vm1397_vm15, -inf, %v9153_v11 }
 0x3c3   :  { %2222 = vrot.lane.b32.xlu0 %v6763_v22, %s4280_s15  ;;  %v1761_v28 = vsel %vm1397_vm15, -inf, %v9146_v17  ;;  %v6802_v23 = vmax.f32 %v1867_v6, %v1763_v24  ;;  %v9150_v17 = vld [vmem:[#allocation104_spill] sm:$0xff] }
 0x3c4   :  { %v2141_v53 = vpop.permute.xlu1 %2140  ;;  %v2161_v60 = vpop.permute.xlu2 %2160  ;;  %9147 = vst [vmem:[#allocation51_spill] sm:$0xff] %v6800_v44  ;;  %v1348_v16 = vsel %vm875_vm14, -inf, %v9150_v17 }
 0x3c5   :  { %2445 = vst.msk [vmem:[#allocation2 + $0x38] sm:$0xff] %vm637_vm1, %v2141_v53  ;;  %v4229_v53 = vld [vmem:[%s8663_s0 + $0x198] sm:$0xff] }
 0x3c6   :  { %2455 = vst.msk [vmem:[#allocation2 + $0x88] sm:$0xff] %vm637_vm1, %v2161_v60  ;;  %v1865_v36 = vmax.f32 %v1343_v21, %v4229_v53  ;;  %v2139_v22 = vpop.permute.xlu0 %2138  ;;  %v9151_v21 = vld [vmem:[#allocation106_spill] sm:$0xff] }
 0x3c7   :  { %9148 = vst [vmem:[#allocation53_spill] sm:$0xff] %v6802_v23  ;;  %v1347_v60 = vsel %vm875_vm14, -inf, %v9151_v21  ;;  %v4231_v21 = vld [vmem:[%s8663_s0 + $0x1b8] sm:$0xff] }
 0x3c8   :  { %2444 = vst.msk [vmem:[#allocation2 + $0x30] sm:$0xff] %vm637_vm1, %v2139_v22  ;;  %v6805_v51 = vmax.f32 %v1865_v36, %v1761_v28  ;;  %v9152_v22 = vld [vmem:[#allocation82_spill] sm:$0xff]  ;;  %v9154_v28 = vld [vmem:[#allocation43_spill] sm:$0xff] }
 0x3c9   :  { %v1346_v63 = vsel %vm875_vm14, -inf, %v9152_v22  ;;  %v1766_v53 = vsel %vm1397_vm15, -inf, %v9154_v28  ;;  %v4230_v36 = vld [vmem:[%s8663_s0 + $0x1c0] sm:$0xff]  ;;  %v1869_v22 = vmax.f32 %v1347_v60, %v4231_v21  ;;  %v9162_v21 = vld [vmem:[#allocation25_spill] sm:$0xff] }
 0x3ca   :  { %9149 = vst [vmem:[#allocation28_spill] sm:$0xff] %v6805_v51  ;;  %2230 = vrot.lane.b32.xlu1 %v6800_v44, %s4280_s15  ;;  %2232 = vrot.lane.b32.xlu2 %v6802_v23, %s4280_s15  ;;  %v1870_v17 = vmax.f32 %v1348_v16, %v4230_v36 }
 0x3cb   :  { %2228 = vrot.lane.b32.xlu0 %v6805_v51, %s4280_s15  ;;  %v9155_v51 = vld [vmem:[#allocation38_spill] sm:$0xff]  ;;  %v6842_v44 = vmax.f32 %v1869_v22, %v1765_v61  ;;  %v1768_v22 = vsel %vm1397_vm15, -inf, %v9162_v21 }
 0x3cc   :  { %v2147_v24 = vpop.permute.xlu1 %2146  ;;  %v2167_v6 = vpop.permute.xlu2 %2166  ;;  %v1764_v11 = vsel %vm1397_vm15, -inf, %v9155_v51  ;;  %v6844_v16 = vmax.f32 %v1870_v17, %v1766_v53  ;;  %v9159_v51 = vld [vmem:[#allocation109_spill] sm:$0xff] }
 0x3cd   :  { %2448 = vst.msk [vmem:[#allocation2 + $0x50] sm:$0xff] %vm637_vm1, %v2147_v24  ;;  %v4232_v24 = vld [vmem:[%s8663_s0 + $0x1b0] sm:$0xff]  ;;  %v1351_v60 = vsel %vm875_vm14, -inf, %v9159_v51 }
 0x3ce   :  { %2458 = vst.msk [vmem:[#allocation2 + $0xa0] sm:$0xff] %vm637_vm1, %v2167_v6  ;;  %v1868_v28 = vmax.f32 %v1346_v63, %v4232_v24  ;;  %v2145_v23 = vpop.permute.xlu0 %2144  ;;  %v9160_v63 = vld [vmem:[#allocation111_spill] sm:$0xff]  ;;  %v4233_v24 = vld [vmem:[%s8663_s0 + $0x1d8] sm:$0xff]  ;;  %v4234_v51 = vld [vmem:[%s8663_s0 + $0x1d0] sm:$0xff] }
 0x3cf   :  { %9156 = vst [vmem:[#allocation57_spill] sm:$0xff] %v6842_v44  ;;  %v1350_v6 = vsel %vm875_vm14, -inf, %v9160_v63 }
 0x3d0   :  { %9157 = vst [vmem:[#allocation59_spill] sm:$0xff] %v6844_v16  ;;  %v6847_v36 = vmax.f32 %v1868_v28, %v1764_v11  ;;  %v1769_v11 = vsel %vm1397_vm15, -inf, %v6046_v13  ;;  %v1873_v28 = vmax.f32 %v1351_v60, %v4233_v24  ;;  %v1872_v63 = vmax.f32 %v1350_v6, %v4234_v51  ;;  %v4235_v13 = vld [vmem:[%s8663_s0 + $0x1c8] sm:$0xff] }
 0x3d1   :  { %2447 = vst.msk [vmem:[#allocation2 + $0x48] sm:$0xff] %vm637_vm1, %v2145_v23  ;;  %v9161_v23 = vld [vmem:[#allocation88_spill] sm:$0xff] }
 0x3d2   :  { %9158 = vst [vmem:[#allocation34_spill] sm:$0xff] %v6847_v36  ;;  %2236 = vrot.lane.b32.xlu1 %v6842_v44, %s4280_s15  ;;  %2238 = vrot.lane.b32.xlu2 %v6844_v16, %s4280_s15  ;;  %v1349_v61 = vsel %vm875_vm14, -inf, %v9161_v23  ;;  %v9163_v23 = vld [vmem:[#allocation44_spill] sm:$0xff]  ;;  %v6886_v60 = vmax.f32 %v1873_v28, %v1769_v11 }
 0x3d3   :  { %2234 = vrot.lane.b32.xlu0 %v6847_v36, %s4280_s15  ;;  %v1767_v21 = vsel %vm1397_vm15, -inf, %v9163_v23  ;;  %v6884_v36 = vmax.f32 %v1872_v63, %v1768_v22  ;;  %v9167_v6 = vld [vmem:[#allocation112_spill] sm:$0xff] }
 0x3d4   :  { %v2153_v53 = vpop.permute.xlu1 %2152  ;;  %v2173_v17 = vpop.permute.xlu2 %2172  ;;  %9165 = vst [vmem:[#allocation65_spill] sm:$0xff] %v6886_v60  ;;  %v9170_v63 = vld [vmem:[#allocation24_spill] sm:$0xff] }
 0x3d5   :  { %2451 = vst.msk [vmem:[#allocation2 + $0x68] sm:$0xff] %vm637_vm1, %v2153_v53  ;;  %v1871_v53 = vmax.f32 %v1349_v61, %v4235_v13  ;;  %v9168_v61 = vld [vmem:[#allocation114_spill] sm:$0xff]  ;;  %v1771_v23 = vsel %vm1397_vm15, -inf, %v9170_v63  ;;  %v4236_v13 = vld [vmem:[%s8663_s0 + $0x1f0] sm:$0xff] }
 0x3d6   :  { %2461 = vst.msk [vmem:[#allocation2 + $0xb8] sm:$0xff] %vm637_vm1, %v2173_v17  ;;  %v2151_v44 = vpop.permute.xlu0 %2150  ;;  %v1354_v17 = vsel %vm875_vm14, -inf, %v9167_v6  ;;  %v1353_v22 = vsel %vm875_vm14, -inf, %v9168_v61  ;;  %v4237_v6 = vld [vmem:[%s8663_s0 + $0x1e8] sm:$0xff] }
 0x3d7   :  { %9164 = vst [vmem:[#allocation63_spill] sm:$0xff] %v6884_v36  ;;  %v6889_v24 = vmax.f32 %v1871_v53, %v1767_v21  ;;  %v1772_v21 = vsel %vm1397_vm15, -inf, %v6091_v25  ;;  %v1876_v53 = vmax.f32 %v1354_v17, %v4236_v13  ;;  %v1875_v61 = vmax.f32 %v1353_v22, %v4237_v6  ;;  %v4238_v25 = vld [vmem:[%s8663_s0 + $0x1e0] sm:$0xff]  ;;  %v9175_v22 = vld [vmem:[#allocation117_spill] sm:$0xff] }
 0x3d8   :  { %2450 = vst.msk [vmem:[#allocation2 + $0x60] sm:$0xff] %vm637_vm1, %v2151_v44  ;;  %v9169_v44 = vld [vmem:[#allocation94_spill] sm:$0xff] }
 0x3d9   :  { %9166 = vst [vmem:[#allocation40_spill] sm:$0xff] %v6889_v24  ;;  %v1352_v11 = vsel %vm875_vm14, -inf, %v9169_v44  ;;  %v9171_v44 = vld [vmem:[#allocation50_spill] sm:$0xff]  ;;  %v6926_v16 = vmax.f32 %v1875_v61, %v1771_v23  ;;  %v6928_v17 = vmax.f32 %v1876_v53, %v1772_v21  ;;  %v4239_v61 = vld [vmem:[%s8663_s0 + $0x200] sm:$0xff] }
 0x3da   :  { %2242 = vrot.lane.b32.xlu1 %v6884_v36, %s4280_s15  ;;  %2244 = vrot.lane.b32.xlu2 %v6886_v60, %s4280_s15  ;;  %v1770_v63 = vsel %vm1397_vm15, -inf, %v9171_v44  ;;  %v9177_v53 = vld [vmem:[#allocation30_spill] sm:$0xff]  ;;  %v7003_v60 = vld [vmem:[#allocation2 + $0x30] sm:$0xff] }
 0x3db   :  { %2240 = vrot.lane.b32.xlu0 %v6889_v24, %s4280_s15  ;;  %9172 = vst [vmem:[#allocation69_spill] sm:$0xff] %v6926_v16  ;;  %v1774_v6 = vsel %vm1397_vm15, -inf, %v9177_v53 }
 0x3dc   :  { %v2159_v28 = vpop.permute.xlu1 %2158  ;;  %v2179_v51 = vpop.permute.xlu2 %2178  ;;  %9173 = vst [vmem:[#allocation71_spill] sm:$0xff] %v6928_v17 }
 0x3dd   :  { %2454 = vst.msk [vmem:[#allocation2 + $0x80] sm:$0xff] %vm637_vm1, %v2159_v28  ;;  %v1874_v28 = vmax.f32 %v1352_v11, %v4238_v25  ;;  %v9176_v11 = vld [vmem:[#allocation100_spill] sm:$0xff]  ;;  %v4240_v25 = vld [vmem:[%s8663_s0 + $0x1f8] sm:$0xff] }
 0x3de   :  { %2464 = vst.msk [vmem:[#allocation2 + $0xd0] sm:$0xff] %vm637_vm1, %v2179_v51  ;;  %v2157_v24 = vpop.permute.xlu0 %2156  ;;  %v1356_v51 = vsel %vm875_vm14, -inf, %v9175_v22  ;;  %v1355_v23 = vsel %vm875_vm14, -inf, %v9176_v11  ;;  %v6959_v11 = vld [vmem:[#allocation2 + $0x70] sm:$0xff] }
 0x3df   :  { %2453 = vst.msk [vmem:[#allocation2 + $0x78] sm:$0xff] %vm637_vm1, %v2157_v24  ;;  %v6931_v13 = vmax.f32 %v1874_v28, %v1770_v63  ;;  %v1878_v44 = vmax.f32 %v1356_v51, %v4239_v61  ;;  %v1773_v63 = vsel %vm1397_vm15, -inf, %v6069_v59  ;;  %v1877_v28 = vmax.f32 %v1355_v23, %v4240_v25  ;;  %v6979_v61 = vld [vmem:[#allocation2 + $0x60] sm:$0xff]  ;;  %v6983_v25 = vld [vmem:[#allocation2 + $0x58] sm:$0xff] }
 0x3e1   :  { %9174 = vst [vmem:[#allocation46_spill] sm:$0xff] %v6931_v13  ;;  %v6963_v53 = vmax.f32 %v1878_v44, %v1774_v6  ;;  %v6968_v59 = vmax.f32 %v1877_v28, %v1773_v63  ;;  %v6976_v6 = vld [vmem:[#allocation2 + $0x50] sm:$0xff]  ;;  %v6981_v44 = vld [vmem:[#allocation2 + $0x68] sm:$0xff] }
 0x3e2   :  { %2248 = vrot.lane.b32.xlu1 %v6926_v16, %s4280_s15  ;;  %2250 = vrot.lane.b32.xlu2 %v6928_v17, %s4280_s15  ;;  %v3931_v28 = vpack.i.bf16 %v6983_v25, %v6976_v6 }
 0x3e3   :  { %2246 = vrot.lane.b32.xlu0 %v6931_v13, %s4280_s15  ;;  %9178 = vst [vmem:[#allocation75_spill] sm:$0xff] %v6963_v53  ;;  %v7013_v13 = vld [vmem:[#allocation2 + $0x20] sm:$0xff] }
 0x3e4   :  { %v2165_v24 = vpop.permute.xlu1 %2164  ;;  %v2185_v21 = vpop.permute.xlu2 %2184  ;;  %9179 = vst [vmem:[#allocation77_spill] sm:$0xff] %v6968_v59 }
 0x3e5   :  { %2457 = vst.msk [vmem:[#allocation2 + $0x98] sm:$0xff] %vm637_vm1, %v2165_v24  ;;  %v7064_v39 = vld [vmem:[#allocation2 + $0xd0] sm:$0xff] }
 0x3e6   :  { %2467 = vst.msk [vmem:[#allocation2 + $0xe8] sm:$0xff] %vm637_vm1, %v2185_v21  ;;  %v2163_v22 = vpop.permute.xlu0 %2162  ;;  %v6961_v24 = vld [vmem:[#allocation2 + $0x78] sm:$0xff] }
 0x3e7   :  { %2456 = vst.msk [vmem:[#allocation2 + $0x90] sm:$0xff] %vm637_vm1, %v2163_v22  ;;  %v3916_v51 = vpack.i.bf16 %v6961_v24, %v6959_v11  ;;  %v3921_v22 = vpack.i.bf16 %v6981_v44, %v6979_v61 }
 0x3e8   :  { %9183 = vst [vmem:[#allocation58_spill] sm:$0xff] %v7064_v39 }
 0x3ea   :  { %2254 = vrot.lane.b32.xlu1 %v6963_v53, %s4280_s15  ;;  %3917 = vrot.lane.b32.xlu2 %v3916_v51, %s4285_s26 }
 0x3eb   :  { %2252 = vrot.lane.b32.xlu0 %v6968_v59, %s4280_s15  ;;  %v7016_v59 = vld [vmem:[#allocation2 + $0x28] sm:$0xff] }
 0x3ec   :  { %v2171_v23 = vpop.permute.xlu1 %2170  ;;  %v2191_v21 = vpop.permute.xlu2 %2190  ;;  %v7061_v10 = vld [vmem:[#allocation2 + $0x98] sm:$0xff] }
 0x3ed   :  { %2460 = vst.msk [vmem:[#allocation2 + $0xb0] sm:$0xff] %vm637_vm1, %v2171_v23  ;;  %v7047_v54 = vld [vmem:[#allocation2 + $0xe8] sm:$0xff] }
 0x3ee   :  { %2470 = vst.msk [vmem:[#allocation2 + $0x100] sm:$0xff] %vm637_vm1, %v2191_v21  ;;  %v2169_v63 = vpop.permute.xlu0 %2168  ;;  %v6993_v21 = vld [vmem:[#allocation2 + $0x48] sm:$0xff]  ;;  %v7059_v56 = vld [vmem:[#allocation2 + $0x90] sm:$0xff] }
 0x3ef   :  { %2459 = vst.msk [vmem:[#allocation2 + $0xa8] sm:$0xff] %vm637_vm1, %v2169_v63  ;;  %v6996_v63 = vld [vmem:[#allocation2 + $0x40] sm:$0xff] }
 0x3f0   :  { %v3946_v36 = vpack.i.bf16 %v6993_v21, %v6996_v63  ;;  %9181 = vst [vmem:[#allocation81_spill] sm:$0xff] %v7047_v54 }
 0x3f2   :  { %3932 = vrot.lane.b32.xlu2 %v3931_v28, %s4285_s26 }
 0x3f3   :  { %3922 = vrot.lane.b32.xlu0 %v3921_v22, %s4285_s26 }
 0x3f4   :  { %v2177_v51 = vpop.permute.xlu1 %2176  ;;  %v2197_v23 = vpop.permute.xlu2 %2196 }
 0x3f5   :  { %2463 = vst.msk [vmem:[#allocation2 + $0xc8] sm:$0xff] %vm637_vm1, %v2177_v51  ;;  %v7005_v51 = vld [vmem:[#allocation2 + $0x38] sm:$0xff] }
 0x3f6   :  { %2473 = vst.msk [vmem:[#allocation2 + $0x118] sm:$0xff] %vm637_vm1, %v2197_v23  ;;  %v2175_v53 = vpop.permute.xlu0 %2174 }
 0x3f7   :  { %2462 = vst.msk [vmem:[#allocation2 + $0xc0] sm:$0xff] %vm637_vm1, %v2175_v53  ;;  %v3961_v53 = vpack.i.bf16 %v7005_v51, %v7003_v60 }
 0x3fa   :  { %3947 = vrot.lane.b32.xlu2 %v3946_v36, %s4285_s26 }
 0x3fc   :  { %v2183_v28 = vpop.permute.xlu1 %2182  ;;  %v2203_v22 = vpop.permute.xlu2 %2202 }
 0x3fd   :  { %2466 = vst.msk [vmem:[#allocation2 + $0xe0] sm:$0xff] %vm637_vm1, %v2183_v28 }
 0x3fe   :  { %2476 = vst.msk [vmem:[#allocation2 + $0x130] sm:$0xff] %vm637_vm1, %v2203_v22  ;;  %v2181_v23 = vpop.permute.xlu0 %2180  ;;  %v3976_v22 = vpack.i.bf16 %v7016_v59, %v7013_v13 }
 0x3ff   :  { %2465 = vst.msk [vmem:[#allocation2 + $0xd8] sm:$0xff] %vm637_vm1, %v2181_v23 }
 0x402   :  { %3962 = vrot.lane.b32.xlu2 %v3961_v53, %s4285_s26 }
 0x404   :  { %v2189_v16 = vpop.permute.xlu1 %2188  ;;  %v2209_v36 = vpop.permute.xlu2 %2208 }
 0x405   :  { %2469 = vst.msk [vmem:[#allocation2 + $0xf8] sm:$0xff] %vm637_vm1, %v2189_v16  ;;  %v7025_v16 = vld [vmem:[#allocation2 + $0x18] sm:$0xff] }
 0x406   :  { %2479 = vst.msk [vmem:[#allocation2 + $0x148] sm:$0xff] %vm637_vm1, %v2209_v36  ;;  %v2187_v28 = vpop.permute.xlu0 %2186 }
 0x407   :  { %2468 = vst.msk [vmem:[#allocation2 + $0xf0] sm:$0xff] %vm637_vm1, %v2187_v28 }
 0x40a   :  { %3977 = vrot.lane.b32.xlu2 %v3976_v22, %s4285_s26  ;;  %v3991_v22 = vpack.i.bf16 %v7025_v16, %v7030_v32 }
 0x40c   :  { %v2195_v23 = vpop.permute.xlu1 %2194  ;;  %v2215_v53 = vpop.permute.xlu2 %2214  ;;  %v7023_v17 = vld [vmem:[#allocation2 + $0xf8] sm:$0xff] }
 0x40d   :  { %2472 = vst.msk [vmem:[#allocation2 + $0x110] sm:$0xff] %vm637_vm1, %v2195_v23 }
 0x40e   :  { %2482 = vst.msk [vmem:[#allocation2 + $0x160] sm:$0xff] %vm637_vm1, %v2215_v53  ;;  %v2193_v36 = vpop.permute.xlu0 %2192  ;;  %v7028_v1 = vld [vmem:[#allocation2 + $0xf0] sm:$0xff]  ;;  %v7040_v53 = vld [vmem:[#allocation2 + $0xe0] sm:$0xff] }
 0x40f   :  { %2471 = vst.msk [vmem:[#allocation2 + $0x108] sm:$0xff] %vm637_vm1, %v2193_v36  ;;  %v3936_v28 = vpack.i.bf16 %v7023_v17, %v7028_v1 }
 0x410   :  { %9180 = vst [vmem:[#allocation52_spill] sm:$0xff] %v7040_v53 }
 0x411   :  { %3937 = vrot.lane.b32.xlu0 %v3936_v28, %s4285_s26  ;;  %v3951_v28 = vpack.i.bf16 %v7047_v54, %v7040_v53 }
 0x412   :  { %3992 = vrot.lane.b32.xlu2 %v3991_v22, %s4285_s26  ;;  %v4006_v22 = vpack.i.bf16 %v7044_v41, %v7042_v45 }
 0x414   :  { %v2201_v23 = vpop.permute.xlu1 %2200  ;;  %v2221_v14 = vpop.permute.xlu2 %2220 }
 0x415   :  { %2475 = vst.msk [vmem:[#allocation2 + $0x128] sm:$0xff] %vm637_vm1, %v2201_v23 }
 0x416   :  { %2485 = vst.msk [vmem:[#allocation2 + $0x178] sm:$0xff] %vm637_vm1, %v2221_v14  ;;  %v2199_v36 = vpop.permute.xlu0 %2198  ;;  %v7057_v14 = vld [vmem:[#allocation2 + $0xd8] sm:$0xff] }
 0x417   :  { %2474 = vst.msk [vmem:[#allocation2 + $0x120] sm:$0xff] %vm637_vm1, %v2199_v36 }
 0x418   :  { %9182 = vst [vmem:[#allocation83_spill] sm:$0xff] %v7057_v14 }
 0x419   :  { %3952 = vrot.lane.b32.xlu0 %v3951_v28, %s4285_s26  ;;  %v3966_v28 = vpack.i.bf16 %v7057_v14, %v7064_v39  ;;  %v7080_v14 = vld [vmem:[#allocation2 + $0xc0] sm:$0xff]  ;;  %v7082_v39 = vld [vmem:[#allocation2 + $0xc8] sm:$0xff] }
 0x41a   :  { %4007 = vrot.lane.b32.xlu2 %v4006_v22, %s4285_s26  ;;  %v4021_v22 = vpack.i.bf16 %v7061_v10, %v7059_v56  ;;  %9185 = vst [vmem:[#allocation87_spill] sm:$0xff] %v7080_v14 }
 0x41b   :  { %9186 = vst [vmem:[#allocation89_spill] sm:$0xff] %v7082_v39 }
 0x41c   :  { %v2207_v23 = vpop.permute.xlu1 %2206  ;;  %v2227_v8 = vpop.permute.xlu2 %2226 }
 0x41d   :  { %2478 = vst.msk [vmem:[#allocation2 + $0x140] sm:$0xff] %vm637_vm1, %v2207_v23  ;;  %v9184_v23 = vld [vmem:[#allocation119_spill] sm:$0xff] }
 0x41e   :  { %2488 = vst.msk [vmem:[#allocation2 + $0x190] sm:$0xff] %vm637_vm1, %v2227_v8  ;;  %v2205_v36 = vpop.permute.xlu0 %2204  ;;  %v1370_v54 = vsel %vm875_vm14, -inf, %v9184_v23 }
 0x41f   :  { %2477 = vst.msk [vmem:[#allocation2 + $0x138] sm:$0xff] %vm637_vm1, %v2205_v36  ;;  %v1788_v36 = vsel %vm1397_vm15, -inf, %v6294_v33  ;;  %v3981_v33 = vpack.i.bf16 %v7082_v39, %v7080_v14 }
 0x421   :  { %3967 = vrot.lane.b32.xlu0 %v3966_v28, %s4285_s26  ;;  %v4241_v28 = vld [vmem:[%s8663_s0 + $0x270] sm:$0xff] }
 0x422   :  { %4022 = vrot.lane.b32.xlu2 %v4021_v22, %s4285_s26  ;;  %v1892_v22 = vmax.f32 %v1370_v54, %v4241_v28 }
 0x424   :  { %v2213_v8 = vpop.permute.xlu1 %2212  ;;  %v2233_v30 = vpop.permute.xlu2 %2232  ;;  %v7088_v53 = vmax.f32 %v1892_v22, %v1788_v36  ;;  %v7103_v36 = vld [vmem:[#allocation2 + $0xb0] sm:$0xff]  ;;  %v4242_v22 = vld [vmem:[%s8663_s0 + $0x2f8] sm:$0xff] }
 0x425   :  { %2481 = vst.msk [vmem:[#allocation2 + $0x158] sm:$0xff] %vm637_vm1, %v2213_v8  ;;  %v9188_v8 = vld [vmem:[#allocation145_spill] sm:$0xff] }
 0x426   :  { %2491 = vst.msk [vmem:[#allocation2 + $0x1a8] sm:$0xff] %vm637_vm1, %v2233_v30  ;;  %v2211_v23 = vpop.permute.xlu0 %2210  ;;  %v1387_v27 = vsel %vm875_vm14, -inf, %v9188_v8  ;;  %v1805_v30 = vsel %vm1397_vm15, -inf, %v6585_v0 }
 0x427   :  { %9187 = vst [vmem:[#allocation64_spill] sm:$0xff] %v7088_v53 }
 0x428   :  { %2480 = vst.msk [vmem:[#allocation2 + $0x150] sm:$0xff] %vm637_vm1, %v2211_v23  ;;  %v1909_v23 = vmax.f32 %v1387_v27, %v4242_v22 }
 0x429   :  { %3982 = vrot.lane.b32.xlu0 %v3981_v33, %s4285_s26  ;;  %9189 = vst [vmem:[#allocation93_spill] sm:$0xff] %v7103_v36 }
 0x42a   :  { %2282 = vrot.lane.b32.xlu2 %v7088_v53, %s4280_s15  ;;  %v7109_v53 = vld [vmem:[#allocation2 + $0xb8] sm:$0xff]  ;;  %v7111_v8 = vmax.f32 %v1909_v23, %v1805_v30  ;;  %v1802_v23 = vsel %vm1397_vm15, -inf, %v6541_v57 }
 0x42b   :  { %9190 = vst [vmem:[#allocation95_spill] sm:$0xff] %v7109_v53  ;;  %v3996_v0 = vpack.i.bf16 %v7109_v53, %v7103_v36  ;;  %v7124_v30 = vld [vmem:[#allocation2 + $0x178] sm:$0xff]  ;;  %v7139_v36 = vld [vmem:[#allocation2 + $0xa0] sm:$0xff] }
 0x42c   :  { %v2219_v54 = vpop.permute.xlu1 %2218  ;;  %v2239_v28 = vpop.permute.xlu2 %2238  ;;  %9191 = vst [vmem:[#allocation70_spill] sm:$0xff] %v7111_v8 }
 0x42d   :  { %2484 = vst.msk [vmem:[#allocation2 + $0x170] sm:$0xff] %vm637_vm1, %v2219_v54  ;;  %v9192_v54 = vld [vmem:[#allocation142_spill] sm:$0xff] }
 0x42e   :  { %2494 = vst.msk [vmem:[#allocation2 + $0x1c0] sm:$0xff] %vm637_vm1, %v2239_v28  ;;  %v2217_v33 = vpop.permute.xlu0 %2216  ;;  %v1384_v27 = vsel %vm875_vm14, -inf, %v9192_v54  ;;  %v4243_v54 = vld [vmem:[%s8663_s0 + $0x2e0] sm:$0xff] }
 0x42f   :  { %2483 = vst.msk [vmem:[#allocation2 + $0x168] sm:$0xff] %vm637_vm1, %v2217_v33 }
 0x430   :  { %9194 = vst [vmem:[#allocation19_spill] sm:$0xff] %v7124_v30 }
 0x431   :  { %3997 = vrot.lane.b32.xlu0 %v3996_v0, %s4285_s26  ;;  %v7132_v0 = vld [vmem:[#allocation2 + $0xa8] sm:$0xff]  ;;  %9196 = vst [vmem:[#allocation101_spill] sm:$0xff] %v7139_v36 }
 0x432   :  { %2316 = vrot.lane.b32.xlu2 %v7111_v8, %s4280_s15  ;;  %9195 = vst [vmem:[#allocation99_spill] sm:$0xff] %v7132_v0  ;;  %v1906_v8 = vmax.f32 %v1384_v27, %v4243_v54 }
 0x434   :  { %v2225_v28 = vpop.permute.xlu1 %2224  ;;  %v2245_v22 = vpop.permute.xlu2 %2244  ;;  %v7122_v39 = vld [vmem:[#allocation2 + $0x170] sm:$0xff]  ;;  %v7141_v57 = vmax.f32 %v1906_v8, %v1802_v23  ;;  %v7154_v8 = vld [vmem:[#allocation2 + $0x160] sm:$0xff]  ;;  %v7160_v23 = vld [vmem:[#allocation2 + $0x108] sm:$0xff] }
 0x435   :  { %9193 = vst [vmem:[#allocation31_spill] sm:$0xff] %v7122_v39  ;;  %v3926_v33 = vpack.i.bf16 %v7124_v30, %v7122_v39  ;;  %v4246_v39 = vld [vmem:[%s8663_s0 + $0x278] sm:$0xff] }
 0x436   :  { %2487 = vst.msk [vmem:[#allocation2 + $0x188] sm:$0xff] %vm637_vm1, %v2225_v28  ;;  %v2223_v53 = vpop.permute.xlu0 %2222  ;;  %v4011_v28 = vpack.i.bf16 %v7132_v0, %v7139_v36  ;;  %v7149_v27 = vld [vmem:[#allocation2 + $0x168] sm:$0xff]  ;;  %v7168_v36 = vld [vmem:[#allocation2 + $0x100] sm:$0xff] }
 0x437   :  { %2497 = vst.msk [vmem:[#allocation2 + $0x1d8] sm:$0xff] %vm637_vm1, %v2245_v22  ;;  %3927 = vrot.lane.b32.xlu1 %v3926_v33, %s4285_s26  ;;  %v9199_v22 = vld [vmem:[#allocation116_spill] sm:$0xff] }
 0x438   :  { %9197 = vst [vmem:[#allocation76_spill] sm:$0xff] %v7141_v57  ;;  %v1367_v33 = vsel %vm875_vm14, -inf, %v9199_v22 }
 0x439   :  { %2486 = vst.msk [vmem:[#allocation2 + $0x180] sm:$0xff] %vm637_vm1, %v2223_v53  ;;  %4012 = vrot.lane.b32.xlu0 %v4011_v28, %s4285_s26  ;;  %v1785_v53 = vsel %vm1397_vm15, -inf, %v6249_v52  ;;  %v3941_v28 = vpack.i.bf16 %v7149_v27, %v7154_v8 }
 0x43a   :  { %2310 = vrot.lane.b32.xlu2 %v7141_v57, %s4280_s15  ;;  %9198 = vst [vmem:[#allocation20_spill] sm:$0xff] %v7149_v27  ;;  %v4244_v57 = vld [vmem:[%s8663_s0 + $0x258] sm:$0xff] }
 0x43b   :  { %9200 = vst [vmem:[#allocation37_spill] sm:$0xff] %v7154_v8  ;;  %v1889_v22 = vmax.f32 %v1367_v33, %v4244_v57  ;;  %v7179_v57 = vld [vmem:[#allocation2 + $0x150] sm:$0xff]  ;;  %v2661_v8 = vmax.f32 %v6961_v24, %v6277_v29  ;;  %v7218_v24 = vld [vmem:[#allocation2 + $0x140] sm:$0xff] }
 0x43c   :  { %v2231_v54 = vpop.permute.xlu1 %2230  ;;  %v2251_v30 = vpop.permute.xlu2 %2250  ;;  %9201 = vst [vmem:[#allocation32_spill] sm:$0xff] %v7160_v23  ;;  %v9205_v33 = vld [vmem:[#allocation113_spill] sm:$0xff] }
 0x43d   :  { %2490 = vst.msk [vmem:[#allocation2 + $0x1a0] sm:$0xff] %vm637_vm1, %v2231_v54  ;;  %v7171_v52 = vmax.f32 %v1889_v22, %v1785_v53  ;;  %v4026_v54 = vpack.i.bf16 %v7160_v23, %v7168_v36  ;;  %v9206_v53 = vld [vmem:[#allocation132_spill] sm:$0xff]  ;;  %v1789_v22 = vsel %vm1397_vm15, -inf, %v6161_v55  ;;  %v4245_v55 = vld [vmem:[%s8663_s0 + $0x240] sm:$0xff] }
 0x43e   :  { %2500 = vst.msk [vmem:[#allocation2 + $0x1f0] sm:$0xff] %vm637_vm1, %v2251_v30  ;;  %v2229_v0 = vpop.permute.xlu0 %2228  ;;  %v7181_v30 = vld [vmem:[#allocation2 + $0x158] sm:$0xff] }
 0x43f   :  { %9202 = vst [vmem:[#allocation104_spill] sm:$0xff] %v7168_v36  ;;  %3942 = vrot.lane.b32.xlu1 %v3941_v28, %s4285_s26  ;;  %v1364_v28 = vsel %vm875_vm14, -inf, %v9205_v33  ;;  %v2660_v36 = vmax.f32 %v6959_v11, %v6230_v48 }
 0x440   :  { %9203 = vst [vmem:[#allocation106_spill] sm:$0xff] %v7171_v52 }
 0x441   :  { %2489 = vst.msk [vmem:[#allocation2 + $0x198] sm:$0xff] %vm637_vm1, %v2229_v0  ;;  %4027 = vrot.lane.b32.xlu0 %v4026_v54, %s4285_s26  ;;  %v1371_v0 = vsel %vm875_vm14, -inf, %v9206_v53  ;;  %v1782_v54 = vsel %vm1397_vm15, -inf, %v6204_v18  ;;  %v3956_v53 = vpack.i.bf16 %v7181_v30, %v7179_v57  ;;  %v1886_v18 = vmax.f32 %v1364_v28, %v4245_v55  ;;  %v4247_v55 = vld [vmem:[%s8663_s0 + $0x260] sm:$0xff] }
 0x442   :  { %2276 = vrot.lane.b32.xlu2 %v7171_v52, %s4280_s15  ;;  %9204 = vst [vmem:[#allocation82_spill] sm:$0xff] %v7181_v30  ;;  %v1893_v48 = vmax.f32 %v1371_v0, %v4246_v39  ;;  %v9207_v39 = vld [vmem:[#allocation129_spill] sm:$0xff] }
 0x443   :  { %v7211_v30 = vmax.f32 %v1886_v18, %v1782_v54  ;;  %v1786_v54 = vsel %vm1397_vm15, -inf, %v6116_v43 }
 0x444   :  { %v2237_v52 = vpop.permute.xlu1 %2236  ;;  %v3918_v23 = vpop.permute.xlu2 %3917  ;;  %v7209_v14 = vmax.f32 %v1893_v48, %v1789_v22  ;;  %v7226_v22 = vld [vmem:[#allocation2 + $0x148] sm:$0xff] }
 0x445   :  { %2493 = vst.msk [vmem:[#allocation2 + $0x1b8] sm:$0xff] %vm637_vm1, %v2237_v52  ;;  %v3920_v33 = vunpack.i.h.bf16 %v3918_v23  ;;  %v3919_v27 = vunpack.i.l.bf16 %v3918_v23  ;;  %v4248_v48 = vld [vmem:[%s8663_s0 + $0x2c8] sm:$0xff] }
 0x446   :  { %v2235_v11 = vpop.permute.xlu0 %2234 }
 0x447   :  { %3957 = vrot.lane.b32.xlu1 %v3956_v53, %s4285_s26  ;;  %v3180_v23 = vmax.f32 %v2660_v36, %v3919_v27  ;;  %v3181_v52 = vmax.f32 %v2661_v8, %v3920_v33  ;;  %2492 = vst.msk [vmem:[#allocation2 + $0x1b0] sm:$0xff] %vm637_vm1, %v2235_v11  ;;  %v1368_v36 = vsel %vm875_vm14, -inf, %v9207_v39  ;;  %v9208_v27 = vld [vmem:[#allocation139_spill] sm:$0xff]  ;;  %v1799_v33 = vsel %vm1397_vm15, -inf, %v6496_v42 }
 0x448   :  { %v1381_v8 = vsel %vm875_vm14, -inf, %v9208_v27  ;;  %v3971_v53 = vpack.i.bf16 %v7226_v22, %v7218_v24  ;;  %v1890_v18 = vmax.f32 %v1368_v36, %v4247_v55  ;;  %v2656_v39 = vmax.f32 %v6976_v6, %v6183_v46  ;;  %v7257_v27 = vld [vmem:[#allocation2 + $0x138] sm:$0xff] }
 0x449   :  { %v3445_v29 = vpack.c.bf16 %v3181_v52, %v3180_v23  ;;  %2284 = vrot.lane.b32.xlu0 %v7209_v14, %s4280_s15  ;;  %v1903_v11 = vmax.f32 %v1381_v8, %v4248_v48  ;;  %v2657_v36 = vmax.f32 %v6983_v25, %v6185_v31  ;;  %v9211_v6 = vld [vmem:[#allocation42_spill] sm:$0xff]  ;;  %v1803_v25 = vsel %vm1397_vm15, -inf, %v6519_v7  ;;  %v4249_v7 = vld [vmem:[%s8663_s0 + $0x230] sm:$0xff] }
 0x44a   :  { %2270 = vrot.lane.b32.xlu2 %v7211_v30, %s4280_s15  ;;  %v7244_v42 = vmax.f32 %v1890_v18, %v1786_v54  ;;  %v1780_v31 = vsel %vm1397_vm15, -inf, %v9211_v6  ;;  %v7271_v18 = vld [vmem:[#allocation2 + $0x130] sm:$0xff] }
 0x44b   :  { %3514 = vmatpush.bf16.msra.mxu0 %v3445_v29  ;;  %3886 = vmatpush.bf16.msra.mxu3 %v3445_v29  ;;  %v7246_v29 = vmax.f32 %v1903_v11, %v1799_v33  ;;  %v9210_v33 = vld [vmem:[#allocation134_spill] sm:$0xff]  ;;  %v2654_v11 = vmax.f32 %v6996_v63, %v6140_v19 }
 0x44c   :  { %v2243_v28 = vpop.permute.xlu1 %2242  ;;  %v3933_v0 = vpop.permute.xlu2 %3932  ;;  %v1385_v46 = vsel %vm875_vm14, -inf, %v9210_v33 }
 0x44d   :  { %2496 = vst.msk [vmem:[#allocation2 + $0x1d0] sm:$0xff] %vm637_vm1, %v2243_v28  ;;  %v3935_v43 = vunpack.i.h.bf16 %v3933_v0  ;;  %v3934_v23 = vunpack.i.l.bf16 %v3933_v0  ;;  %v9209_v0 = vld [vmem:[#allocation123_spill] sm:$0xff] }
 0x44e   :  { %v2241_v52 = vpop.permute.xlu0 %2240  ;;  %v1362_v54 = vsel %vm875_vm14, -inf, %v9209_v0 }
 0x44f   :  { %3972 = vrot.lane.b32.xlu1 %v3971_v53, %s4285_s26  ;;  %2495 = vst.msk [vmem:[#allocation2 + $0x1c8] sm:$0xff] %vm637_vm1, %v2241_v52  ;;  %v3176_v8 = vmax.f32 %v2656_v39, %v3934_v23  ;;  %v3177_v28 = vmax.f32 %v2657_v36, %v3935_v43  ;;  %v3986_v52 = vpack.i.bf16 %v7257_v27, %v7271_v18 }
 0x450   :  { %v2655_v39 = vmax.f32 %v6993_v21, %v6187_v12  ;;  %v1884_v36 = vmax.f32 %v1362_v54, %v4249_v7  ;;  %v7300_v21 = vld [vmem:[#allocation2 + $0x120] sm:$0xff]  ;;  %v7302_v54 = vld [vmem:[#allocation2 + $0x128] sm:$0xff] }
 0x451   :  { %2278 = vrot.lane.b32.xlu0 %v7244_v42, %s4280_s15  ;;  %v7273_v48 = vpack.c.bf16 %v3177_v28, %v3176_v8  ;;  %v4250_v8 = vld [vmem:[%s8663_s0 + $0x2e8] sm:$0xff] }
 0x452   :  { %2304 = vrot.lane.b32.xlu2 %v7246_v29, %s4280_s15  ;;  %v1907_v19 = vmax.f32 %v1385_v46, %v4250_v8  ;;  %v7289_v33 = vmax.f32 %v1884_v36, %v1780_v31  ;;  %v9213_v46 = vld [vmem:[#allocation128_spill] sm:$0xff]  ;;  %v4001_v36 = vpack.i.bf16 %v7302_v54, %v7300_v21  ;;  %v2653_v8 = vmax.f32 %v7005_v51, %v6138_v49 }
 0x453   :  { %v1379_v31 = vsel %vm875_vm14, -inf, %v9213_v46 }
 0x454   :  { %v2249_v53 = vpop.permute.xlu1 %2248  ;;  %v3948_v55 = vpop.permute.xlu2 %3947  ;;  %9212 = vst [vmem:[#allocation26_spill] sm:$0xff] %v7289_v33  ;;  %v7291_v6 = vmax.f32 %v1907_v19, %v1803_v25  ;;  %v9214_v25 = vld [vmem:[#allocation131_spill] sm:$0xff]  ;;  %v4252_v19 = vld [vmem:[%s8663_s0 + $0x2d0] sm:$0xff] }
 0x455   :  { %2499 = vst.msk [vmem:[#allocation2 + $0x1e8] sm:$0xff] %vm637_vm1, %v2249_v53  ;;  %v3950_v43 = vunpack.i.h.bf16 %v3948_v55  ;;  %v3949_v23 = vunpack.i.l.bf16 %v3948_v55  ;;  %v1382_v53 = vsel %vm875_vm14, -inf, %v9214_v25  ;;  %v1797_v55 = vsel %vm1397_vm15, -inf, %v6429_v26  ;;  %v4251_v26 = vld [vmem:[%s8663_s0 + $0x2b8] sm:$0xff] }
 0x456   :  { %v2247_v63 = vpop.permute.xlu0 %2246 }
 0x457   :  { %3987 = vrot.lane.b32.xlu1 %v3986_v52, %s4285_s26  ;;  %v3174_v28 = vmax.f32 %v2654_v11, %v3949_v23  ;;  %v3175_v0 = vmax.f32 %v2655_v39, %v3950_v43  ;;  %2498 = vst.msk [vmem:[#allocation2 + $0x1e0] sm:$0xff] %vm637_vm1, %v2247_v63  ;;  %v1800_v11 = vsel %vm1397_vm15, -inf, %v6474_v38  ;;  %v2652_v52 = vmax.f32 %v7003_v60, %v6142_v62 }
 0x458   :  { %v1901_v38 = vmax.f32 %v1379_v31, %v4251_v26  ;;  %v1904_v62 = vmax.f32 %v1382_v53, %v4252_v19  ;;  %v9217_v31 = vld [vmem:[#allocation126_spill] sm:$0xff] }
 0x459   :  { %v7294_v12 = vpack.c.bf16 %v3175_v0, %v3174_v28  ;;  %2312 = vrot.lane.b32.xlu0 %v7291_v6, %s4280_s15  ;;  %v9215_v0 = vld [vmem:[#allocation118_spill] sm:$0xff]  ;;  %v1365_v25 = vsel %vm875_vm14, -inf, %v9217_v31 }
 0x45a   :  { %2266 = vrot.lane.b32.xlu2 %v7289_v33, %s4280_s15  ;;  %v1360_v46 = vsel %vm875_vm14, -inf, %v9215_v0  ;;  %v7333_v49 = vmax.f32 %v1901_v38, %v1797_v55  ;;  %v7335_v51 = vmax.f32 %v1904_v62, %v1800_v11  ;;  %v4253_v55 = vld [vmem:[%s8663_s0 + $0x220] sm:$0xff]  ;;  %v7361_v38 = vld [vmem:[#allocation2 + $0x118] sm:$0xff] }
 0x45b   :  { %v1882_v11 = vmax.f32 %v1360_v46, %v4253_v55  ;;  %v9220_v19 = vld [vmem:[#allocation54_spill] sm:$0xff] }
 0x45c   :  { %v2255_v43 = vpop.permute.xlu1 %2254  ;;  %v3963_v23 = vpop.permute.xlu2 %3962  ;;  %9216 = vst [vmem:[#allocation43_spill] sm:$0xff] %v7333_v49  ;;  %v2651_v62 = vmax.f32 %v7016_v59, %v9220_v19  ;;  %v9221_v0 = vld [vmem:[#allocation62_spill] sm:$0xff]  ;;  %v2658_v59 = vmax.f32 %v6979_v61, %v6232_v4 }
 0x45d   :  { %2502 = vst.msk [vmem:[#allocation2 + $0x200] sm:$0xff] %vm637_vm1, %v2255_v43  ;;  %v3965_v39 = vunpack.i.h.bf16 %v3963_v23  ;;  %v3964_v7 = vunpack.i.l.bf16 %v3963_v23  ;;  %v7347_v43 = vld [vmem:[#allocation2 + $0x110] sm:$0xff]  ;;  %v4254_v23 = vld [vmem:[%s8663_s0 + $0x248] sm:$0xff]  ;;  %v2650_v46 = vmax.f32 %v7013_v13, %v9221_v0  ;;  %v9225_v4 = vld [vmem:[#allocation138_spill] sm:$0xff] }
 0x45e   :  { %v2253_v60 = vpop.permute.xlu0 %2252  ;;  %v1377_v61 = vsel %vm875_vm14, -inf, %v9225_v4 }
 0x45f   :  { %4002 = vrot.lane.b32.xlu1 %v4001_v36, %s4285_s26  ;;  %v3172_v63 = vmax.f32 %v2652_v52, %v3964_v7  ;;  %v3173_v28 = vmax.f32 %v2653_v8, %v3965_v39  ;;  %2501 = vst.msk [vmem:[#allocation2 + $0x1f8] sm:$0xff] %vm637_vm1, %v2253_v60  ;;  %v1887_v52 = vmax.f32 %v1365_v25, %v4254_v23  ;;  %v9218_v39 = vld [vmem:[#allocation55_spill] sm:$0xff]  ;;  %v9219_v36 = vld [vmem:[#allocation74_spill] sm:$0xff] }
 0x460   :  { %v1783_v7 = vsel %vm1397_vm15, -inf, %v9218_v39  ;;  %v1778_v8 = vsel %vm1397_vm15, -inf, %v9219_v36 }
 0x461   :  { %v7341_v53 = vpack.c.bf16 %v3173_v28, %v3172_v63  ;;  %2306 = vrot.lane.b32.xlu0 %v7335_v51, %s4280_s15  ;;  %v4016_v28 = vpack.i.bf16 %v7361_v38, %v7347_v43  ;;  %v7369_v31 = vmax.f32 %v1887_v52, %v1783_v7  ;;  %v7371_v25 = vmax.f32 %v1882_v11, %v1778_v8  ;;  %v7384_v52 = vld [vmem:[#allocation2 + $0x80] sm:$0xff] }
 0x462   :  { %2300 = vrot.lane.b32.xlu2 %v7333_v49, %s4280_s15  ;;  %v9224_v7 = vld [vmem:[#allocation143_spill] sm:$0xff] }
 0x463   :  { %9222 = vst [vmem:[#allocation38_spill] sm:$0xff] %v7371_v25  ;;  %v1394_v8 = vsel %vm875_vm14, -inf, %v9224_v7 }
 0x464   :  { %v3978_v26 = vpop.permute.xlu2 %3977 }
 0x465   :  { %v3980_v60 = vunpack.i.h.bf16 %v3978_v26  ;;  %v3979_v63 = vunpack.i.l.bf16 %v3978_v26  ;;  %v9223_v26 = vld [vmem:[#allocation80_spill] sm:$0xff] }
 0x466   :  { %v3923_v55 = vpop.permute.xlu0 %3922  ;;  %v2659_v19 = vmax.f32 %v6981_v44, %v9223_v26  ;;  %v1812_v44 = vsel %vm1397_vm15, -inf, %v6652_v40 }
 0x467   :  { %4017 = vrot.lane.b32.xlu1 %v4016_v28, %s4285_s26  ;;  %v3170_v23 = vmax.f32 %v2650_v46, %v3979_v63  ;;  %v3171_v39 = vmax.f32 %v2651_v62, %v3980_v60  ;;  %v3925_v36 = vunpack.i.h.bf16 %v3923_v55  ;;  %v3924_v49 = vunpack.i.l.bf16 %v3923_v55  ;;  %v7395_v63 = vld [vmem:[#allocation2 + $0x88] sm:$0xff] }
 0x468   :  { %v4031_v55 = vpack.i.bf16 %v7395_v63, %v7384_v52 }
 0x469   :  { %v7378_v33 = vpack.c.bf16 %v3171_v39, %v3170_v23  ;;  %2272 = vrot.lane.b32.xlu0 %v7369_v31, %s4280_s15  ;;  %v3178_v13 = vmax.f32 %v2658_v59, %v3924_v49  ;;  %v3179_v11 = vmax.f32 %v2659_v19, %v3925_v36  ;;  %v9226_v49 = vld [vmem:[#allocation56_spill] sm:$0xff]  ;;  %v9227_v23 = vld [vmem:[#allocation61_spill] sm:$0xff] }
 0x46a   :  { %2262 = vrot.lane.b32.xlu2 %v7371_v25, %s4280_s15  ;;  %v2648_v28 = vmax.f32 %v7030_v32, %v9226_v49  ;;  %v2649_v39 = vmax.f32 %v7025_v16, %v9227_v23  ;;  %v4255_v36 = vld [vmem:[%s8663_s0 + $0x330] sm:$0xff]  ;;  %v9228_v59 = vld [vmem:[#allocation72_spill] sm:$0xff] }
 0x46b   :  { %v3444_v62 = vpack.c.bf16 %v3179_v11, %v3178_v13  ;;  %v1916_v40 = vmax.f32 %v1394_v8, %v4255_v36  ;;  %v1795_v26 = vsel %vm1397_vm15, -inf, %v9228_v59  ;;  %v4256_v32 = vld [vmem:[%s8663_s0 + $0x2a8] sm:$0xff]  ;;  %v9229_v13 = vld [vmem:[#allocation146_spill] sm:$0xff] }
 0x46c   :  { %v3993_v60 = vpop.permute.xlu2 %3992  ;;  %v1899_v19 = vmax.f32 %v1377_v61, %v4256_v32  ;;  %v1386_v16 = vsel %vm875_vm14, -inf, %v9229_v13  ;;  %v4257_v61 = vld [vmem:[%s8663_s0 + $0x2f0] sm:$0xff]  ;;  %v9234_v59 = vld [vmem:[#allocation48_spill] sm:$0xff] }
 0x46d   :  { %v3995_v0 = vunpack.i.h.bf16 %v3993_v60  ;;  %v3994_v46 = vunpack.i.l.bf16 %v3993_v60  ;;  %3515 = vmatpush.bf16.msra.mxu0 %v3444_v62  ;;  %3887 = vmatpush.bf16.msra.mxu3 %v3444_v62  ;;  %v7416_v8 = vmax.f32 %v1916_v40, %v1812_v44  ;;  %v1804_v62 = vsel %vm1397_vm15, -inf, %v6386_v9  ;;  %v9231_v44 = vld [vmem:[#allocation121_spill] sm:$0xff] }
 0x46e   :  { %v7418_v4 = vmax.f32 %v1899_v19, %v1795_v26  ;;  %v1908_v49 = vmax.f32 %v1386_v16, %v4257_v61  ;;  %v9232_v9 = vld [vmem:[#allocation105_spill] sm:$0xff]  ;;  %v2646_v26 = vmax.f32 %v7042_v45, %v9234_v59  ;;  %v4258_v19 = vld [vmem:[%s8663_s0 + $0x238] sm:$0xff]  ;;  %v9236_v16 = vld [vmem:[#allocation68_spill] sm:$0xff] }
 0x46f   :  { %4032 = vrot.lane.b32.xlu1 %v4031_v55, %s4285_s26  ;;  %v3168_v11 = vmax.f32 %v2648_v28, %v3994_v46  ;;  %v3169_v7 = vmax.f32 %v2649_v39, %v3995_v0  ;;  %v1363_v28 = vsel %vm875_vm14, -inf, %v9231_v44  ;;  %v1358_v0 = vsel %vm875_vm14, -inf, %v9232_v9  ;;  %v9233_v46 = vld [vmem:[#allocation73_spill] sm:$0xff]  ;;  %v9237_v61 = vld [vmem:[#allocation127_spill] sm:$0xff] }
 0x470   :  { %9230 = vst [vmem:[#allocation109_spill] sm:$0xff] %v7418_v4  ;;  %v1781_v55 = vsel %vm1397_vm15, -inf, %v9233_v46  ;;  %v7443_v23 = vmax.f32 %v1908_v49, %v1804_v62  ;;  %v1885_v13 = vmax.f32 %v1363_v28, %v4258_v19  ;;  %v1369_v49 = vsel %vm875_vm14, -inf, %v9237_v61 }
 0x471   :  { %v7423_v60 = vpack.c.bf16 %v3169_v7, %v3168_v11  ;;  %2330 = vrot.lane.b32.xlu0 %v7416_v8, %s4280_s15  ;;  %3516 = vmatpush.bf16.msra.mxu0 %v7273_v48  ;;  %v1776_v11 = vsel %vm1397_vm15, -inf, %v9236_v16  ;;  %v4259_v7 = vld [vmem:[%s8663_s0 + $0x210] sm:$0xff]  ;;  %v9241_v16 = vld [vmem:[#allocation124_spill] sm:$0xff] }
 0x472   :  { %3888 = vmatpush.bf16.msra.mxu3 %v7273_v48  ;;  %2296 = vrot.lane.b32.xlu2 %v7418_v4, %s4280_s15  ;;  %v9235_v48 = vld [vmem:[#allocation49_spill] sm:$0xff]  ;;  %v1880_v62 = vmax.f32 %v1358_v0, %v4259_v7  ;;  %v7465_v44 = vmax.f32 %v1885_v13, %v1781_v55  ;;  %v1787_v0 = vsel %vm1397_vm15, -inf, %v6316_v58 }
 0x473   :  { %v2647_v32 = vmax.f32 %v7044_v41, %v9235_v48  ;;  %v9240_v58 = vld [vmem:[#allocation133_spill] sm:$0xff]  ;;  %v4261_v48 = vld [vmem:[%s8663_s0 + $0x320] sm:$0xff] }
 0x474   :  { %v4008_v39 = vpop.permute.xlu2 %4007  ;;  %v7467_v28 = vmax.f32 %v1880_v62, %v1776_v11  ;;  %v1366_v11 = vsel %vm875_vm14, -inf, %v9241_v16  ;;  %v9247_v16 = vld [vmem:[#allocation60_spill] sm:$0xff] }
 0x475   :  { %v4010_v36 = vunpack.i.h.bf16 %v4008_v39  ;;  %v4009_v40 = vunpack.i.l.bf16 %v4008_v39  ;;  %3517 = vmatpush.bf16.msra.mxu0 %v7294_v12  ;;  %v9239_v39 = vld [vmem:[#allocation150_spill] sm:$0xff] }
 0x476   :  { %3889 = vmatpush.bf16.msra.mxu3 %v7294_v12  ;;  %9238 = vst [vmem:[#allocation111_spill] sm:$0xff] %v7467_v28  ;;  %v4260_v12 = vld [vmem:[%s8663_s0 + $0x268] sm:$0xff]  ;;  %v1392_v55 = vsel %vm875_vm14, -inf, %v9239_v39 }
 0x477   :  { %2314 = vrot.lane.b32.xlu1 %v7443_v23, %s4280_s15  ;;  %v3166_v41 = vmax.f32 %v2646_v26, %v4009_v40  ;;  %v3167_v45 = vmax.f32 %v2647_v32, %v4010_v36  ;;  %v1891_v46 = vmax.f32 %v1369_v49, %v4260_v12  ;;  %v1375_v36 = vsel %vm875_vm14, -inf, %v9240_v58  ;;  %v9245_v12 = vld [vmem:[#allocation67_spill] sm:$0xff] }
 0x478   :  { %v1810_v26 = vsel %vm1397_vm15, -inf, %v6476_v47  ;;  %v1914_v32 = vmax.f32 %v1392_v55, %v4261_v48  ;;  %v4262_v47 = vld [vmem:[%s8663_s0 + $0x298] sm:$0xff]  ;;  %v2677_v48 = vmax.f32 %v7023_v17, %v6498_v3 }
 0x479   :  { %v3438_v9 = vpack.c.bf16 %v3167_v45, %v3166_v41  ;;  %2268 = vrot.lane.b32.xlu0 %v7465_v44, %s4280_s15  ;;  %3518 = vmatpush.bf16.msra.mxu0 %v7341_v53  ;;  %v7487_v59 = vmax.f32 %v1891_v46, %v1787_v0  ;;  %v1897_v7 = vmax.f32 %v1375_v36, %v4262_v47  ;;  %v1784_v45 = vsel %vm1397_vm15, -inf, %v6271_v20  ;;  %v9243_v0 = vld [vmem:[#allocation110_spill] sm:$0xff]  ;;  %v9244_v20 = vld [vmem:[#allocation115_spill] sm:$0xff] }
 0x47a   :  { %3890 = vmatpush.bf16.msra.mxu3 %v7341_v53  ;;  %2258 = vrot.lane.b32.xlu2 %v7467_v28, %s4280_s15  ;;  %v1793_v53 = vsel %vm1397_vm15, -inf, %v6406_v5  ;;  %v7508_v62 = vmax.f32 %v1914_v32, %v1810_v26  ;;  %v2664_v5 = vmax.f32 %v7059_v56, %v6322_v37  ;;  %v2665_v41 = vmax.f32 %v7061_v10, %v6318_v15  ;;  %v4264_v32 = vld [vmem:[%s8663_s0 + $0x228] sm:$0xff] }
 0x47b   :  { %v7517_v61 = vmax.f32 %v1897_v7, %v1793_v53  ;;  %v1361_v15 = vsel %vm875_vm14, -inf, %v9243_v0  ;;  %v1357_v10 = vsel %vm875_vm14, -inf, %v9244_v20  ;;  %v1779_v46 = vsel %vm1397_vm15, -inf, %v9245_v12  ;;  %v9249_v7 = vld [vmem:[#allocation84_spill] sm:$0xff] }
 0x47c   :  { %v4023_v40 = vpop.permute.xlu2 %4022  ;;  %v1883_v53 = vmax.f32 %v1361_v15, %v4264_v32  ;;  %v1808_v0 = vsel %vm1397_vm15, -inf, %v6629_v34  ;;  %v9256_v32 = vld [vmem:[#allocation141_spill] sm:$0xff] }
 0x47d   :  { %3519 = vmatpush.bf16.msra.mxu0 %v7378_v33  ;;  %v4025_v19 = vunpack.i.h.bf16 %v4023_v40  ;;  %v4024_v13 = vunpack.i.l.bf16 %v4023_v40  ;;  %9242 = vst [vmem:[#allocation88_spill] sm:$0xff] %v7517_v61 }
 0x47e   :  { %3891 = vmatpush.bf16.msra.mxu3 %v7378_v33  ;;  %v4263_v33 = vld [vmem:[%s8663_s0 + $0x250] sm:$0xff]  ;;  %v7560_v47 = vmax.f32 %v1883_v53, %v1779_v46  ;;  %v9252_v46 = vld [vmem:[#allocation107_spill] sm:$0xff]  ;;  %v1380_v53 = vsel %vm875_vm14, -inf, %v9256_v32 }
 0x47f   :  { %2280 = vrot.lane.b32.xlu1 %v7487_v59, %s4280_s15  ;;  %v1888_v49 = vmax.f32 %v1366_v11, %v4263_v33  ;;  %v3184_v37 = vmax.f32 %v2664_v5, %v4024_v13  ;;  %v3185_v56 = vmax.f32 %v2665_v41, %v4025_v19  ;;  %v9246_v19 = vld [vmem:[#allocation144_spill] sm:$0xff]  ;;  %v1775_v11 = vsel %vm1397_vm15, -inf, %v9247_v16  ;;  %v7595_v16 = vld [vmem:[#allocation2 + $0x1f8] sm:$0xff]  ;;  %v9265_v32 = vld [vmem:[#allocation151_spill] sm:$0xff] }
 0x480   :  { %v1383_v13 = vsel %vm875_vm14, -inf, %v9246_v19  ;;  %9248 = vst [vmem:[#allocation25_spill] sm:$0xff] %v7560_v47  ;;  %v1801_v5 = vsel %vm1397_vm15, -inf, %v9249_v7  ;;  %v4268_v7 = vld [vmem:[%s8663_s0 + $0x2c0] sm:$0xff] }
 0x481   :  { %2326 = vrot.lane.b32.xlu0 %v7508_v62, %s4280_s15  ;;  %3520 = vmatpush.bf16.msra.mxu0 %v7423_v60  ;;  %v7537_v39 = vmax.f32 %v1888_v49, %v1784_v45  ;;  %v7539_v36 = vpack.c.bf16 %v3185_v56, %v3184_v37  ;;  %v9251_v49 = vld [vmem:[#allocation147_spill] sm:$0xff] }
 0x482   :  { %3892 = vmatpush.bf16.msra.mxu3 %v7423_v60  ;;  %2292 = vrot.lane.b32.xlu2 %v7517_v61, %s4280_s15  ;;  %v2676_v60 = vmax.f32 %v7028_v1, %v6502_v2  ;;  %v4265_v1 = vld [vmem:[%s8663_s0 + $0x208] sm:$0xff]  ;;  %v1390_v37 = vsel %vm875_vm14, -inf, %v9251_v49 }
 0x483   :  { %v3938_v55 = vpop.permute.xlu0 %3937  ;;  %v1879_v17 = vmax.f32 %v1357_v10, %v4265_v1  ;;  %v9260_v49 = vld [vmem:[#allocation36_spill] sm:$0xff] }
 0x484   :  { %v2283_v58 = vpop.permute.xlu2 %2282  ;;  %v3940_v40 = vunpack.i.h.bf16 %v3938_v55  ;;  %v3939_v26 = vunpack.i.l.bf16 %v3938_v55  ;;  %v9253_v55 = vld [vmem:[#allocation52_spill] sm:$0xff] }
 0x485   :  { %2516 = vst.msk [vmem:[#allocation2 + $0x270] sm:$0xff] %vm637_vm1, %v2283_v58  ;;  %3521 = vmatpush.bf16.msra.mxu0 %v3438_v9  ;;  %v7568_v33 = vmax.f32 %v1879_v17, %v1775_v11  ;;  %v2674_v58 = vmax.f32 %v9253_v55, %v9252_v46  ;;  %v7602_v17 = vld [vmem:[#allocation2 + $0x1f0] sm:$0xff]  ;;  %v9261_v46 = vld [vmem:[#allocation102_spill] sm:$0xff]  ;;  %v9338_v61 = vld [vmem:[#allocation64_spill] sm:$0xff] }
 0x486   :  { %3893 = vmatpush.bf16.msra.mxu3 %v3438_v9  ;;  %v3196_v2 = vmax.f32 %v2676_v60, %v3939_v26  ;;  %v3197_v3 = vmax.f32 %v2677_v48, %v3940_v40  ;;  %v4266_v9 = vld [vmem:[%s8663_s0 + $0x2d8] sm:$0xff]  ;;  %v9254_v40 = vld [vmem:[#allocation3_spill] sm:$0xff]  ;;  %v9255_v26 = vld [vmem:[#allocation81_spill] sm:$0xff] }
 0x487   :  { %2274 = vrot.lane.b32.xlu1 %v7537_v39, %s4280_s15  ;;  %v1905_v45 = vmax.f32 %v1383_v13, %v4266_v9  ;;  %9250 = vst [vmem:[#allocation44_spill] sm:$0xff] %v7568_v33  ;;  %v2675_v60 = vmax.f32 %v9255_v26, %v9254_v40  ;;  %v4267_v48 = vld [vmem:[%s8663_s0 + $0x310] sm:$0xff]  ;;  %v9259_v9 = vld [vmem:[#allocation120_spill] sm:$0xff]  ;;  %v9262_v55 = vld [vmem:[#allocation58_spill] sm:$0xff] }
 0x488   :  { %v3453_v41 = vpack.c.bf16 %v3197_v3, %v3196_v2  ;;  %v1912_v34 = vmax.f32 %v1390_v37, %v4267_v48  ;;  %v9258_v2 = vld [vmem:[#allocation78_spill] sm:$0xff]  ;;  %v1777_v37 = vsel %vm1397_vm15, -inf, %v9260_v49  ;;  %v9264_v26 = vld [vmem:[#allocation83_spill] sm:$0xff] }
 0x489   :  { %2264 = vrot.lane.b32.xlu0 %v7560_v47, %s4280_s15  ;;  %v7575_v56 = vmax.f32 %v1905_v45, %v1801_v5  ;;  %v1798_v3 = vsel %vm1397_vm15, -inf, %v9258_v2  ;;  %v1902_v5 = vmax.f32 %v1380_v53, %v4268_v7  ;;  %v1359_v45 = vsel %vm875_vm14, -inf, %v9259_v9  ;;  %v9263_v40 = vld [vmem:[#allocation10_spill] sm:$0xff]  ;;  %v9268_v9 = vld [vmem:[#allocation137_spill] sm:$0xff] }
 0x48a   :  { %3563 = vmatpush.bf16.msrb.mxu0 %v3453_v41  ;;  %3894 = vmatpush.bf16.msra.mxu1 %v3453_v41  ;;  %v7597_v11 = vmax.f32 %v1912_v34, %v1808_v0  ;;  %v4036_v41 = vpack.i.bf16 %v7595_v16, %v7602_v17  ;;  %v4269_v48 = vld [vmem:[%s8663_s0 + $0x218] sm:$0xff]  ;;  %v1395_v53 = vsel %vm875_vm14, -inf, %v9265_v32 }
 0x48b   :  { %v3953_v15 = vpop.permute.xlu0 %3952  ;;  %2256 = vrot.lane.b32.xlu2 %v7568_v33, %s4280_s15  ;;  %v7617_v0 = vmax.f32 %v1902_v5, %v1798_v3  ;;  %v1881_v34 = vmax.f32 %v1359_v45, %v4269_v48  ;;  %v9267_v3 = vld [vmem:[#allocation4_spill] sm:$0xff]  ;;  %v4270_v5 = vld [vmem:[%s8663_s0 + $0x338] sm:$0xff]  ;;  %v1388_v45 = vsel %vm875_vm14, -inf, %v9268_v9  ;;  %v4272_v9 = vld [vmem:[%s8663_s0 + $0x2b0] sm:$0xff] }
 0x48c   :  { %v2317_v20 = vpop.permute.xlu2 %2316  ;;  %v3955_v10 = vunpack.i.h.bf16 %v3953_v15  ;;  %v3954_v12 = vunpack.i.l.bf16 %v3953_v15  ;;  %9257 = vst [vmem:[#allocation112_spill] sm:$0xff] %v7597_v11 }
 0x48d   :  { %2533 = vst.msk [vmem:[#allocation2 + $0x2f8] sm:$0xff] %vm637_vm1, %v2317_v20  ;;  %v7633_v2 = vmax.f32 %v1881_v34, %v1777_v37  ;;  %v9270_v37 = vld [vmem:[#allocation16_spill] sm:$0xff]  ;;  %v4271_v34 = vld [vmem:[%s8663_s0 + $0x300] sm:$0xff] }
 0x48e   :  { %v3194_v19 = vmax.f32 %v2674_v58, %v3954_v12  ;;  %v3195_v13 = vmax.f32 %v2675_v60, %v3955_v10  ;;  %v2672_v58 = vmax.f32 %v9262_v55, %v9261_v46  ;;  %v2673_v60 = vmax.f32 %v9264_v26, %v9263_v40  ;;  %v9271_v55 = vld [vmem:[#allocation108_spill] sm:$0xff]  ;;  %v9273_v26 = vld [vmem:[#allocation103_spill] sm:$0xff] }
 0x48f   :  { %2308 = vrot.lane.b32.xlu1 %v7575_v56, %s4280_s15  ;;  %9266 = vst [vmem:[#allocation114_spill] sm:$0xff] %v7633_v2  ;;  %v1910_v32 = vmax.f32 %v1388_v45, %v4271_v34  ;;  %v9283_v34 = vld [vmem:[#allocation90_spill] sm:$0xff] }
 0x490   :  { %v3452_v1 = vpack.c.bf16 %v3195_v13, %v3194_v19 }
 0x491   :  { %2322 = vrot.lane.b32.xlu0 %v7597_v11, %s4280_s15 }
 0x492   :  { %3564 = vmatpush.bf16.msrb.mxu0 %v3452_v1  ;;  %3895 = vmatpush.bf16.msra.mxu1 %v3452_v1  ;;  %v1813_v1 = vsel %vm1397_vm15, -inf, %v9267_v3 }
 0x493   :  { %v3968_v15 = vpop.permute.xlu0 %3967  ;;  %4037 = vrot.lane.b32.xlu2 %v4036_v41, %s4285_s26  ;;  %v1917_v41 = vmax.f32 %v1395_v53, %v4270_v5  ;;  %v9275_v53 = vld [vmem:[#allocation136_spill] sm:$0xff] }
 0x494   :  { %v2311_v20 = vpop.permute.xlu2 %2310  ;;  %v3970_v10 = vunpack.i.h.bf16 %v3968_v15  ;;  %v3969_v12 = vunpack.i.l.bf16 %v3968_v15  ;;  %v1806_v15 = vsel %vm1397_vm15, -inf, %v9270_v37  ;;  %v9278_v37 = vld [vmem:[#allocation130_spill] sm:$0xff] }
 0x495   :  { %2530 = vst.msk [vmem:[#allocation2 + $0x2e0] sm:$0xff] %vm637_vm1, %v2311_v20  ;;  %v7646_v49 = vmax.f32 %v1917_v41, %v1813_v1  ;;  %v7664_v1 = vmax.f32 %v1910_v32, %v1806_v15  ;;  %v9279_v15 = vld [vmem:[#allocation91_spill] sm:$0xff] }
 0x496   :  { %v3192_v19 = vmax.f32 %v2672_v58, %v3969_v12  ;;  %v3193_v13 = vmax.f32 %v2673_v60, %v3970_v10  ;;  %v9272_v58 = vld [vmem:[#allocation87_spill] sm:$0xff]  ;;  %v9274_v60 = vld [vmem:[#allocation89_spill] sm:$0xff] }
 0x497   :  { %2302 = vrot.lane.b32.xlu1 %v7617_v0, %s4280_s15  ;;  %9269 = vst [vmem:[#allocation94_spill] sm:$0xff] %v7646_v49  ;;  %v2670_v40 = vmax.f32 %v9272_v58, %v9271_v55  ;;  %v2671_v48 = vmax.f32 %v9274_v60, %v9273_v26  ;;  %v9281_v26 = vld [vmem:[#allocation98_spill] sm:$0xff]  ;;  %v9282_v60 = vld [vmem:[#allocation93_spill] sm:$0xff]  ;;  %v9284_v32 = vld [vmem:[#allocation95_spill] sm:$0xff] }
 0x498   :  { %v3451_v7 = vpack.c.bf16 %v3193_v13, %v3192_v19  ;;  %v1378_v19 = vsel %vm875_vm14, -inf, %v9275_v53  ;;  %9276 = vst [vmem:[#allocation24_spill] sm:$0xff] %v7664_v1  ;;  %v2669_v53 = vmax.f32 %v9284_v32, %v9283_v34  ;;  %v9291_v34 = vld [vmem:[#allocation19_spill] sm:$0xff] }
 0x499   :  { %2260 = vrot.lane.b32.xlu0 %v7633_v2, %s4280_s15  ;;  %v1900_v45 = vmax.f32 %v1378_v19, %v4272_v9  ;;  %v4273_v19 = vld [vmem:[%s8663_s0 + $0x280] sm:$0xff] }
 0x49a   :  { %3565 = vmatpush.bf16.msrb.mxu0 %v3451_v7  ;;  %3896 = vmatpush.bf16.msra.mxu1 %v3451_v7  ;;  %v9277_v7 = vld [vmem:[#allocation9_spill] sm:$0xff] }
 0x49b   :  { %v3983_v20 = vpop.permute.xlu0 %3982  ;;  %v1796_v5 = vsel %vm1397_vm15, -inf, %v9277_v7 }
 0x49c   :  { %v2277_v10 = vpop.permute.xlu2 %2276  ;;  %v3985_v12 = vunpack.i.h.bf16 %v3983_v20  ;;  %v3984_v46 = vunpack.i.l.bf16 %v3983_v20  ;;  %v1372_v20 = vsel %vm875_vm14, -inf, %v9278_v37 }
 0x49d   :  { %2513 = vst.msk [vmem:[#allocation2 + $0x258] sm:$0xff] %vm637_vm1, %v2277_v10  ;;  %v1790_v10 = vsel %vm1397_vm15, -inf, %v9279_v15  ;;  %v9287_v15 = vld [vmem:[#allocation11_spill] sm:$0xff] }
 0x49e   :  { %v3190_v13 = vmax.f32 %v2670_v40, %v3984_v46  ;;  %v3191_v3 = vmax.f32 %v2671_v48, %v3985_v12  ;;  %v7680_v12 = vmax.f32 %v1900_v45, %v1796_v5  ;;  %v2668_v48 = vmax.f32 %v9282_v60, %v9281_v26  ;;  %v4274_v45 = vld [vmem:[%s8663_s0 + $0x328] sm:$0xff] }
 0x49f   :  { %2332 = vrot.lane.b32.xlu1 %v7646_v49, %s4280_s15 }
 0x4a0   :  { %v3450_v41 = vpack.c.bf16 %v3191_v3, %v3190_v13  ;;  %9280 = vst [vmem:[#allocation50_spill] sm:$0xff] %v7680_v12  ;;  %v1894_v13 = vmax.f32 %v1372_v20, %v4273_v19  ;;  %v9285_v3 = vld [vmem:[#allocation149_spill] sm:$0xff]  ;;  %v1811_v20 = vsel %vm1397_vm15, -inf, %v9287_v15  ;;  %v7714_v15 = vld [vmem:[#allocation2 + $0x1e8] sm:$0xff] }
 0x4a1   :  { %2318 = vrot.lane.b32.xlu0 %v7664_v1, %s4280_s15  ;;  %v1393_v7 = vsel %vm875_vm14, -inf, %v9285_v3 }
 0x4a2   :  { %3566 = vmatpush.bf16.msrb.mxu0 %v3450_v41  ;;  %3897 = vmatpush.bf16.msra.mxu1 %v3450_v41  ;;  %v7695_v9 = vmax.f32 %v1894_v13, %v1790_v10  ;;  %v1915_v37 = vmax.f32 %v1393_v7, %v4274_v45  ;;  %v7712_v45 = vld [vmem:[#allocation2 + $0x1e0] sm:$0xff] }
 0x4a3   :  { %v3998_v46 = vpop.permute.xlu0 %3997 }
 0x4a4   :  { %v2271_v55 = vpop.permute.xlu2 %2270  ;;  %v4000_v58 = vunpack.i.h.bf16 %v3998_v46  ;;  %v3999_v40 = vunpack.i.l.bf16 %v3998_v46  ;;  %9286 = vst [vmem:[#allocation117_spill] sm:$0xff] %v7695_v9 }
 0x4a5   :  { %2510 = vst.msk [vmem:[#allocation2 + $0x240] sm:$0xff] %vm637_vm1, %v2271_v55 }
 0x4a6   :  { %v3188_v5 = vmax.f32 %v2668_v48, %v3999_v40  ;;  %v3189_v41 = vmax.f32 %v2669_v53, %v4000_v58  ;;  %v9288_v40 = vld [vmem:[#allocation39_spill] sm:$0xff]  ;;  %v9290_v48 = vld [vmem:[#allocation41_spill] sm:$0xff]  ;;  %v7709_v53 = vmax.f32 %v1915_v37, %v1811_v20 }
 0x4a7   :  { %2298 = vrot.lane.b32.xlu1 %v7680_v12, %s4280_s15  ;;  %v9289_v58 = vld [vmem:[#allocation31_spill] sm:$0xff]  ;;  %v2693_v32 = vmax.f32 %v9291_v34, %v9290_v48  ;;  %v9294_v48 = vld [vmem:[#allocation97_spill] sm:$0xff] }
 0x4a8   :  { %v3449_v46 = vpack.c.bf16 %v3189_v41, %v3188_v5  ;;  %v2692_v10 = vmax.f32 %v9289_v58, %v9288_v40  ;;  %v9293_v40 = vld [vmem:[#allocation101_spill] sm:$0xff]  ;;  %v9295_v34 = vld [vmem:[#allocation99_spill] sm:$0xff] }
 0x4a9   :  { %v3928_v55 = vpop.permute.xlu1 %3927  ;;  %2286 = vrot.lane.b32.xlu0 %v7695_v9, %s4280_s15  ;;  %v9304_v9 = vld [vmem:[#allocation5_spill] sm:$0xff] }
 0x4aa   :  { %v3930_v26 = vunpack.i.h.bf16 %v3928_v55  ;;  %v3929_v60 = vunpack.i.l.bf16 %v3928_v55  ;;  %3567 = vmatpush.bf16.msrb.mxu0 %v3449_v46  ;;  %3898 = vmatpush.bf16.msra.mxu1 %v3449_v46  ;;  %v9292_v55 = vld [vmem:[#allocation85_spill] sm:$0xff]  ;;  %v2667_v46 = vmax.f32 %v9295_v34, %v9294_v48  ;;  %v9301_v34 = vld [vmem:[#allocation96_spill] sm:$0xff] }
 0x4ab   :  { %v4013_v19 = vpop.permute.xlu0 %4012  ;;  %v2666_v58 = vmax.f32 %v9293_v40, %v9292_v55  ;;  %v9297_v55 = vld [vmem:[#allocation35_spill] sm:$0xff]  ;;  %v9298_v40 = vld [vmem:[#allocation37_spill] sm:$0xff] }
 0x4ac   :  { %v2305_v13 = vpop.permute.xlu2 %2304  ;;  %v3212_v3 = vmax.f32 %v2692_v10, %v3929_v60  ;;  %v3213_v7 = vmax.f32 %v2693_v32, %v3930_v26  ;;  %v4015_v5 = vunpack.i.h.bf16 %v4013_v19  ;;  %v4014_v41 = vunpack.i.l.bf16 %v4013_v19  ;;  %v9296_v10 = vld [vmem:[#allocation125_spill] sm:$0xff] }
 0x4ad   :  { %2527 = vst.msk [vmem:[#allocation2 + $0x2c8] sm:$0xff] %vm637_vm1, %v2305_v13  ;;  %v4041_v60 = vpack.i.bf16 %v7714_v15, %v7712_v45  ;;  %v1376_v32 = vsel %vm875_vm14, -inf, %v9296_v10  ;;  %v2690_v48 = vmax.f32 %v9298_v40, %v9297_v55  ;;  %v9302_v40 = vld [vmem:[#allocation12_spill] sm:$0xff] }
 0x4ae   :  { %v7720_v37 = vpack.c.bf16 %v3213_v7, %v3212_v3  ;;  %v3186_v20 = vmax.f32 %v2666_v58, %v4014_v41  ;;  %v3187_v26 = vmax.f32 %v2667_v46, %v4015_v5  ;;  %v9299_v41 = vld [vmem:[#allocation17_spill] sm:$0xff]  ;;  %v9300_v5 = vld [vmem:[#allocation20_spill] sm:$0xff]  ;;  %v1794_v46 = vsel %vm1397_vm15, -inf, %v9301_v34 }
 0x4af   :  { %2328 = vrot.lane.b32.xlu1 %v7709_v53, %s4280_s15  ;;  %v2691_v58 = vmax.f32 %v9300_v5, %v9299_v41  ;;  %v9303_v41 = vld [vmem:[#allocation104_spill] sm:$0xff] }
 0x4b0   :  { %3902 = vmatpush.bf16.msra.mxu2 %v7720_v37  ;;  %v3448_v19 = vpack.c.bf16 %v3187_v26, %v3186_v20  ;;  %v4275_v20 = vld [vmem:[%s8663_s0 + $0x2a0] sm:$0xff]  ;;  %v2678_v5 = vmax.f32 %v9303_v41, %v9302_v40  ;;  %v9305_v34 = vld [vmem:[#allocation32_spill] sm:$0xff] }
 0x4b1   :  { %v3943_v13 = vpop.permute.xlu1 %3942  ;;  %4042 = vrot.lane.b32.xlu0 %v4041_v60, %s4285_s26  ;;  %v1898_v26 = vmax.f32 %v1376_v32, %v4275_v20  ;;  %v2679_v33 = vmax.f32 %v9305_v34, %v9304_v9  ;;  %v9308_v20 = vld [vmem:[#allocation14_spill] sm:$0xff] }
 0x4b2   :  { %v3945_v3 = vunpack.i.h.bf16 %v3943_v13  ;;  %v3944_v7 = vunpack.i.l.bf16 %v3943_v13  ;;  %3568 = vmatpush.bf16.msrb.mxu0 %v3448_v19  ;;  %3899 = vmatpush.bf16.msra.mxu1 %v3448_v19 }
 0x4b3   :  { %v4028_v60 = vpop.permute.xlu0 %4027  ;;  %v7746_v19 = vmax.f32 %v1898_v26, %v1794_v46  ;;  %v2688_v26 = vmax.f32 %v7179_v57, %v9308_v20 }
 0x4b4   :  { %v2267_v10 = vpop.permute.xlu2 %2266  ;;  %v3210_v13 = vmax.f32 %v2690_v48, %v3944_v7  ;;  %v3211_v1 = vmax.f32 %v2691_v58, %v3945_v3  ;;  %v4030_v11 = vunpack.i.h.bf16 %v4028_v60  ;;  %v4029_v55 = vunpack.i.l.bf16 %v4028_v60  ;;  %v9307_v7 = vld [vmem:[#allocation140_spill] sm:$0xff]  ;;  %v9310_v60 = vld [vmem:[#allocation82_spill] sm:$0xff] }
 0x4b5   :  { %2508 = vst.msk [vmem:[#allocation2 + $0x230] sm:$0xff] %vm637_vm1, %v2267_v10  ;;  %v1391_v48 = vsel %vm875_vm14, -inf, %v9307_v7 }
 0x4b6   :  { %9306 = vst [vmem:[#allocation100_spill] sm:$0xff] %v7746_v19  ;;  %v7748_v2 = vpack.c.bf16 %v3211_v1, %v3210_v13  ;;  %3569 = vmatpush.bf16.msrb.mxu0 %v7539_v36  ;;  %3900 = vmatpush.bf16.msra.mxu1 %v7539_v36  ;;  %v3198_v32 = vmax.f32 %v2678_v5, %v4029_v55  ;;  %v9309_v36 = vld [vmem:[#allocation33_spill] sm:$0xff]  ;;  %v4276_v13 = vld [vmem:[%s8663_s0 + $0x318] sm:$0xff] }
 0x4b7   :  { %v3199_v3 = vmax.f32 %v2679_v33, %v4030_v11  ;;  %2294 = vrot.lane.b32.xlu1 %v7746_v19, %s4280_s15  ;;  %v2689_v33 = vmax.f32 %v9310_v60, %v9309_v36  ;;  %v9311_v11 = vld [vmem:[#allocation23_spill] sm:$0xff]  ;;  %v1913_v55 = vmax.f32 %v1391_v48, %v4276_v13  ;;  %v9316_v60 = vld [vmem:[#allocation66_spill] sm:$0xff] }
 0x4b8   :  { %3903 = vmatpush.bf16.msra.mxu2 %v7748_v2  ;;  %v1809_v10 = vsel %vm1397_vm15, -inf, %v9311_v11  ;;  %v4277_v11 = vld [vmem:[%s8663_s0 + $0x290] sm:$0xff] }
 0x4b9   :  { %v3958_v9 = vpop.permute.xlu1 %3957  ;;  %v7758_v58 = vpack.c.bf16 %v3199_v3, %v3198_v32  ;;  %v7771_v32 = vmax.f32 %v1913_v55, %v1809_v10  ;;  %v9313_v3 = vld [vmem:[#allocation135_spill] sm:$0xff] }
 0x4ba   :  { %v3960_v1 = vunpack.i.h.bf16 %v3958_v9  ;;  %v3959_v46 = vunpack.i.l.bf16 %v3958_v9  ;;  %v1374_v7 = vsel %vm875_vm14, -inf, %v9313_v3 }
 0x4bb   :  { %v2285_v40 = vpop.permute.xlu0 %2284  ;;  %9312 = vst [vmem:[#allocation30_spill] sm:$0xff] %v7771_v32  ;;  %v1896_v10 = vmax.f32 %v1374_v7, %v4277_v11  ;;  %v9318_v7 = vld [vmem:[#allocation148_spill] sm:$0xff] }
 0x4bc   :  { %v2301_v41 = vpop.permute.xlu2 %2300  ;;  %v3208_v5 = vmax.f32 %v2688_v26, %v3959_v46  ;;  %v3209_v34 = vmax.f32 %v2689_v33, %v3960_v1  ;;  %2517 = vst.msk [vmem:[#allocation2 + $0x278] sm:$0xff] %vm637_vm1, %v2285_v40  ;;  %v9314_v46 = vld [vmem:[#allocation8_spill] sm:$0xff]  ;;  %v9315_v26 = vld [vmem:[#allocation27_spill] sm:$0xff]  ;;  %v1792_v33 = vsel %vm1397_vm15, -inf, %v9316_v60  ;;  %v7792_v40 = vld [vmem:[#allocation2 + $0x270] sm:$0xff] }
 0x4bd   :  { %2525 = vst.msk [vmem:[#allocation2 + $0x2b8] sm:$0xff] %vm637_vm1, %v2301_v41  ;;  %v2686_v20 = vmax.f32 %v7218_v24, %v9314_v46  ;;  %v2687_v36 = vmax.f32 %v7226_v22, %v9315_v26 }
 0x4be   :  { %v7774_v57 = vpack.c.bf16 %v3209_v34, %v3208_v5  ;;  %v7799_v34 = vmax.f32 %v1896_v10, %v1792_v33  ;;  %v9321_v33 = vld [vmem:[#allocation7_spill] sm:$0xff]  ;;  %v4278_v10 = vld [vmem:[%s8663_s0 + $0x308] sm:$0xff] }
 0x4bf   :  { %2324 = vrot.lane.b32.xlu1 %v7771_v32, %s4280_s15  ;;  %v1807_v11 = vsel %vm1397_vm15, -inf, %v9321_v33  ;;  %v8016_v32 = vld [vmem:[#allocation2 + $0x180] sm:$0xff] }
 0x4c0   :  { %3904 = vmatpush.bf16.msra.mxu2 %v7774_v57  ;;  %9317 = vst [vmem:[#allocation119_spill] sm:$0xff] %v7799_v34 }
 0x4c1   :  { %v3973_v48 = vpop.permute.xlu1 %3972  ;;  %9336 = vst [vmem:[#allocation132_spill] sm:$0xff] %v8016_v32 }
 0x4c2   :  { %v3975_v9 = vunpack.i.h.bf16 %v3973_v48  ;;  %v3974_v1 = vunpack.i.l.bf16 %v3973_v48  ;;  %v1389_v48 = vsel %vm875_vm14, -inf, %v9318_v7 }
 0x4c3   :  { %v2279_v13 = vpop.permute.xlu0 %2278  ;;  %v7794_v41 = vld [vmem:[#allocation2 + $0x278] sm:$0xff] }
 0x4c4   :  { %v2263_v55 = vpop.permute.xlu2 %2262  ;;  %v3206_v5 = vmax.f32 %v2686_v20, %v3974_v1  ;;  %v3207_v24 = vmax.f32 %v2687_v36, %v3975_v9  ;;  %2514 = vst.msk [vmem:[#allocation2 + $0x260] sm:$0xff] %vm637_vm1, %v2279_v13  ;;  %v4051_v22 = vpack.i.bf16 %v7794_v41, %v7792_v40  ;;  %v9319_v20 = vld [vmem:[#allocation6_spill] sm:$0xff]  ;;  %v9320_v36 = vld [vmem:[#allocation29_spill] sm:$0xff]  ;;  %v1911_v13 = vmax.f32 %v1389_v48, %v4278_v10 }
 0x4c5   :  { %2506 = vst.msk [vmem:[#allocation2 + $0x220] sm:$0xff] %vm637_vm1, %v2263_v55  ;;  %v2684_v26 = vmax.f32 %v7271_v18, %v9319_v20  ;;  %v2685_v60 = vmax.f32 %v7257_v27, %v9320_v36  ;;  %v3270_v18 = vld [vmem:[%s8664_s1] sm:$0xff]  ;;  %v3277_v27 = vld [vmem:[%s8664_s1 + $0x38] sm:$0xff]  ;;  %v2725_v12 = vmax.f32 %v7794_v41, %v7209_v14 }
 0x4c6   :  { %v7802_v3 = vpack.c.bf16 %v3207_v24, %v3206_v5  ;;  %4052 = vrot.lane.b32.xlu2 %v4051_v22, %s4285_s26  ;;  %v7828_v7 = vmax.f32 %v1911_v13, %v1807_v11  ;;  %v3382_v48 = vpack.c.bf16 %v3277_v27, %v3270_v18  ;;  %v9325_v11 = vld [vmem:[#allocation18_spill] sm:$0xff]  ;;  %v9326_v13 = vld [vmem:[#allocation92_spill] sm:$0xff] }
 0x4c7   :  { %2290 = vrot.lane.b32.xlu1 %v7799_v34, %s4280_s15  ;;  %v2683_v10 = vmax.f32 %v7302_v54, %v9325_v11  ;;  %v8024_v47 = vld [vmem:[#allocation2 + $0x2b8] sm:$0xff] }
 0x4c8   :  { %3905 = vmatpush.bf16.msra.mxu2 %v7802_v3  ;;  %9322 = vst [vmem:[#allocation145_spill] sm:$0xff] %v7828_v7  ;;  %3522 = vmatmul.bf16.vlgmr.msra.gmra.mxu0 %v3382_v48 }
 0x4c9   :  { %v3988_v9 = vpop.permute.xlu1 %3987 }
 0x4ca   :  { %v3990_v1 = vunpack.i.h.bf16 %v3988_v9  ;;  %v3989_v46 = vunpack.i.l.bf16 %v3988_v9 }
 0x4cb   :  { %v2313_v55 = vpop.permute.xlu0 %2312 }
 0x4cc   :  { %v3204_v5 = vmax.f32 %v2684_v26, %v3989_v46  ;;  %v3205_v24 = vmax.f32 %v2685_v60, %v3990_v1  ;;  %2531 = vst.msk [vmem:[#allocation2 + $0x2e8] sm:$0xff] %vm637_vm1, %v2313_v55  ;;  %v2297_v22 = vpop.permute.xlu2 %2296  ;;  %v9323_v1 = vld [vmem:[#allocation122_spill] sm:$0xff]  ;;  %v9324_v60 = vld [vmem:[#allocation21_spill] sm:$0xff]  ;;  %v1791_v55 = vsel %vm1397_vm15, -inf, %v9326_v13 }
 0x4cd   :  { %2523 = vst.msk [vmem:[#allocation2 + $0x2a8] sm:$0xff] %vm637_vm1, %v2297_v22  ;;  %v1373_v46 = vsel %vm875_vm14, -inf, %v9323_v1  ;;  %v2682_v33 = vmax.f32 %v7300_v21, %v9324_v60  ;;  %v7862_v60 = vld [vmem:[#allocation2 + $0x1d0] sm:$0xff] }
 0x4ce   :  { %v7831_v9 = vpack.c.bf16 %v3205_v24, %v3204_v5  ;;  %v4279_v5 = vld [vmem:[%s8663_s0 + $0x288] sm:$0xff] }
 0x4cf   :  { %2320 = vrot.lane.b32.xlu1 %v7828_v7, %s4280_s15  ;;  %v1895_v35 = vmax.f32 %v1373_v46, %v4279_v5  ;;  %v9328_v46 = vld [vmem:[#allocation13_spill] sm:$0xff] }
 0x4d0   :  { %3906 = vmatpush.bf16.msra.mxu2 %v7831_v9 }
 0x4d1   :  { %v4003_v20 = vpop.permute.xlu1 %4002  ;;  %v7850_v48 = vmax.f32 %v1895_v35, %v1791_v55  ;;  %v7865_v55 = vld [vmem:[#allocation2 + $0x1d8] sm:$0xff] }
 0x4d2   :  { %v4005_v26 = vunpack.i.h.bf16 %v4003_v20  ;;  %v4004_v36 = vunpack.i.l.bf16 %v4003_v20  ;;  %v2680_v20 = vmax.f32 %v7347_v43, %v9328_v46  ;;  %v4046_v5 = vpack.i.bf16 %v7865_v55, %v7862_v60 }
 0x4d3   :  { %v2307_v24 = vpop.permute.xlu0 %2306  ;;  %9327 = vst [vmem:[#allocation142_spill] sm:$0xff] %v7850_v48 }
 0x4d4   :  { %v3202_v22 = vmax.f32 %v2682_v33, %v4004_v36  ;;  %v3203_v18 = vmax.f32 %v2683_v10, %v4005_v26  ;;  %2528 = vst.msk [vmem:[#allocation2 + $0x2d0] sm:$0xff] %vm637_vm1, %v2307_v24  ;;  %v2259_v27 = vpop.permute.xlu2 %2258  ;;  %v9329_v26 = vld [vmem:[#allocation15_spill] sm:$0xff] }
 0x4d5   :  { %2504 = vst.msk [vmem:[#allocation2 + $0x210] sm:$0xff] %vm637_vm1, %v2259_v27  ;;  %v2681_v36 = vmax.f32 %v7361_v38, %v9329_v26  ;;  %v9331_v27 = vld [vmem:[#allocation86_spill] sm:$0xff]  ;;  %v7882_v26 = vld [vmem:[#allocation2 + $0x1c0] sm:$0xff] }
 0x4d6   :  { %v7853_v21 = vpack.c.bf16 %v3203_v18, %v3202_v22  ;;  %v9330_v22 = vld [vmem:[#allocation79_spill] sm:$0xff] }
 0x4d7   :  { %2288 = vrot.lane.b32.xlu1 %v7850_v48, %s4280_s15  ;;  %v2662_v18 = vmax.f32 %v7384_v52, %v9330_v22  ;;  %v9332_v22 = vld [vmem:[#allocation71_spill] sm:$0xff]  ;;  %v8018_v48 = vld [vmem:[#allocation2 + $0x188] sm:$0xff] }
 0x4d8   :  { %3907 = vmatpush.bf16.msra.mxu2 %v7853_v21  ;;  %9337 = vst [vmem:[#allocation129_spill] sm:$0xff] %v8018_v48  ;;  %v4131_v25 = vpack.i.bf16 %v8018_v48, %v8016_v32  ;;  %v9339_v48 = vld [vmem:[#allocation46_spill] sm:$0xff]  ;;  %v9340_v32 = vld [vmem:[#allocation69_spill] sm:$0xff] }
 0x4d9   :  { %v4018_v50 = vpop.permute.xlu1 %4017  ;;  %v2707_v14 = vmax.f32 %v7714_v15, %v9340_v32  ;;  %v3319_v32 = vld [vmem:[%s8664_s1 + $0x188] sm:$0xff] }
 0x4da   :  { %v4020_v54 = vunpack.i.h.bf16 %v4018_v50  ;;  %v4019_v1 = vunpack.i.l.bf16 %v4018_v50  ;;  %v2663_v50 = vmax.f32 %v7395_v63, %v9331_v27  ;;  %v7890_v63 = vld [vmem:[#allocation2 + $0x1b0] sm:$0xff] }
 0x4db   :  { %v2273_v33 = vpop.permute.xlu0 %2272 }
 0x4dc   :  { %v3200_v11 = vmax.f32 %v2680_v20, %v4019_v1  ;;  %v3201_v10 = vmax.f32 %v2681_v36, %v4020_v54  ;;  %2511 = vst.msk [vmem:[#allocation2 + $0x248] sm:$0xff] %vm637_vm1, %v2273_v33  ;;  %v2293_v13 = vpop.permute.xlu2 %2292  ;;  %v7878_v54 = vld [vmem:[#allocation2 + $0x1c8] sm:$0xff] }
 0x4dd   :  { %2521 = vst.msk [vmem:[#allocation2 + $0x298] sm:$0xff] %vm637_vm1, %v2293_v13  ;;  %v4061_v33 = vpack.i.bf16 %v7878_v54, %v7882_v26 }
 0x4de   :  { %v7870_v35 = vpack.c.bf16 %v3201_v10, %v3200_v11  ;;  %v7892_v10 = vld [vmem:[#allocation2 + $0x1b8] sm:$0xff] }
 0x4df   :  { %4047 = vrot.lane.b32.xlu1 %v4046_v5, %s4285_s26 }
 0x4e0   :  { %3908 = vmatpush.bf16.msra.mxu2 %v7870_v35 }
 0x4e1   :  { %v4033_v43 = vpop.permute.xlu1 %4032 }
 0x4e2   :  { %v4035_v38 = vunpack.i.h.bf16 %v4033_v43  ;;  %v4034_v24 = vunpack.i.l.bf16 %v4033_v43  ;;  %v4076_v43 = vpack.i.bf16 %v7892_v10, %v7890_v63 }
 0x4e3   :  { %v2331_v1 = vpop.permute.xlu0 %2330 }
 0x4e4   :  { %3909 = vmatpush.bf16.msra.mxu2 %v7758_v58  ;;  %v3182_v46 = vmax.f32 %v2662_v18, %v4034_v24  ;;  %v3183_v20 = vmax.f32 %v2663_v50, %v4035_v38  ;;  %2540 = vst.msk [vmem:[#allocation2 + $0x330] sm:$0xff] %vm637_vm1, %v2331_v1  ;;  %v9333_v18 = vld [vmem:[#allocation77_spill] sm:$0xff] }
 0x4e5   :  { %v2257_v36 = vpop.permute.xlu2 %2256  ;;  %v2709_v27 = vmax.f32 %v7595_v16, %v9333_v18 }
 0x4e6   :  { %v3446_v11 = vpack.c.bf16 %v3183_v20, %v3182_v46  ;;  %2503 = vst.msk [vmem:[#allocation2 + $0x208] sm:$0xff] %vm637_vm1, %v2257_v36  ;;  %v7906_v20 = vld [vmem:[#allocation2 + $0x2f8] sm:$0xff] }
 0x4e7   :  { %4062 = vrot.lane.b32.xlu1 %v4061_v33, %s4285_s26  ;;  %v7911_v33 = vld [vmem:[#allocation2 + $0x1a0] sm:$0xff] }
 0x4e8   :  { %3570 = vmatpush.bf16.msrb.mxu0 %v3446_v11  ;;  %3901 = vmatpush.bf16.msra.mxu1 %v3446_v11  ;;  %v3284_v11 = vld [vmem:[%s8664_s1 + $0x70] sm:$0xff] }
 0x4e9   :  { %v2315_v52 = vpop.permute.xlu1 %2314 }
 0x4ea   :  { %2532 = vst.msk [vmem:[#allocation2 + $0x2f0] sm:$0xff] %vm637_vm1, %v2315_v52  ;;  %v3291_v52 = vld [vmem:[%s8664_s1 + $0xa8] sm:$0xff] }
 0x4eb   :  { %v2269_v13 = vpop.permute.xlu0 %2268 }
 0x4ec   :  { %3612 = vmatpush.bf16.msra.mxu0 %v7720_v37  ;;  %2509 = vst.msk [vmem:[#allocation2 + $0x238] sm:$0xff] %vm637_vm1, %v2269_v13  ;;  %v2708_v37 = vmax.f32 %v7602_v17, %v9332_v22  ;;  %v7934_v22 = vld [vmem:[#allocation2 + $0x2e0] sm:$0xff] }
 0x4ed   :  { %v4038_v5 = vpop.permute.xlu2 %4037 }
 0x4ee   :  { %v4040_v38 = vunpack.i.h.bf16 %v4038_v5  ;;  %v4039_v24 = vunpack.i.l.bf16 %v4038_v5  ;;  %v3389_v5 = vpack.c.bf16 %v3291_v52, %v3284_v11  ;;  %v7964_v52 = vld [vmem:[#allocation2 + $0x2d0] sm:$0xff] }
 0x4ef   :  { %4077 = vrot.lane.b32.xlu1 %v4076_v43, %s4285_s26  ;;  %v7926_v43 = vld [vmem:[#allocation2 + $0x2e8] sm:$0xff] }
 0x4f0   :  { %3613 = vmatpush.bf16.msra.mxu0 %v7748_v2  ;;  %v3228_v1 = vmax.f32 %v2708_v37, %v4039_v24  ;;  %v3229_v46 = vmax.f32 %v2709_v27, %v4040_v38  ;;  %v7930_v38 = vld [vmem:[#allocation2 + $0x260] sm:$0xff]  ;;  %v4071_v18 = vpack.i.bf16 %v7926_v43, %v7934_v22 }
 0x4f1   :  { %v2281_v50 = vpop.permute.xlu1 %2280  ;;  %v7904_v2 = vld [vmem:[#allocation2 + $0x2f0] sm:$0xff]  ;;  %3527 = vmatmul.bf16.gmra.mxu0 %v3389_v5  ;;  %v7968_v5 = vld [vmem:[#allocation2 + $0x240] sm:$0xff] }
 0x4f2   :  { %2515 = vst.msk [vmem:[#allocation2 + $0x268] sm:$0xff] %vm637_vm1, %v2281_v50  ;;  %v4056_v36 = vpack.i.bf16 %v7906_v20, %v7904_v2  ;;  %v3469_v17 = vpack.c.bf16 %v3229_v46, %v3228_v1  ;;  %v7948_v1 = vld [vmem:[#allocation2 + $0x258] sm:$0xff] }
 0x4f3   :  { %v2327_v16 = vpop.permute.xlu0 %2326 }
 0x4f4   :  { %3614 = vmatpush.bf16.msra.mxu0 %v7774_v57  ;;  %4057 = vrot.lane.b32.xlu0 %v4056_v36, %s4285_s26  ;;  %2538 = vst.msk [vmem:[#allocation2 + $0x320] sm:$0xff] %vm637_vm1, %v2327_v16  ;;  %v7916_v57 = vld [vmem:[#allocation2 + $0x1a8] sm:$0xff] }
 0x4f5   :  { %3661 = vmatpush.bf16.msrb.mxu3 %v3469_v17  ;;  %v4091_v13 = vpack.i.bf16 %v7916_v57, %v7911_v33  ;;  %v7962_v17 = vld [vmem:[#allocation2 + $0x248] sm:$0xff] }
 0x4f7   :  { %4092 = vrot.lane.b32.xlu1 %v4091_v13, %s4285_s26 }
 0x4f8   :  { %3615 = vmatpush.bf16.msra.mxu0 %v7802_v3 }
 0x4f9   :  { %v2275_v3 = vpop.permute.xlu1 %2274  ;;  %v7932_v24 = vld [vmem:[#allocation2 + $0x268] sm:$0xff] }
 0x4fa   :  { %2512 = vst.msk [vmem:[#allocation2 + $0x250] sm:$0xff] %vm637_vm1, %v2275_v3  ;;  %v4066_v37 = vpack.i.bf16 %v7932_v24, %v7930_v38  ;;  %v4096_v3 = vpack.i.bf16 %v7962_v17, %v7968_v5 }
 0x4fb   :  { %v2265_v27 = vpop.permute.xlu0 %2264 }
 0x4fc   :  { %3616 = vmatpush.bf16.msra.mxu0 %v7831_v9  ;;  %4067 = vrot.lane.b32.xlu2 %v4066_v37, %s4285_s26  ;;  %2507 = vst.msk [vmem:[#allocation2 + $0x228] sm:$0xff] %vm637_vm1, %v2265_v27 }
 0x4fd   :  { %4072 = vrot.lane.b32.xlu0 %v4071_v18, %s4285_s26  ;;  %v7978_v18 = vld [vmem:[#allocation2 + $0x198] sm:$0xff] }
 0x500   :  { %3617 = vmatpush.bf16.msra.mxu0 %v7853_v21  ;;  %v3271_v21 = vld [vmem:[%s8664_s1 + $0x8] sm:$0xff] }
 0x501   :  { %v2309_v9 = vpop.permute.xlu1 %2308  ;;  %v7946_v50 = vld [vmem:[#allocation2 + $0x250] sm:$0xff] }
 0x502   :  { %2529 = vst.msk [vmem:[#allocation2 + $0x2d8] sm:$0xff] %vm637_vm1, %v2309_v9  ;;  %v4081_v46 = vpack.i.bf16 %v7948_v1, %v7946_v50 }
 0x503   :  { %v2323_v36 = vpop.permute.xlu0 %2322 }
 0x504   :  { %3618 = vmatpush.bf16.msra.mxu0 %v7870_v35  ;;  %4082 = vrot.lane.b32.xlu2 %v4081_v46, %s4285_s26  ;;  %2536 = vst.msk [vmem:[#allocation2 + $0x310] sm:$0xff] %vm637_vm1, %v2323_v36  ;;  %v3278_v35 = vld [vmem:[%s8664_s1 + $0x40] sm:$0xff]  ;;  %v7982_v46 = vld [vmem:[#allocation2 + $0x2c8] sm:$0xff]  ;;  %v7984_v36 = vld [vmem:[#allocation2 + $0x190] sm:$0xff] }
 0x505   :  { %v3383_v16 = vpack.c.bf16 %v3278_v35, %v3271_v21  ;;  %v4111_v35 = vpack.i.bf16 %v7978_v18, %v7984_v36 }
 0x507   :  { %3571 = vmatmul.bf16.vlgmr.msrb.gmra.mxu0 %v3383_v16 }
 0x508   :  { %3619 = vmatpush.bf16.msra.mxu0 %v7758_v58 }
 0x509   :  { %v2303_v11 = vpop.permute.xlu1 %2302  ;;  %v7966_v13 = vld [vmem:[#allocation2 + $0x2d8] sm:$0xff] }
 0x50a   :  { %2526 = vst.msk [vmem:[#allocation2 + $0x2c0] sm:$0xff] %vm637_vm1, %v2303_v11  ;;  %v4086_v58 = vpack.i.bf16 %v7966_v13, %v7964_v52  ;;  %v7994_v11 = vld [vmem:[#allocation2 + $0x238] sm:$0xff] }
 0x50b   :  { %v2261_v37 = vpop.permute.xlu0 %2260 }
 0x50c   :  { %4087 = vrot.lane.b32.xlu0 %v4086_v58, %s4285_s26  ;;  %4097 = vrot.lane.b32.xlu2 %v4096_v3, %s4285_s26  ;;  %2505 = vst.msk [vmem:[#allocation2 + $0x218] sm:$0xff] %vm637_vm1, %v2261_v37  ;;  %v7996_v3 = vld [vmem:[#allocation2 + $0x330] sm:$0xff] }
 0x50d   :  { %9334 = vst [vmem:[#allocation116_spill] sm:$0xff] %v7996_v3 }
 0x511   :  { %v2333_v27 = vpop.permute.xlu1 %2332  ;;  %v7980_v9 = vld [vmem:[#allocation2 + $0x2c0] sm:$0xff] }
 0x512   :  { %2541 = vst.msk [vmem:[#allocation2 + $0x338] sm:$0xff] %vm637_vm1, %v2333_v27  ;;  %v4101_v21 = vpack.i.bf16 %v7982_v46, %v7980_v9  ;;  %v8000_v27 = vld [vmem:[#allocation2 + $0x230] sm:$0xff] }
 0x513   :  { %v2319_v16 = vpop.permute.xlu0 %2318 }
 0x514   :  { %4102 = vrot.lane.b32.xlu0 %v4101_v21, %s4285_s26  ;;  %4112 = vrot.lane.b32.xlu2 %v4111_v35, %s4285_s26  ;;  %2534 = vst.msk [vmem:[#allocation2 + $0x300] sm:$0xff] %vm637_vm1, %v2319_v16  ;;  %v4116_v21 = vpack.i.bf16 %v7994_v11, %v8000_v27  ;;  %v3298_v16 = vld [vmem:[%s8664_s1 + $0xe0] sm:$0xff] }
 0x519   :  { %v2299_v58 = vpop.permute.xlu1 %2298  ;;  %v7998_v37 = vld [vmem:[#allocation2 + $0x338] sm:$0xff] }
 0x51a   :  { %9335 = vst [vmem:[#allocation113_spill] sm:$0xff] %v7998_v37  ;;  %v4106_v7 = vpack.i.bf16 %v7998_v37, %v7996_v3  ;;  %v8039_v3 = vld [vmem:[#allocation2 + $0x228] sm:$0xff] }
 0x51b   :  { %2524 = vst.msk [vmem:[#allocation2 + $0x2b0] sm:$0xff] %vm637_vm1, %v2299_v58  ;;  %v2287_v35 = vpop.permute.xlu0 %2286  ;;  %v3305_v58 = vld [vmem:[%s8664_s1 + $0x118] sm:$0xff] }
 0x51c   :  { %4107 = vrot.lane.b32.xlu1 %v4106_v7, %s4285_s26  ;;  %4117 = vrot.lane.b32.xlu0 %v4116_v21, %s4285_s26  ;;  %2518 = vst.msk [vmem:[#allocation2 + $0x280] sm:$0xff] %vm637_vm1, %v2287_v35  ;;  %v3396_v28 = vpack.c.bf16 %v3305_v58, %v3298_v16  ;;  %v2724_v7 = vmax.f32 %v7792_v40, %v9338_v61 }
 0x51d   :  { %9341 = vst [vmem:[#allocation139_spill] sm:$0xff] %v8039_v3 }
 0x51e   :  { %3532 = vmatmul.bf16.vlgmr.msra.gmra.mxu3 %v3396_v28 }
 0x520   :  { %v4053_v21 = vpop.permute.xlu2 %4052 }
 0x521   :  { %v2329_v34 = vpop.permute.xlu1 %2328  ;;  %v4055_v4 = vunpack.i.h.bf16 %v4053_v21  ;;  %v4054_v19 = vunpack.i.l.bf16 %v4053_v21  ;;  %v2706_v21 = vmax.f32 %v7712_v45, %v9339_v48 }
 0x522   :  { %v8022_v35 = vld [vmem:[#allocation2 + $0x2b0] sm:$0xff]  ;;  %2539 = vst.msk [vmem:[#allocation2 + $0x328] sm:$0xff] %vm637_vm1, %v2329_v34 }
 0x523   :  { %v4121_v28 = vpack.i.bf16 %v8024_v47, %v8022_v35  ;;  %v3244_v61 = vmax.f32 %v2724_v7, %v4054_v19  ;;  %v3245_v40 = vmax.f32 %v2725_v12, %v4055_v4  ;;  %v4043_v16 = vpop.permute.xlu0 %4042  ;;  %v8041_v12 = vld [vmem:[#allocation2 + $0x320] sm:$0xff] }
 0x524   :  { %4132 = vrot.lane.b32.xlu0 %v4131_v25, %s4285_s26  ;;  %v4045_v58 = vunpack.i.h.bf16 %v4043_v16  ;;  %v4044_v37 = vunpack.i.l.bf16 %v4043_v16  ;;  %v8045_v25 = vld [vmem:[#allocation2 + $0x220] sm:$0xff]  ;;  %v8066_v16 = vld [vmem:[#allocation2 + $0x2a8] sm:$0xff] }
 0x525   :  { %4122 = vrot.lane.b32.xlu1 %v4121_v28, %s4285_s26  ;;  %v3477_v41 = vpack.c.bf16 %v3245_v40, %v3244_v61  ;;  %9342 = vst [vmem:[#allocation123_spill] sm:$0xff] %v8045_v25  ;;  %v4136_v15 = vpack.i.bf16 %v8039_v3, %v8045_v25  ;;  %v8062_v28 = vld [vmem:[#allocation2 + $0x210] sm:$0xff] }
 0x526   :  { %v3226_v34 = vmax.f32 %v2706_v21, %v4044_v37  ;;  %v3227_v49 = vmax.f32 %v2707_v14, %v4045_v58  ;;  %v8060_v37 = vld [vmem:[#allocation2 + $0x218] sm:$0xff]  ;;  %9344 = vst [vmem:[#allocation42_spill] sm:$0xff] %v8062_v28  ;;  %v8075_v14 = vld [vmem:[#allocation2 + $0x208] sm:$0xff] }
 0x527   :  { %3710 = vmatpush.bf16.msrb.mxu0 %v3477_v41  ;;  %9343 = vst [vmem:[#allocation134_spill] sm:$0xff] %v8060_v37  ;;  %v4151_v58 = vpack.i.bf16 %v8060_v37, %v8062_v28  ;;  %v8077_v41 = vld [vmem:[#allocation2 + $0x200] sm:$0xff]  ;;  %v9356_v37 = vld [vmem:[#allocation65_spill] sm:$0xff] }
 0x528   :  { %v3468_v4 = vpack.c.bf16 %v3227_v49, %v3226_v34  ;;  %v3312_v49 = vld [vmem:[%s8664_s1 + $0x150] sm:$0xff]  ;;  %9345 = vst [vmem:[#allocation128_spill] sm:$0xff] %v8066_v16 }
 0x529   :  { %v8043_v19 = vld [vmem:[#allocation2 + $0x328] sm:$0xff]  ;;  %v2295_v7 = vpop.permute.xlu1 %2294  ;;  %v3403_v48 = vpack.c.bf16 %v3319_v32, %v3312_v49  ;;  %9346 = vst [vmem:[#allocation131_spill] sm:$0xff] %v8075_v14  ;;  %v3306_v32 = vld [vmem:[%s8664_s1 + $0x120] sm:$0xff] }
 0x52a   :  { %v4126_v45 = vpack.i.bf16 %v8043_v19, %v8041_v12  ;;  %3662 = vmatpush.bf16.msrb.mxu3 %v3468_v4  ;;  %2522 = vst.msk [vmem:[#allocation2 + $0x2a0] sm:$0xff] %vm637_vm1, %v2295_v7  ;;  %v8079_v4 = vld [vmem:[#allocation2 + $0x310] sm:$0xff]  ;;  %v3299_v49 = vld [vmem:[%s8664_s1 + $0xe8] sm:$0xff] }
 0x52b   :  { %9347 = vst [vmem:[#allocation118_spill] sm:$0xff] %v8077_v41 }
 0x52c   :  { %4127 = vrot.lane.b32.xlu2 %v4126_v45, %s4285_s26  ;;  %9348 = vst [vmem:[#allocation126_spill] sm:$0xff] %v8079_v4  ;;  %v4166_v45 = vpack.i.bf16 %v8075_v14, %v8077_v41 }
 0x52d   :  { %4137 = vrot.lane.b32.xlu1 %v4136_v15, %s4285_s26 }
 0x52e   :  { %3537 = vmatmul.bf16.gmra.mxu3 %v3403_v48  ;;  %v3397_v48 = vpack.c.bf16 %v3306_v32, %v3299_v49  ;;  %v3307_v49 = vld [vmem:[%s8664_s1 + $0x128] sm:$0xff] }
 0x530   :  { %3581 = vmatmul.bf16.vlgmr.msra.gmra.mxu1 %v3397_v48  ;;  %v8116_v48 = vld [vmem:[#allocation2 + $0x300] sm:$0xff] }
 0x531   :  { %v2325_v61 = vpop.permute.xlu1 %2324  ;;  %v8064_v40 = vld [vmem:[#allocation2 + $0x2a0] sm:$0xff]  ;;  %9352 = vst [vmem:[#allocation62_spill] sm:$0xff] %v8116_v48 }
 0x532   :  { %2537 = vst.msk [vmem:[#allocation2 + $0x318] sm:$0xff] %vm637_vm1, %v2325_v61  ;;  %v4141_v21 = vpack.i.bf16 %v8066_v16, %v8064_v40  ;;  %v3326_v61 = vld [vmem:[%s8664_s1 + $0x1c0] sm:$0xff] }
 0x534   :  { %4142 = vrot.lane.b32.xlu2 %v4141_v21, %s4285_s26 }
 0x535   :  { %4152 = vrot.lane.b32.xlu1 %v4151_v58, %s4285_s26  ;;  %v3333_v58 = vld [vmem:[%s8664_s1 + $0x1f8] sm:$0xff] }
 0x539   :  { %v2291_v34 = vpop.permute.xlu1 %2290  ;;  %v8081_v7 = vld [vmem:[#allocation2 + $0x318] sm:$0xff] }
 0x53a   :  { %9349 = vst [vmem:[#allocation55_spill] sm:$0xff] %v8081_v7  ;;  %v4146_v15 = vpack.i.bf16 %v8081_v7, %v8079_v4  ;;  %v8104_v7 = vld [vmem:[#allocation2 + $0x298] sm:$0xff]  ;;  %v3410_v4 = vpack.c.bf16 %v3333_v58, %v3326_v61 }
 0x53b   :  { %2520 = vst.msk [vmem:[#allocation2 + $0x290] sm:$0xff] %vm637_vm1, %v2291_v34 }
 0x53c   :  { %4147 = vrot.lane.b32.xlu0 %v4146_v15, %s4285_s26  ;;  %9351 = vst [vmem:[#allocation54_spill] sm:$0xff] %v8104_v7  ;;  %v3300_v15 = vld [vmem:[%s8664_s1 + $0xf0] sm:$0xff] }
 0x53d   :  { %4167 = vrot.lane.b32.xlu1 %v4166_v45, %s4285_s26  ;;  %v3398_v58 = vpack.c.bf16 %v3307_v49, %v3300_v15  ;;  %v3340_v15 = vld [vmem:[%s8664_s1 + $0x230] sm:$0xff]  ;;  %v3347_v49 = vld [vmem:[%s8664_s1 + $0x268] sm:$0xff] }
 0x53e   :  { %3542 = vmatmul.bf16.gmra.mxu3 %v3410_v4 }
 0x53f   :  { %3630 = vmatmul.bf16.vlgmr.msra.gmra.mxu2 %v3398_v58  ;;  %v2705_v58 = vmax.f32 %v7865_v55, %v9356_v37 }
 0x541   :  { %v2321_v21 = vpop.permute.xlu1 %2320 }
 0x542   :  { %v8102_v34 = vld [vmem:[#allocation2 + $0x290] sm:$0xff]  ;;  %2535 = vst.msk [vmem:[#allocation2 + $0x308] sm:$0xff] %vm637_vm1, %v2321_v21  ;;  %v3313_v21 = vld [vmem:[%s8664_s1 + $0x158] sm:$0xff] }
 0x543   :  { %9350 = vst [vmem:[#allocation74_spill] sm:$0xff] %v8102_v34  ;;  %v4156_v45 = vpack.i.bf16 %v8104_v7, %v8102_v34  ;;  %v9359_v34 = vld [vmem:[#allocation40_spill] sm:$0xff] }
 0x544   :  { %v2703_v3 = vmax.f32 %v7878_v54, %v9359_v34  ;;  %v3361_v54 = vld [vmem:[%s8664_s1 + $0x2d8] sm:$0xff] }
 0x545   :  { %4157 = vrot.lane.b32.xlu2 %v4156_v45, %s4285_s26  ;;  %v3320_v45 = vld [vmem:[%s8664_s1 + $0x190] sm:$0xff] }
 0x546   :  { %v3404_v14 = vpack.c.bf16 %v3320_v45, %v3313_v21  ;;  %v9357_v45 = vld [vmem:[#allocation63_spill] sm:$0xff] }
 0x547   :  { %v2704_v28 = vmax.f32 %v7862_v60, %v9357_v45  ;;  %v3314_v60 = vld [vmem:[%s8664_s1 + $0x160] sm:$0xff]  ;;  %v2723_v45 = vmax.f32 %v7932_v24, %v7487_v59 }
 0x548   :  { %3586 = vmatmul.bf16.gmra.mxu1 %v3404_v14 }
 0x549   :  { %v2289_v32 = vpop.permute.xlu1 %2288  ;;  %v8118_v61 = vld [vmem:[#allocation2 + $0x308] sm:$0xff] }
 0x54a   :  { %9353 = vst [vmem:[#allocation80_spill] sm:$0xff] %v8118_v61  ;;  %v4161_v4 = vpack.i.bf16 %v8118_v61, %v8116_v48  ;;  %v8136_v48 = vld [vmem:[#allocation2 + $0x280] sm:$0xff] }
 0x54b   :  { %2519 = vst.msk [vmem:[#allocation2 + $0x288] sm:$0xff] %vm637_vm1, %v2289_v32  ;;  %v3417_v32 = vpack.c.bf16 %v3347_v49, %v3340_v15  ;;  %v3285_v15 = vld [vmem:[%s8664_s1 + $0x78] sm:$0xff]  ;;  %v3292_v49 = vld [vmem:[%s8664_s1 + $0xb0] sm:$0xff]  ;;  %vm3857_vm1 = vcmask 400384  }
 0x54c   :  { %4162 = vrot.lane.b32.xlu0 %v4161_v4, %s4285_s26  ;;  %9354 = vst [vmem:[#allocation143_spill] sm:$0xff] %v8136_v48 }
 0x54e   :  { %3547 = vmatmul.bf16.gmra.mxu3 %v3417_v32  ;;  %v3321_v32 = vld [vmem:[%s8664_s1 + $0x198] sm:$0xff] }
 0x551   :  { %v4048_v61 = vpop.permute.xlu1 %4047 }
 0x552   :  { %v8138_v41 = vld [vmem:[#allocation2 + $0x288] sm:$0xff]  ;;  %v4050_v21 = vunpack.i.h.bf16 %v4048_v61  ;;  %v4049_v4 = vunpack.i.l.bf16 %v4048_v61  ;;  %v3390_v61 = vpack.c.bf16 %v3292_v49, %v3285_v15  ;;  %v9358_v49 = vld [vmem:[#allocation59_spill] sm:$0xff] }
 0x553   :  { %9355 = vst [vmem:[#allocation138_spill] sm:$0xff] %v8138_v41  ;;  %v4171_v14 = vpack.i.bf16 %v8138_v41, %v8136_v48  ;;  %v2722_v41 = vmax.f32 %v7930_v38, %v7244_v42  ;;  %v3334_v42 = vld [vmem:[%s8664_s1 + $0x200] sm:$0xff]  ;;  %v3405_v38 = vpack.c.bf16 %v3321_v32, %v3314_v60  ;;  %v2702_v59 = vmax.f32 %v7882_v26, %v9358_v49 }
 0x554   :  { %v3224_v55 = vmax.f32 %v2704_v28, %v4049_v4  ;;  %v3225_v37 = vmax.f32 %v2705_v58, %v4050_v21  ;;  %v3327_v58 = vld [vmem:[%s8664_s1 + $0x1c8] sm:$0xff]  ;;  %3576 = vmatmul.bf16.gmra.mxu0 %v3390_v61  ;;  %v9360_v61 = vld [vmem:[#allocation106_spill] sm:$0xff]  ;;  %v2720_v60 = vmax.f32 %v7946_v50, %v7537_v39 }
 0x555   :  { %4172 = vrot.lane.b32.xlu2 %v4171_v14, %s4285_s26  ;;  %v3411_v24 = vpack.c.bf16 %v3334_v42, %v3327_v58  ;;  %3635 = vmatmul.bf16.gmra.mxu2 %v3405_v38  ;;  %v9361_v58 = vld [vmem:[#allocation34_spill] sm:$0xff] }
 0x556   :  { %v4068_v7 = vpop.permute.xlu2 %4067  ;;  %v3467_v28 = vpack.c.bf16 %v3225_v37, %v3224_v55  ;;  %v2700_v42 = vmax.f32 %v7890_v63, %v9361_v58  ;;  %v2718_v63 = vmax.f32 %v7968_v5, %v7211_v30  ;;  %v3335_v30 = vld [vmem:[%s8664_s1 + $0x208] sm:$0xff] }
 0x557   :  { %v4070_v48 = vunpack.i.h.bf16 %v4068_v7  ;;  %v4069_v14 = vunpack.i.l.bf16 %v4068_v7 }
 0x558   :  { %3663 = vmatpush.bf16.msrb.mxu3 %v3467_v28  ;;  %3591 = vmatmul.bf16.gmra.mxu1 %v3411_v24 }
 0x559   :  { %v3243_v21 = vmax.f32 %v2723_v45, %v4070_v48  ;;  %v3242_v4 = vmax.f32 %v2722_v41, %v4069_v14  ;;  %v4063_v15 = vpop.permute.xlu1 %4062  ;;  %v2721_v48 = vmax.f32 %v7948_v1, %v9360_v61  ;;  %v3354_v14 = vld [vmem:[%s8664_s1 + $0x2a0] sm:$0xff] }
 0x55a   :  { %v4065_v7 = vunpack.i.h.bf16 %v4063_v15  ;;  %v4064_v55 = vunpack.i.l.bf16 %v4063_v15 }
 0x55b   :  { %v3476_v37 = vpack.c.bf16 %v3243_v21, %v3242_v4  ;;  %v3272_v21 = vld [vmem:[%s8664_s1 + $0x10] sm:$0xff]  ;;  %v3279_v4 = vld [vmem:[%s8664_s1 + $0x48] sm:$0xff] }
 0x55c   :  { %v3222_v25 = vmax.f32 %v2702_v59, %v4064_v55  ;;  %v3223_v16 = vmax.f32 %v2703_v3, %v4065_v7  ;;  %v3424_v3 = vpack.c.bf16 %v3361_v54, %v3354_v14  ;;  %v3384_v59 = vpack.c.bf16 %v3279_v4, %v3272_v21 }
 0x55d   :  { %3711 = vmatpush.bf16.msrb.mxu0 %v3476_v37  ;;  %v2740_v55 = vmax.f32 %v7904_v2, %v7443_v23  ;;  %v9363_v37 = vld [vmem:[#allocation70_spill] sm:$0xff] }
 0x55e   :  { %v4083_v41 = vpop.permute.xlu2 %4082  ;;  %v3466_v45 = vpack.c.bf16 %v3223_v16, %v3222_v25  ;;  %v9362_v25 = vld [vmem:[#allocation57_spill] sm:$0xff]  ;;  %3552 = vmatmul.bf16.gmra.mxu3 %v3424_v3  ;;  %v2741_v61 = vmax.f32 %v7906_v20, %v9363_v37  ;;  %v9364_v3 = vld [vmem:[#allocation51_spill] sm:$0xff] }
 0x55f   :  { %v4085_v26 = vunpack.i.h.bf16 %v4083_v41  ;;  %v4084_v32 = vunpack.i.l.bf16 %v4083_v41  ;;  %v2701_v16 = vmax.f32 %v7892_v10, %v9362_v25  ;;  %v2719_v10 = vmax.f32 %v7962_v17, %v7369_v31  ;;  %v3341_v31 = vld [vmem:[%s8664_s1 + $0x238] sm:$0xff]  ;;  %v3348_v20 = vld [vmem:[%s8664_s1 + $0x270] sm:$0xff] }
 0x560   :  { %3664 = vmatpush.bf16.msrb.mxu3 %v3466_v45  ;;  %v3418_v58 = vpack.c.bf16 %v3348_v20, %v3341_v31 }
 0x561   :  { %v3241_v34 = vmax.f32 %v2721_v48, %v4085_v26  ;;  %v3240_v28 = vmax.f32 %v2720_v60, %v4084_v32  ;;  %v4078_v1 = vpop.permute.xlu1 %4077  ;;  %v3328_v32 = vld [vmem:[%s8664_s1 + $0x1d0] sm:$0xff] }
 0x562   :  { %v4080_v39 = vunpack.i.h.bf16 %v4078_v1  ;;  %v4079_v50 = vunpack.i.l.bf16 %v4078_v1  ;;  %v3412_v2 = vpack.c.bf16 %v3335_v30, %v3328_v32  ;;  %v3286_v32 = vld [vmem:[%s8664_s1 + $0x80] sm:$0xff]  ;;  %v3293_v30 = vld [vmem:[%s8664_s1 + $0xb8] sm:$0xff] }
 0x563   :  { %v3475_v38 = vpack.c.bf16 %v3241_v34, %v3240_v28  ;;  %v2698_v34 = vmax.f32 %v7911_v33, %v9364_v3  ;;  %v9365_v28 = vld [vmem:[#allocation53_spill] sm:$0xff]  ;;  %v3391_v31 = vpack.c.bf16 %v3293_v30, %v3286_v32 }
 0x564   :  { %v3220_v15 = vmax.f32 %v2700_v42, %v4079_v50  ;;  %v3221_v49 = vmax.f32 %v2701_v16, %v4080_v39  ;;  %3620 = vmatmul.bf16.vlgmr.msra.gmra.mxu0 %v3384_v59  ;;  %v2699_v1 = vmax.f32 %v7916_v57, %v9365_v28  ;;  %v9367_v59 = vld [vmem:[#allocation28_spill] sm:$0xff]  ;;  %v2737_v28 = vmax.f32 %v7966_v13, %v7575_v56 }
 0x565   :  { %3712 = vmatpush.bf16.msrb.mxu0 %v3475_v38  ;;  %3640 = vmatmul.bf16.gmra.mxu2 %v3412_v2  ;;  %v2697_v33 = vmax.f32 %v7978_v18, %v9367_v59  ;;  %v3368_v18 = vld [vmem:[%s8664_s1 + $0x310] sm:$0xff]  ;;  %v3349_v2 = vld [vmem:[%s8664_s1 + $0x278] sm:$0xff] }
 0x566   :  { %v4098_v24 = vpop.permute.xlu2 %4097  ;;  %v4058_v7 = vpop.permute.xlu0 %4057  ;;  %v3465_v23 = vpack.c.bf16 %v3221_v49, %v3220_v15  ;;  %v9366_v15 = vld [vmem:[#allocation47_spill] sm:$0xff] }
 0x567   :  { %v4100_v48 = vunpack.i.h.bf16 %v4098_v24  ;;  %v4099_v41 = vunpack.i.l.bf16 %v4098_v24  ;;  %v4060_v60 = vunpack.i.h.bf16 %v4058_v7  ;;  %v4059_v26 = vunpack.i.l.bf16 %v4058_v7 }
 0x568   :  { %3665 = vmatpush.bf16.msrb.mxu3 %v3465_v23  ;;  %v2696_v49 = vmax.f32 %v7984_v36, %v9366_v15  ;;  %v2739_v24 = vmax.f32 %v7926_v43, %v7291_v6  ;;  %3596 = vmatmul.bf16.gmra.mxu1 %v3418_v58  ;;  %v3342_v23 = vld [vmem:[%s8664_s1 + $0x240] sm:$0xff] }
 0x569   :  { %v3238_v17 = vmax.f32 %v2718_v63, %v4099_v41  ;;  %v3239_v5 = vmax.f32 %v2719_v10, %v4100_v48  ;;  %v3260_v45 = vmax.f32 %v2740_v55, %v4059_v26  ;;  %v3261_v14 = vmax.f32 %v2741_v61, %v4060_v60  ;;  %v4093_v54 = vpop.permute.xlu1 %4092  ;;  %v9368_v63 = vld [vmem:[#allocation76_spill] sm:$0xff] }
 0x56a   :  { %v4095_v42 = vunpack.i.h.bf16 %v4093_v54  ;;  %v4094_v39 = vunpack.i.l.bf16 %v4093_v54  ;;  %v2738_v57 = vmax.f32 %v7934_v22, %v9368_v63  ;;  %v3375_v22 = vld [vmem:[%s8664_s1 + $0x348] sm:$0xff]  ;;  %v3419_v20 = vpack.c.bf16 %v3349_v2, %v3342_v23  ;;  %v9369_v63 = vld [vmem:[#allocation26_spill] sm:$0xff]  ;;  %v9376_v23 = vld [vmem:[#allocation129_spill] sm:$0xff] }
 0x56b   :  { %v3474_v50 = vpack.c.bf16 %v3239_v5, %v3238_v17  ;;  %v3485_v38 = vpack.c.bf16 %v3261_v14, %v3260_v45  ;;  %v3431_v6 = vpack.c.bf16 %v3375_v22, %v3368_v18  ;;  %v3355_v17 = vld [vmem:[%s8664_s1 + $0x2a8] sm:$0xff]  ;;  %v3362_v5 = vld [vmem:[%s8664_s1 + $0x2e0] sm:$0xff] }
 0x56c   :  { %v3218_v25 = vmax.f32 %v2698_v34, %v4094_v39  ;;  %v3219_v16 = vmax.f32 %v2699_v1, %v4095_v42  ;;  %v3425_v45 = vpack.c.bf16 %v3362_v5, %v3355_v17  ;;  %v2736_v34 = vmax.f32 %v7964_v52, %v7335_v51 }
 0x56d   :  { %3713 = vmatpush.bf16.msrb.mxu0 %v3474_v50  ;;  %3759 = vmatpush.bf16.msrb.mxu1 %v3485_v38  ;;  %v2734_v38 = vmax.f32 %v7980_v9, %v7617_v0  ;;  %v2747_v51 = vmax.f32 %v8043_v19, %v7709_v53  ;;  %v3356_v0 = vld [vmem:[%s8664_s1 + $0x2b0] sm:$0xff] }
 0x56e   :  { %v4113_v21 = vpop.permute.xlu2 %4112  ;;  %v3464_v61 = vpack.c.bf16 %v3219_v16, %v3218_v25  ;;  %3557 = vmatmul.bf16.gmra.mxu3 %v3431_v6  ;;  %v2735_v25 = vmax.f32 %v7982_v46, %v7246_v29  ;;  %v2746_v16 = vmax.f32 %v8041_v12, %v7508_v62  ;;  %v3363_v29 = vld [vmem:[%s8664_s1 + $0x2e8] sm:$0xff]  ;;  %v3369_v62 = vld [vmem:[%s8664_s1 + $0x318] sm:$0xff]  ;;  %v3376_v9 = vld [vmem:[%s8664_s1 + $0x350] sm:$0xff] }
 0x56f   :  { %v4073_v4 = vpop.permute.xlu0 %4072  ;;  %v4115_v10 = vunpack.i.h.bf16 %v4113_v21  ;;  %v4114_v7 = vunpack.i.l.bf16 %v4113_v21  ;;  %v3426_v53 = vpack.c.bf16 %v3363_v29, %v3356_v0  ;;  %v3432_v19 = vpack.c.bf16 %v3376_v9, %v3369_v62  ;;  %v9382_v62 = vld [vmem:[#allocation38_spill] sm:$0xff] }
 0x570   :  { %v4075_v55 = vunpack.i.h.bf16 %v4073_v4  ;;  %v4074_v37 = vunpack.i.l.bf16 %v4073_v4  ;;  %3666 = vmatpush.bf16.msrb.mxu3 %v3464_v61  ;;  %v9372_v61 = vld [vmem:[#allocation113_spill] sm:$0xff] }
 0x571   :  { %v3216_v48 = vmax.f32 %v2696_v49, %v4114_v7  ;;  %v3217_v41 = vmax.f32 %v2697_v33, %v4115_v10  ;;  %v9370_v7 = vld [vmem:[#allocation116_spill] sm:$0xff] }
 0x572   :  { %v3258_v60 = vmax.f32 %v2738_v57, %v4074_v37  ;;  %v3259_v26 = vmax.f32 %v2739_v24, %v4075_v55  ;;  %v2716_v57 = vmax.f32 %v8000_v27, %v9369_v63  ;;  %v2717_v24 = vmax.f32 %v7994_v11, %v7465_v44  ;;  %v9371_v37 = vld [vmem:[#allocation94_spill] sm:$0xff]  ;;  %v9374_v11 = vld [vmem:[#allocation132_spill] sm:$0xff]  ;;  %v9384_v63 = vld [vmem:[#allocation25_spill] sm:$0xff] }
 0x573   :  { %v3463_v43 = vpack.c.bf16 %v3217_v41, %v3216_v48  ;;  %v2748_v55 = vmax.f32 %v9370_v7, %v7416_v8  ;;  %v2749_v48 = vmax.f32 %v9372_v61, %v9371_v37  ;;  %v9373_v44 = vld [vmem:[#allocation22_spill] sm:$0xff]  ;;  %v9386_v37 = vld [vmem:[#allocation119_spill] sm:$0xff] }
 0x574   :  { %v3484_v36 = vpack.c.bf16 %v3259_v26, %v3258_v60  ;;  %3625 = vmatmul.bf16.gmra.mxu0 %v3391_v31  ;;  %v2694_v8 = vmax.f32 %v9374_v11, %v9373_v44  ;;  %v9375_v31 = vld [vmem:[#allocation45_spill] sm:$0xff]  ;;  %v9387_v61 = vld [vmem:[#allocation74_spill] sm:$0xff]  ;;  %v9390_v44 = vld [vmem:[#allocation111_spill] sm:$0xff] }
 0x575   :  { %3667 = vmatpush.bf16.msrb.mxu3 %v3463_v43  ;;  %3645 = vmatmul.bf16.gmra.mxu2 %v3419_v20  ;;  %v2695_v2 = vmax.f32 %v9376_v23, %v9375_v31  ;;  %v9391_v11 = vld [vmem:[#allocation42_spill] sm:$0xff] }
 0x576   :  { %3760 = vmatpush.bf16.msrb.mxu1 %v3484_v36 }
 0x578   :  { %3601 = vmatmul.bf16.gmra.mxu1 %v3425_v45 }
 0x57e   :  { %v4088_v14 = vpop.permute.xlu0 %4087 }
 0x57f   :  { %v4090_v54 = vunpack.i.h.bf16 %v4088_v14  ;;  %v4089_v3 = vunpack.i.l.bf16 %v4088_v14  ;;  %v9377_v14 = vld [vmem:[#allocation50_spill] sm:$0xff] }
 0x581   :  { %v3256_v1 = vmax.f32 %v2736_v34, %v4089_v3  ;;  %v3257_v58 = vmax.f32 %v2737_v28, %v4090_v54  ;;  %v2732_v54 = vmax.f32 %v8022_v35, %v9377_v14  ;;  %v9378_v3 = vld [vmem:[#allocation43_spill] sm:$0xff]  ;;  %v9381_v35 = vld [vmem:[#allocation128_spill] sm:$0xff] }
 0x582   :  { %v2733_v34 = vmax.f32 %v8024_v47, %v9378_v3  ;;  %v3370_v28 = vld [vmem:[%s8664_s1 + $0x320] sm:$0xff]  ;;  %v3287_v14 = vld [vmem:[%s8664_s1 + $0x88] sm:$0xff] }
 0x583   :  { %v3483_v42 = vpack.c.bf16 %v3257_v58, %v3256_v1  ;;  %v3377_v1 = vld [vmem:[%s8664_s1 + $0x358] sm:$0xff] }
 0x585   :  { %3761 = vmatpush.bf16.msrb.mxu1 %v3483_v42  ;;  %3650 = vmatmul.bf16.gmra.mxu2 %v3426_v53  ;;  %v9383_v53 = vld [vmem:[#allocation123_spill] sm:$0xff] }
 0x586   :  { %v4128_v39 = vpop.permute.xlu2 %4127  ;;  %v4103_v50 = vpop.permute.xlu0 %4102  ;;  %v2714_v9 = vmax.f32 %v9383_v53, %v9382_v62 }
 0x587   :  { %v4130_v52 = vunpack.i.h.bf16 %v4128_v39  ;;  %v4129_v56 = vunpack.i.l.bf16 %v4128_v39  ;;  %v4105_v13 = vunpack.i.h.bf16 %v4103_v50  ;;  %v4104_v21 = vunpack.i.l.bf16 %v4103_v50 }
 0x588   :  { %3606 = vmatmul.bf16.gmra.mxu1 %v3432_v19 }
 0x589   :  { %v3254_v4 = vmax.f32 %v2734_v38, %v4104_v21  ;;  %v3255_v15 = vmax.f32 %v2735_v25, %v4105_v13  ;;  %v3266_v49 = vmax.f32 %v2746_v16, %v4129_v56  ;;  %v3267_v59 = vmax.f32 %v2747_v51, %v4130_v52  ;;  %v9379_v38 = vld [vmem:[#allocation100_spill] sm:$0xff]  ;;  %v9380_v16 = vld [vmem:[#allocation109_spill] sm:$0xff] }
 0x58a   :  { %v2730_v25 = vmax.f32 %v8064_v40, %v9379_v38  ;;  %v2731_v51 = vmax.f32 %v9381_v35, %v9380_v16  ;;  %v3433_v52 = vpack.c.bf16 %v3377_v1, %v3370_v28  ;;  %v9394_v28 = vld [vmem:[#allocation75_spill] sm:$0xff]  ;;  %v9395_v1 = vld [vmem:[#allocation118_spill] sm:$0xff] }
 0x58b   :  { %v3482_v46 = vpack.c.bf16 %v3255_v15, %v3254_v4  ;;  %v3488_v12 = vpack.c.bf16 %v3267_v59, %v3266_v49  ;;  %v3273_v4 = vld [vmem:[%s8664_s1 + $0x18] sm:$0xff]  ;;  %v3280_v15 = vld [vmem:[%s8664_s1 + $0x50] sm:$0xff]  ;;  %v9399_v16 = vld [vmem:[#allocation143_spill] sm:$0xff] }
 0x58c   :  { %v3385_v29 = vpack.c.bf16 %v3280_v15, %v3273_v4  ;;  %v9402_v4 = vld [vmem:[#allocation142_spill] sm:$0xff] }
 0x58d   :  { %3762 = vmatpush.bf16.msrb.mxu1 %v3482_v46  ;;  %v9403_v15 = vld [vmem:[#allocation138_spill] sm:$0xff] }
 0x58e   :  { %v4108_v33 = vpop.permute.xlu1 %4107  ;;  %v4118_v10 = vpop.permute.xlu0 %4117 }
 0x58f   :  { %v4110_v41 = vunpack.i.h.bf16 %v4108_v33  ;;  %v4109_v60 = vunpack.i.l.bf16 %v4108_v33  ;;  %v4120_v26 = vunpack.i.h.bf16 %v4118_v10  ;;  %v4119_v18 = vunpack.i.l.bf16 %v4118_v10  ;;  %v4143_v27 = vpop.permute.xlu2 %4142 }
 0x590   :  { %v4145_v20 = vunpack.i.h.bf16 %v4143_v27  ;;  %v4144_v17 = vunpack.i.l.bf16 %v4143_v27 }
 0x591   :  { %v3237_v22 = vmax.f32 %v2717_v24, %v4120_v26  ;;  %v3236_v6 = vmax.f32 %v2716_v57, %v4119_v18  ;;  %v3268_v43 = vmax.f32 %v2748_v55, %v4109_v60  ;;  %v3269_v36 = vmax.f32 %v2749_v48, %v4110_v41  ;;  %v9385_v57 = vld [vmem:[#allocation139_spill] sm:$0xff]  ;;  %v9388_v41 = vld [vmem:[#allocation88_spill] sm:$0xff]  ;;  %v9389_v60 = vld [vmem:[#allocation54_spill] sm:$0xff] }
 0x592   :  { %v3250_v40 = vmax.f32 %v2730_v25, %v4144_v17  ;;  %v3251_v0 = vmax.f32 %v2731_v51, %v4145_v20  ;;  %v2715_v24 = vmax.f32 %v9385_v57, %v9384_v63  ;;  %v2728_v48 = vmax.f32 %v9387_v61, %v9386_v37  ;;  %v9393_v20 = vld [vmem:[#allocation134_spill] sm:$0xff]  ;;  %v9398_v25 = vld [vmem:[#allocation117_spill] sm:$0xff]  ;;  %v9400_v51 = vld [vmem:[#allocation112_spill] sm:$0xff] }
 0x593   :  { %v3473_v32 = vpack.c.bf16 %v3237_v22, %v3236_v6  ;;  %v3489_v30 = vpack.c.bf16 %v3269_v36, %v3268_v43  ;;  %v2729_v26 = vmax.f32 %v9389_v60, %v9388_v41  ;;  %v2726_v35 = vmax.f32 %v9399_v16, %v9398_v25  ;;  %v3274_v63 = vld [vmem:[%s8664_s1 + $0x20] sm:$0xff]  ;;  %v3281_v57 = vld [vmem:[%s8664_s1 + $0x58] sm:$0xff]  ;;  %v3275_v37 = vld [vmem:[%s8664_s1 + $0x28] sm:$0xff] }
 0x594   :  { %v3480_v10 = vpack.c.bf16 %v3251_v0, %v3250_v40  ;;  %v9404_v0 = vld [vmem:[#allocation30_spill] sm:$0xff]  ;;  %v3282_v61 = vld [vmem:[%s8664_s1 + $0x60] sm:$0xff] }
 0x595   :  { %3714 = vmatpush.bf16.msrb.mxu0 %v3473_v32  ;;  %3812 = vmatpush.bf16.msrb.mxu2 %v3489_v30 }
 0x596   :  { %v4133_v45 = vpop.permute.xlu0 %4132  ;;  %3655 = vmatmul.bf16.gmra.mxu2 %v3433_v52  ;;  %v9401_v52 = vld [vmem:[#allocation126_spill] sm:$0xff] }
 0x597   :  { %v4123_v5 = vpop.permute.xlu1 %4122  ;;  %v4135_v39 = vunpack.i.h.bf16 %v4133_v45  ;;  %v4134_v50 = vunpack.i.l.bf16 %v4133_v45 }
 0x598   :  { %v4125_v58 = vunpack.i.h.bf16 %v4123_v5  ;;  %v4124_v42 = vunpack.i.l.bf16 %v4123_v5 }
 0x599   :  { %3813 = vmatpush.bf16.msrb.mxu2 %v3488_v12  ;;  %v3214_v47 = vmax.f32 %v2694_v8, %v4134_v50  ;;  %v3215_v56 = vmax.f32 %v2695_v2, %v4135_v39  ;;  %v2712_v8 = vmax.f32 %v9391_v11, %v9390_v44  ;;  %v9392_v2 = vld [vmem:[#allocation114_spill] sm:$0xff]  ;;  %v9397_v39 = vld [vmem:[#allocation131_spill] sm:$0xff]  ;;  %v8355_v11 = vpop.f32.mrf.mxu0 }
 0x59a   :  { %v3252_v13 = vmax.f32 %v2732_v54, %v4124_v42  ;;  %v3253_v21 = vmax.f32 %v2733_v34, %v4125_v58  ;;  %v2713_v17 = vmax.f32 %v9393_v20, %v9392_v2  ;;  %v3294_v54 = vld [vmem:[%s8664_s1 + $0xc0] sm:$0xff]  ;;  %v2710_v58 = vmax.f32 %v9395_v1, %v9394_v28  ;;  %v9396_v42 = vld [vmem:[#allocation44_spill] sm:$0xff]  ;;  %v9408_v2 = vld [vmem:[#allocation145_spill] sm:$0xff] }
 0x59b   :  { %v3462_v49 = vpack.c.bf16 %v3215_v56, %v3214_v47  ;;  %v3392_v34 = vpack.c.bf16 %v3294_v54, %v3287_v14  ;;  %v2711_v50 = vmax.f32 %v9397_v39, %v9396_v42  ;;  %v2744_v47 = vmax.f32 %v9401_v52, %v9400_v51  ;;  %v9409_v20 = vld [vmem:[#allocation80_spill] sm:$0xff]  ;;  %v3288_v14 = vld [vmem:[%s8664_s1 + $0x90] sm:$0xff]  ;;  %v3289_v1 = vld [vmem:[%s8664_s1 + $0x98] sm:$0xff] }
 0x59c   :  { %v3481_v59 = vpack.c.bf16 %v3253_v21, %v3252_v13  ;;  %v3276_v54 = vld [vmem:[%s8664_s1 + $0x30] sm:$0xff]  ;;  %v3283_v28 = vld [vmem:[%s8664_s1 + $0x68] sm:$0xff]  ;;  %v3322_v51 = vld [vmem:[%s8664_s1 + $0x1a0] sm:$0xff] }
 0x59d   :  { %3668 = vmatpush.bf16.msrb.mxu3 %v3462_v49  ;;  %v2727_v49 = vmax.f32 %v9403_v15, %v9402_v4  ;;  %v3388_v25 = vpack.c.bf16 %v3283_v28, %v3276_v54  ;;  %v3330_v28 = vld [vmem:[%s8664_s1 + $0x1e0] sm:$0xff] }
 0x59e   :  { %3763 = vmatpush.bf16.msrb.mxu1 %v3481_v59 }
 0x59f   :  { %v4138_v46 = vpop.permute.xlu1 %4137  ;;  %v4158_v12 = vpop.permute.xlu2 %4157 }
 0x5a0   :  { %v4140_v19 = vunpack.i.h.bf16 %v4138_v46  ;;  %v4139_v33 = vunpack.i.l.bf16 %v4138_v46  ;;  %v4160_v7 = vunpack.i.h.bf16 %v4158_v12  ;;  %v4159_v55 = vunpack.i.l.bf16 %v4158_v12  ;;  %3669 = vmatmul.bf16.vlgmr.msrb.gmra.mxu3 %v3385_v29  ;;  %v9405_v29 = vld [vmem:[#allocation55_spill] sm:$0xff] }
 0x5a1   :  { %v3533_v32 = vpop.f32.mrf.mxu3  ;;  %v2745_v62 = vmax.f32 %v9405_v29, %v9404_v0  ;;  %v8390_v52 = vpop.f32.mrf.mxu0  ;;  %v3290_v0 = vld [vmem:[%s8664_s1 + $0xa0] sm:$0xff]  ;;  %v3297_v29 = vld [vmem:[%s8664_s1 + $0xd8] sm:$0xff] }
 0x5a2   :  { %v3234_v18 = vmax.f32 %v2714_v9, %v4139_v33  ;;  %v3235_v22 = vmax.f32 %v2715_v24, %v4140_v19  ;;  %3764 = vmatpush.bf16.msrb.mxu1 %v3480_v10  ;;  %v3248_v6 = vmax.f32 %v2728_v48, %v4159_v55  ;;  %v3249_v43 = vmax.f32 %v2729_v26, %v4160_v7 }
 0x5a3   :  { %v3386_v26 = vpack.c.bf16 %v3281_v57, %v3274_v63 }
 0x5a4   :  { %v3472_v36 = vpack.c.bf16 %v3235_v22, %v3234_v18  ;;  %v3479_v27 = vpack.c.bf16 %v3249_v43, %v3248_v6  ;;  %v3387_v18 = vpack.c.bf16 %v3282_v61, %v3275_v37  ;;  %v3301_v22 = vld [vmem:[%s8664_s1 + $0xf8] sm:$0xff]  ;;  %v3308_v6 = vld [vmem:[%s8664_s1 + $0x130] sm:$0xff] }
 0x5a6   :  { %3715 = vmatpush.bf16.msrb.mxu0 %v3472_v36  ;;  %3765 = vmatpush.bf16.msrb.mxu1 %v3479_v27  ;;  %v3399_v27 = vpack.c.bf16 %v3308_v6, %v3301_v22  ;;  %v3311_v6 = vld [vmem:[%s8664_s1 + $0x148] sm:$0xff] }
 0x5a7   :  { %v4153_v30 = vpop.permute.xlu1 %4152 }
 0x5a8   :  { %v4155_v31 = vunpack.i.h.bf16 %v4153_v30  ;;  %v4154_v23 = vunpack.i.l.bf16 %v4153_v30 }
 0x5a9   :  { %v8331_v56 = vpop.f32.mrf.mxu3 }
 0x5aa   :  { %v3232_v5 = vmax.f32 %v2712_v8, %v4154_v23  ;;  %v3233_v45 = vmax.f32 %v2713_v17, %v4155_v31  ;;  %v9406_v8 = vld [vmem:[#allocation24_spill] sm:$0xff]  ;;  %v9407_v31 = vld [vmem:[#allocation62_spill] sm:$0xff]  ;;  %v2743_v17 = vmax.f32 %v9409_v20, %v9408_v2 }
 0x5ab   :  { %v2742_v23 = vmax.f32 %v9407_v31, %v9406_v8  ;;  %v3343_v20 = vld [vmem:[%s8664_s1 + $0x248] sm:$0xff] }
 0x5ac   :  { %v3471_v3 = vpack.c.bf16 %v3233_v45, %v3232_v5 }
 0x5ad   :  { %v3582_v36 = vpop.f32.mrf.mxu1 }
 0x5ae   :  { %3716 = vmatpush.bf16.msrb.mxu0 %v3471_v3  ;;  %v4148_v40 = vpop.permute.xlu0 %4147  ;;  %v3583_v30 = vadd.f32 %v3582_v36, %v3533_v32  ;;  %v3295_v32 = vld [vmem:[%s8664_s1 + $0xc8] sm:$0xff]  ;;  %v3324_v36 = vld [vmem:[%s8664_s1 + $0x1b0] sm:$0xff] }
 0x5af   :  { %v4168_v38 = vpop.permute.xlu1 %4167  ;;  %v4173_v59 = vpop.permute.xlu2 %4172  ;;  %v4150_v46 = vunpack.i.h.bf16 %v4148_v40  ;;  %v4149_v12 = vunpack.i.l.bf16 %v4148_v40  ;;  %v3309_v40 = vld [vmem:[%s8664_s1 + $0x138] sm:$0xff] }
 0x5b0   :  { %v4170_v13 = vunpack.i.h.bf16 %v4168_v38  ;;  %v4169_v21 = vunpack.i.l.bf16 %v4168_v38  ;;  %v4175_v53 = vunpack.i.h.bf16 %v4173_v59  ;;  %v4174_v9 = vunpack.i.l.bf16 %v4173_v59  ;;  %3674 = vmatmul.bf16.gmra.mxu3 %v3392_v34  ;;  %v3302_v59 = vld [vmem:[%s8664_s1 + $0x100] sm:$0xff] }
 0x5b1   :  { %v3264_v7 = vmax.f32 %v2744_v47, %v4149_v12  ;;  %v3265_v55 = vmax.f32 %v2745_v62, %v4150_v46  ;;  %v3538_v43 = vpop.f32.mrf.mxu3  ;;  %v3393_v38 = vpack.c.bf16 %v3295_v32, %v3288_v14  ;;  %v3303_v62 = vld [vmem:[%s8664_s1 + $0x108] sm:$0xff]  ;;  %v3400_v12 = vpack.c.bf16 %v3309_v40, %v3302_v59  ;;  %v3357_v59 = vld [vmem:[%s8664_s1 + $0x2b8] sm:$0xff]  ;;  %v3364_v40 = vld [vmem:[%s8664_s1 + $0x2f0] sm:$0xff] }
 0x5b2   :  { %v3231_v19 = vmax.f32 %v2711_v50, %v4170_v13  ;;  %v3230_v33 = vmax.f32 %v2710_v58, %v4169_v21  ;;  %v3247_v24 = vmax.f32 %v2727_v49, %v4175_v53  ;;  %v3246_v10 = vmax.f32 %v2726_v35, %v4174_v9  ;;  %v3296_v58 = vld [vmem:[%s8664_s1 + $0xd0] sm:$0xff]  ;;  %v3315_v35 = vld [vmem:[%s8664_s1 + $0x168] sm:$0xff]  ;;  %v3310_v53 = vld [vmem:[%s8664_s1 + $0x140] sm:$0xff]  ;;  %v8412_v9 = vpop.f32.mrf.mxu0 }
 0x5b3   :  { %v3487_v60 = vpack.c.bf16 %v3265_v55, %v3264_v7  ;;  %v3394_v16 = vpack.c.bf16 %v3296_v58, %v3289_v1  ;;  %v3406_v13 = vpack.c.bf16 %v3322_v51, %v3315_v35  ;;  %v3337_v1 = vld [vmem:[%s8664_s1 + $0x218] sm:$0xff]  ;;  %v3318_v58 = vld [vmem:[%s8664_s1 + $0x180] sm:$0xff] }
 0x5b4   :  { %v3470_v48 = vpack.c.bf16 %v3231_v19, %v3230_v33  ;;  %v3478_v41 = vpack.c.bf16 %v3247_v24, %v3246_v10  ;;  %v3395_v19 = vpack.c.bf16 %v3297_v29, %v3290_v0  ;;  %v3401_v33 = vpack.c.bf16 %v3310_v53, %v3303_v62  ;;  %v3329_v24 = vld [vmem:[%s8664_s1 + $0x1d8] sm:$0xff]  ;;  %v3336_v10 = vld [vmem:[%s8664_s1 + $0x210] sm:$0xff] }
 0x5b5   :  { %3814 = vmatpush.bf16.msrb.mxu2 %v3487_v60  ;;  %v8381_v39 = vpop.f32.mrf.mxu1  ;;  %v3413_v55 = vpack.c.bf16 %v3336_v10, %v3329_v24  ;;  %v3316_v60 = vld [vmem:[%s8664_s1 + $0x170] sm:$0xff]  ;;  %v3414_v35 = vpack.c.bf16 %v3337_v1, %v3330_v28  ;;  %v3427_v62 = vpack.c.bf16 %v3364_v40, %v3357_v59  ;;  %v3351_v24 = vld [vmem:[%s8664_s1 + $0x288] sm:$0xff]  ;;  %v3353_v28 = vld [vmem:[%s8664_s1 + $0x298] sm:$0xff] }
 0x5b6   :  { %3717 = vmatpush.bf16.msrb.mxu0 %v3470_v48  ;;  %3766 = vmatpush.bf16.msrb.mxu1 %v3478_v41  ;;  %v3332_v10 = vld [vmem:[%s8664_s1 + $0x1f0] sm:$0xff]  ;;  %v3359_v1 = vld [vmem:[%s8664_s1 + $0x2c8] sm:$0xff] }
 0x5b7   :  { %v3372_v40 = vld [vmem:[%s8664_s1 + $0x330] sm:$0xff] }
 0x5b9   :  { %3718 = vmatmul.bf16.vlgmr.msrb.gmra.mxu0 %v3386_v26  ;;  %3767 = vmatmul.bf16.vlgmr.msrb.gmra.mxu1 %v3387_v18  ;;  %v8379_v42 = vpop.f32.mrf.mxu3  ;;  %v3323_v26 = vld [vmem:[%s8664_s1 + $0x1a8] sm:$0xff]  ;;  %v3304_v18 = vld [vmem:[%s8664_s1 + $0x110] sm:$0xff] }
 0x5ba   :  { %v8425_v61 = vpop.f32.mrf.mxu0  ;;  %v3402_v8 = vpack.c.bf16 %v3311_v6, %v3304_v18 }
 0x5be   :  { %v4163_v44 = vpop.permute.xlu0 %4162 }
 0x5bf   :  { %v4165_v5 = vunpack.i.h.bf16 %v4163_v44  ;;  %v4164_v45 = vunpack.i.l.bf16 %v4163_v44 }
 0x5c0   :  { %3679 = vmatmul.bf16.gmra.mxu3 %v3399_v27 }
 0x5c1   :  { %v3263_v3 = vmax.f32 %v2743_v17, %v4165_v5  ;;  %v3262_v34 = vmax.f32 %v2742_v23, %v4164_v45  ;;  %v3543_v4 = vpop.f32.mrf.mxu3  ;;  %v3350_v17 = vld [vmem:[%s8664_s1 + $0x280] sm:$0xff] }
 0x5c2   :  { %v3631_v15 = vpop.f32.mrf.mxu2  ;;  %v8447_v23 = vpop.f32.mrf.mxu0  ;;  %v3420_v14 = vpack.c.bf16 %v3350_v17, %v3343_v20 }
 0x5c3   :  { %v3486_v50 = vpack.c.bf16 %v3263_v3, %v3262_v34  ;;  %v8392_v49 = vadd.f32 %v3631_v15, %v3583_v30  ;;  %v3407_v30 = vpack.c.bf16 %v3323_v26, %v3316_v60 }
 0x5c5   :  { %3815 = vmatpush.bf16.msrb.mxu2 %v3486_v50  ;;  %v3587_v47 = vpop.f32.mrf.mxu1  ;;  %v3325_v50 = vld [vmem:[%s8664_s1 + $0x1b8] sm:$0xff] }
 0x5c6   :  { %v3588_v21 = vadd.f32 %v3587_v47, %v3538_v43  ;;  %v3317_v43 = vld [vmem:[%s8664_s1 + $0x178] sm:$0xff]  ;;  %v3409_v47 = vpack.c.bf16 %v3325_v50, %v3318_v58  ;;  %v3366_v58 = vld [vmem:[%s8664_s1 + $0x300] sm:$0xff] }
 0x5c7   :  { %v3408_v31 = vpack.c.bf16 %v3324_v36, %v3317_v43 }
 0x5c8   :  { %3878 = vmatmul.msk.bf16.vlgmr.msrb.gmra.mxu2 %vm12_vm0, %v3388_v25  ;;  %v3338_v25 = vld [vmem:[%s8664_s1 + $0x220] sm:$0xff] }
 0x5c9   :  { %3723 = vmatmul.bf16.gmra.mxu0 %v3393_v38  ;;  %3772 = vmatmul.bf16.gmra.mxu1 %v3394_v16  ;;  %v3545_v63 = vpop.f32.mrf.mxu3  ;;  %v3331_v38 = vld [vmem:[%s8664_s1 + $0x1e8] sm:$0xff] }
 0x5ca   :  { %v8416_v57 = vpop.f32.mrf.mxu2  ;;  %v8460_v34 = vpop.f32.mrf.mxu0 }
 0x5cd   :  { %v8414_v46 = vpop.f32.mrf.mxu1 }
 0x5d0   :  { %3684 = vmatmul.bf16.gmra.mxu3 %v3406_v13  ;;  %v3415_v13 = vpack.c.bf16 %v3338_v25, %v3331_v38 }
 0x5d1   :  { %v3548_v22 = vpop.f32.mrf.mxu3 }
 0x5d2   :  { %v8489_v0 = vpop.f32.mrf.mxu0 }
 0x5d5   :  { %v3592_v7 = vpop.f32.mrf.mxu1 }
 0x5d6   :  { %v3593_v37 = vadd.f32 %v3592_v7, %v3543_v4  ;;  %v3339_v7 = vld [vmem:[%s8664_s1 + $0x228] sm:$0xff] }
 0x5d8   :  { %3879 = vmatmul.msk.bf16.gmra.mxu2 %vm12_vm0, %v3395_v19  ;;  %v3636_v48 = vpop.f32.mrf.mxu2 }
 0x5d9   :  { %3728 = vmatmul.bf16.gmra.mxu0 %v3400_v12  ;;  %3777 = vmatmul.bf16.gmra.mxu1 %v3401_v33  ;;  %v8427_v41 = vadd.f32 %v3636_v48, %v3588_v21  ;;  %v3550_v5 = vpop.f32.mrf.mxu3 }
 0x5da   :  { %v8511_v18 = vpop.f32.mrf.mxu0 }
 0x5dd   :  { %v3594_v27 = vpop.f32.mrf.mxu1 }
 0x5de   :  { %v3595_v44 = vadd.f32 %v3594_v27, %v3545_v63  ;;  %v3344_v63 = vld [vmem:[%s8664_s1 + $0x250] sm:$0xff]  ;;  %v3371_v27 = vld [vmem:[%s8664_s1 + $0x328] sm:$0xff] }
 0x5df   :  { %v3421_v60 = vpack.c.bf16 %v3351_v24, %v3344_v63 }
 0x5e0   :  { %3689 = vmatmul.bf16.gmra.mxu3 %v3413_v55  ;;  %v8449_v2 = vpop.f32.mrf.mxu2  ;;  %v3345_v55 = vld [vmem:[%s8664_s1 + $0x258] sm:$0xff] }
 0x5e1   :  { %v3553_v21 = vpop.f32.mrf.mxu3 }
 0x5e2   :  { %v3621_v17 = vpop.f32.mrf.mxu0 }
 0x5e5   :  { %v3597_v45 = vpop.f32.mrf.mxu1 }
 0x5e6   :  { %v3598_v32 = vadd.f32 %v3597_v45, %v3548_v22  ;;  %v3416_v22 = vpack.c.bf16 %v3339_v7, %v3332_v10 }
 0x5e8   :  { %3880 = vmatmul.msk.bf16.gmra.mxu2 %vm12_vm0, %v3402_v8  ;;  %v3641_v54 = vpop.f32.mrf.mxu2 }
 0x5e9   :  { %3733 = vmatmul.bf16.gmra.mxu0 %v3407_v30  ;;  %3782 = vmatmul.bf16.gmra.mxu1 %v3408_v31  ;;  %v8458_v3 = vadd.f32 %v3641_v54, %v3593_v37  ;;  %v3555_v12 = vpop.f32.mrf.mxu3  ;;  %v3352_v37 = vld [vmem:[%s8664_s1 + $0x290] sm:$0xff]  ;;  %v3378_v30 = vld [vmem:[%s8664_s1 + $0x360] sm:$0xff] }
 0x5ea   :  { %v3422_v6 = vpack.c.bf16 %v3352_v37, %v3345_v55  ;;  %v3434_v31 = vpack.c.bf16 %v3378_v30, %v3371_v27  ;;  %v3346_v54 = vld [vmem:[%s8664_s1 + $0x260] sm:$0xff] }
 0x5ed   :  { %v3599_v16 = vpop.f32.mrf.mxu1 }
 0x5ee   :  { %v3600_v51 = vadd.f32 %v3599_v16, %v3550_v5 }
 0x5f0   :  { %3694 = vmatmul.bf16.gmra.mxu3 %v3420_v14  ;;  %v3643_v4 = vpop.f32.mrf.mxu2  ;;  %v3358_v14 = vld [vmem:[%s8664_s1 + $0x2c0] sm:$0xff] }
 0x5f1   :  { %v8480_v15 = vadd.f32 %v3643_v4, %v3595_v44  ;;  %v3558_v44 = vpop.f32.mrf.mxu3 }
 0x5f5   :  { %v3602_v29 = vpop.f32.mrf.mxu1 }
 0x5f6   :  { %v3603_v53 = vadd.f32 %v3602_v29, %v3553_v21  ;;  %v3623_v21 = vpop.f32.mrf.mxu0  ;;  %v3379_v29 = vld [vmem:[%s8664_s1 + $0x368] sm:$0xff] }
 0x5f7   :  { %v3435_v10 = vpack.c.bf16 %v3379_v29, %v3372_v40 }
 0x5f8   :  { %3881 = vmatmul.msk.bf16.gmra.mxu2 %vm12_vm0, %v3409_v47  ;;  %v3646_v19 = vpop.f32.mrf.mxu2 }
 0x5f9   :  { %3738 = vmatmul.bf16.gmra.mxu0 %v3414_v35  ;;  %3787 = vmatmul.bf16.gmra.mxu1 %v3415_v13  ;;  %v8491_v33 = vadd.f32 %v3646_v19, %v3598_v32  ;;  %v3365_v32 = vld [vmem:[%s8664_s1 + $0x2f8] sm:$0xff]  ;;  %v3560_v50 = vpop.f32.mrf.mxu3  ;;  %v3423_v35 = vpack.c.bf16 %v3353_v28, %v3346_v54  ;;  %v3380_v19 = vld [vmem:[%s8664_s1 + $0x370] sm:$0xff] }
 0x5fa   :  { %v3428_v25 = vpack.c.bf16 %v3365_v32, %v3358_v14 }
 0x5fd   :  { %v3604_v48 = vpop.f32.mrf.mxu1 }
 0x5fe   :  { %v3605_v26 = vadd.f32 %v3604_v48, %v3555_v12  ;;  %v3373_v12 = vld [vmem:[%s8664_s1 + $0x338] sm:$0xff]  ;;  %v3626_v63 = vpop.f32.mrf.mxu0 }
 0x5ff   :  { %v3436_v55 = vpack.c.bf16 %v3380_v19, %v3373_v12  ;;  %v3580_v12 = vadd.f32 %v8511_v18, %v8425_v61 }
 0x600   :  { %3699 = vmatmul.bf16.gmra.mxu3 %v3427_v62  ;;  %v3648_v43 = vpop.f32.mrf.mxu2  ;;  %v3360_v62 = vld [vmem:[%s8664_s1 + $0x2d0] sm:$0xff] }
 0x601   :  { %v8513_v36 = vadd.f32 %v3648_v43, %v3600_v51  ;;  %v3429_v51 = vpack.c.bf16 %v3366_v58, %v3359_v1  ;;  %v3575_v1 = vadd.f32 %v8460_v34, %v8390_v52 }
 0x605   :  { %v3607_v8 = vpop.f32.mrf.mxu1 }
 0x606   :  { %v3608_v20 = vadd.f32 %v3607_v8, %v3558_v44 }
 0x608   :  { %3882 = vmatmul.msk.bf16.gmra.mxu2 %vm12_vm0, %v3416_v22  ;;  %v3651_v5 = vpop.f32.mrf.mxu2  ;;  %v3374_v22 = vld [vmem:[%s8664_s1 + $0x340] sm:$0xff] }
 0x609   :  { %3743 = vmatmul.bf16.gmra.mxu0 %v3421_v60  ;;  %3792 = vmatmul.bf16.gmra.mxu1 %v3422_v6  ;;  %v8522_v45 = vadd.f32 %v3651_v5, %v3603_v53  ;;  %v3367_v53 = vld [vmem:[%s8664_s1 + $0x308] sm:$0xff]  ;;  %v3628_v60 = vpop.f32.mrf.mxu0  ;;  %v3381_v6 = vld [vmem:[%s8664_s1 + $0x378] sm:$0xff] }
 0x60a   :  { %v3430_v7 = vpack.c.bf16 %v3367_v53, %v3360_v62  ;;  %v3437_v27 = vpack.c.bf16 %v3381_v6, %v3374_v22 }
 0x60d   :  { %v3609_v38 = vpop.f32.mrf.mxu1 }
 0x60e   :  { %v3610_v16 = vadd.f32 %v3609_v38, %v3560_v50  ;;  %v3624_v50 = vadd.f32 %v3623_v21, %v3575_v1 }
 0x610   :  { %3704 = vmatmul.bf16.gmra.mxu3 %v3434_v31  ;;  %v3653_v47 = vpop.f32.mrf.mxu2 }
 0x611   :  { %v8542_v13 = vadd.f32 %v3653_v47, %v3605_v26 }
 0x618   :  { %3883 = vmatmul.msk.bf16.gmra.mxu2 %vm12_vm0, %v3423_v35 }
 0x619   :  { %3748 = vmatmul.bf16.gmra.mxu0 %v3428_v25  ;;  %3797 = vmatmul.bf16.gmra.mxu1 %v3429_v51  ;;  %v3656_v4 = vpop.f32.mrf.mxu2 }
 0x61a   :  { %v8545_v59 = vadd.f32 %v3656_v4, %v3608_v20  ;;  %v3573_v20 = vadd.f32 %v8447_v23, %v8355_v11  ;;  %v3578_v11 = vadd.f32 %v8489_v0, %v8412_v9  ;;  %v3629_v9 = vadd.f32 %v3628_v60, %v3580_v12 }
 0x61c   :  { %v3622_v14 = vadd.f32 %v3621_v17, %v3573_v20  ;;  %v3627_v52 = vadd.f32 %v3626_v63, %v3578_v11 }
 0x621   :  { %v3658_v37 = vpop.f32.mrf.mxu2 }
 0x622   :  { %v8565_v48 = vadd.f32 %v3658_v37, %v3610_v16 }
 0x623   :  { %v3670_v24 = vpop.f32.mrf.mxu3 }
 0x624   :  { %v3671_v32 = vadd.f32 %v3670_v24, %v3622_v14 }
 0x628   :  { %3884 = vmatmul.msk.bf16.gmra.mxu2 %vm12_vm0, %v3430_v7 }
 0x629   :  { %3753 = vmatmul.bf16.gmra.mxu0 %v3435_v10  ;;  %3802 = vmatmul.bf16.gmra.mxu1 %v3436_v55 }
 0x62b   :  { %v3672_v26 = vpop.f32.mrf.mxu3 }
 0x62c   :  { %v3673_v35 = vadd.f32 %v3672_v26, %v3624_v50 }
 0x633   :  { %v3675_v44 = vpop.f32.mrf.mxu3 }
 0x634   :  { %v3676_v21 = vadd.f32 %v3675_v44, %v3627_v52 }
 0x636   :  { %v3719_v43 = vpop.f32.mrf.mxu0  ;;  %v3768_v30 = vpop.f32.mrf.mxu1 }
 0x637   :  { %v3720_v58 = vadd.f32 %v3719_v43, %v3671_v32 }
 0x638   :  { %3885 = vmatmul.msk.bf16.gmra.mxu2 %vm12_vm0, %v3437_v27  ;;  %v3585_v27 = vadd.f32 %v8381_v39, %v8331_v56 }
 0x639   :  { %v3769_v38 = vadd.f32 %v3768_v30, %v3720_v58 }
 0x63b   :  { %v3677_v5 = vpop.f32.mrf.mxu3 }
 0x63c   :  { %v3678_v63 = vadd.f32 %v3677_v5, %v3629_v9 }
 0x63e   :  { %v3721_v8 = vpop.f32.mrf.mxu0  ;;  %v3770_v31 = vpop.f32.mrf.mxu1 }
 0x63f   :  { %v3722_v23 = vadd.f32 %v3721_v8, %v3673_v35  ;;  %v3634_v8 = vadd.f32 %v8416_v57, %v3585_v27  ;;  %v3590_v57 = vadd.f32 %v8414_v46, %v8379_v42 }
 0x641   :  { %v3771_v34 = vadd.f32 %v3770_v31, %v3722_v23 }
 0x643   :  { %v3680_v25 = vpop.f32.mrf.mxu3 }
 0x644   :  { %v3681_v22 = vadd.f32 %v3680_v25, %v8392_v49 }
 0x646   :  { %v3724_v54 = vpop.f32.mrf.mxu0  ;;  %v3773_v28 = vpop.f32.mrf.mxu1 }
 0x647   :  { %v3725_v19 = vadd.f32 %v3724_v54, %v3676_v21 }
 0x649   :  { %v3774_v0 = vadd.f32 %v3773_v28, %v3725_v19 }
 0x64b   :  { %v3817_v16 = vpop.f32.mrf.mxu2  ;;  %v3682_v62 = vpop.f32.mrf.mxu3 }
 0x64c   :  { %v3818_v51 = vadd.f32 %v3817_v16, %v3769_v38  ;;  %v3683_v5 = vadd.f32 %v3682_v62, %v3634_v8  ;;  %v3639_v16 = vadd.f32 %v8449_v2, %v3590_v57 }
 0x64e   :  { %v3726_v47 = vpop.f32.mrf.mxu0  ;;  %v3775_v4 = vpop.f32.mrf.mxu1  ;;  %3858 = vst.msk [vmem:[%s8665_s2] sm:$0xff] %vm3857_vm1, %v3818_v51 }
 0x64f   :  { %v3727_v37 = vadd.f32 %v3726_v47, %v3678_v63 }
 0x651   :  { %v3776_v18 = vadd.f32 %v3775_v4, %v3727_v37 }
 0x653   :  { %v3819_v17 = vpop.f32.mrf.mxu2  ;;  %v3685_v61 = vpop.f32.mrf.mxu3 }
 0x654   :  { %v3820_v40 = vadd.f32 %v3819_v17, %v3771_v34  ;;  %v3686_v1 = vadd.f32 %v3685_v61, %v8427_v41 }
 0x656   :  { %v3729_v29 = vpop.f32.mrf.mxu0  ;;  %v3778_v53 = vpop.f32.mrf.mxu1  ;;  %3859 = vst.msk [vmem:[%s8665_s2 + $0x8] sm:$0xff] %vm3857_vm1, %v3820_v40 }
 0x657   :  { %v3730_v30 = vadd.f32 %v3729_v29, %v3681_v22 }
 0x659   :  { %v3779_v31 = vadd.f32 %v3778_v53, %v3730_v30 }
 0x65b   :  { %v3822_v24 = vpop.f32.mrf.mxu2  ;;  %v3687_v44 = vpop.f32.mrf.mxu3 }
 0x65c   :  { %v3823_v10 = vadd.f32 %v3822_v24, %v3774_v0  ;;  %v3688_v47 = vadd.f32 %v3687_v44, %v3639_v16 }
 0x65e   :  { %v3731_v7 = vpop.f32.mrf.mxu0  ;;  %v3780_v55 = vpop.f32.mrf.mxu1  ;;  %3860 = vst.msk [vmem:[%s8665_s2 + $0x10] sm:$0xff] %vm3857_vm1, %v3823_v10 }
 0x65f   :  { %v3732_v32 = vadd.f32 %v3731_v7, %v3683_v5 }
 0x661   :  { %v3781_v39 = vadd.f32 %v3780_v55, %v3732_v32 }
 0x663   :  { %v3824_v26 = vpop.f32.mrf.mxu2  ;;  %v3690_v54 = vpop.f32.mrf.mxu3 }
 0x664   :  { %v3825_v6 = vadd.f32 %v3824_v26, %v3776_v18  ;;  %v3691_v34 = vadd.f32 %v3690_v54, %v8458_v3 }
 0x666   :  { %v3734_v43 = vpop.f32.mrf.mxu0  ;;  %v3783_v60 = vpop.f32.mrf.mxu1  ;;  %3861 = vst.msk [vmem:[%s8665_s2 + $0x18] sm:$0xff] %vm3857_vm1, %v3825_v6 }
 0x667   :  { %v3735_v38 = vadd.f32 %v3734_v43, %v3686_v1 }
 0x669   :  { %v3784_v35 = vadd.f32 %v3783_v60, %v3735_v38 }
 0x66b   :  { %v3827_v20 = vpop.f32.mrf.mxu2  ;;  %v3692_v11 = vpop.f32.mrf.mxu3 }
 0x66c   :  { %v3828_v14 = vadd.f32 %v3827_v20, %v3779_v31  ;;  %v3693_v53 = vadd.f32 %v3692_v11, %v8480_v15 }
 0x66e   :  { %v3736_v49 = vpop.f32.mrf.mxu0  ;;  %3862 = vst.msk [vmem:[%s8665_s2 + $0x20] sm:$0xff] %vm3857_vm1, %v3828_v14  ;;  %v3785_v56 = vpop.f32.mrf.mxu1 }
 0x66f   :  { %v3737_v41 = vadd.f32 %v3736_v49, %v3688_v47 }
 0x671   :  { %v3786_v46 = vadd.f32 %v3785_v56, %v3737_v41 }
 0x673   :  { %v3829_v28 = vpop.f32.mrf.mxu2  ;;  %v3695_v2 = vpop.f32.mrf.mxu3 }
 0x674   :  { %v3830_v58 = vadd.f32 %v3829_v28, %v3781_v39  ;;  %v3696_v10 = vadd.f32 %v3695_v2, %v8491_v33 }
 0x676   :  { %v3739_v50 = vpop.f32.mrf.mxu0  ;;  %3863 = vst.msk [vmem:[%s8665_s2 + $0x28] sm:$0xff] %vm3857_vm1, %v3830_v58  ;;  %v3788_v25 = vpop.f32.mrf.mxu1 }
 0x677   :  { %v3740_v21 = vadd.f32 %v3739_v50, %v3691_v34 }
 0x679   :  { %v3789_v29 = vadd.f32 %v3788_v25, %v3740_v21 }
 0x67b   :  { %v3832_v51 = vpop.f32.mrf.mxu2  ;;  %v3697_v3 = vpop.f32.mrf.mxu3 }
 0x67c   :  { %v3833_v4 = vadd.f32 %v3832_v51, %v3784_v35  ;;  %v3698_v26 = vadd.f32 %v3697_v3, %v8513_v36 }
 0x67e   :  { %3864 = vst.msk [vmem:[%s8665_s2 + $0x30] sm:$0xff] %vm3857_vm1, %v3833_v4  ;;  %v3741_v42 = vpop.f32.mrf.mxu0  ;;  %v3790_v23 = vpop.f32.mrf.mxu1 }
 0x67f   :  { %v3742_v9 = vadd.f32 %v3741_v42, %v3693_v53 }
 0x681   :  { %v3791_v0 = vadd.f32 %v3790_v23, %v3742_v9 }
 0x683   :  { %v3834_v52 = vpop.f32.mrf.mxu2  ;;  %v3700_v61 = vpop.f32.mrf.mxu3 }
 0x684   :  { %v3835_v17 = vadd.f32 %v3834_v52, %v3786_v46  ;;  %v3701_v30 = vadd.f32 %v3700_v61, %v8522_v45 }
 0x686   :  { %3865 = vst.msk [vmem:[%s8665_s2 + $0x38] sm:$0xff] %vm3857_vm1, %v3835_v17  ;;  %v3744_v40 = vpop.f32.mrf.mxu0  ;;  %v3793_v19 = vpop.f32.mrf.mxu1 }
 0x687   :  { %v3745_v55 = vadd.f32 %v3744_v40, %v3696_v10 }
 0x689   :  { %v3794_v37 = vadd.f32 %v3793_v19, %v3745_v55 }
 0x68b   :  { %v3837_v62 = vpop.f32.mrf.mxu2  ;;  %v3702_v8 = vpop.f32.mrf.mxu3 }
 0x68c   :  { %v3838_v12 = vadd.f32 %v3837_v62, %v3789_v29  ;;  %v3703_v49 = vadd.f32 %v3702_v8, %v8542_v13 }
 0x68e   :  { %3866 = vst.msk [vmem:[%s8665_s2 + $0x40] sm:$0xff] %vm3857_vm1, %v3838_v12  ;;  %v3746_v24 = vpop.f32.mrf.mxu0  ;;  %v3795_v15 = vpop.f32.mrf.mxu1 }
 0x68f   :  { %v3747_v43 = vadd.f32 %v3746_v24, %v3698_v26 }
 0x691   :  { %v3796_v60 = vadd.f32 %v3795_v15, %v3747_v43 }
 0x693   :  { %v3839_v63 = vpop.f32.mrf.mxu2  ;;  %v3705_v45 = vpop.f32.mrf.mxu3 }
 0x694   :  { %v3840_v7 = vadd.f32 %v3839_v63, %v3791_v0  ;;  %v3706_v1 = vadd.f32 %v3705_v45, %v8545_v59 }
 0x696   :  { %3867 = vst.msk [vmem:[%s8665_s2 + $0x48] sm:$0xff] %vm3857_vm1, %v3840_v7  ;;  %v3749_v6 = vpop.f32.mrf.mxu0  ;;  %v3798_v33 = vpop.f32.mrf.mxu1 }
 0x697   :  { %v3750_v31 = vadd.f32 %v3749_v6, %v3701_v30 }
 0x699   :  { %v3799_v20 = vadd.f32 %v3798_v33, %v3750_v31 }
 0x69b   :  { %v3842_v18 = vpop.f32.mrf.mxu2  ;;  %v3707_v13 = vpop.f32.mrf.mxu3 }
 0x69c   :  { %v3843_v22 = vadd.f32 %v3842_v18, %v3794_v37  ;;  %v3708_v35 = vadd.f32 %v3707_v13, %v8565_v48 }
 0x69e   :  { %3868 = vst.msk [vmem:[%s8665_s2 + $0x50] sm:$0xff] %vm3857_vm1, %v3843_v22  ;;  %v3751_v36 = vpop.f32.mrf.mxu0  ;;  %v3800_v5 = vpop.f32.mrf.mxu1 }
 0x69f   :  { %v3752_v56 = vadd.f32 %v3751_v36, %v3703_v49 }
 0x6a1   :  { %v3801_v54 = vadd.f32 %v3800_v5, %v3752_v56 }
 0x6a3   :  { %v3844_v27 = vpop.f32.mrf.mxu2 }
 0x6a4   :  { %v3845_v44 = vadd.f32 %v3844_v27, %v3796_v60 }
 0x6a6   :  { %3869 = vst.msk [vmem:[%s8665_s2 + $0x58] sm:$0xff] %vm3857_vm1, %v3845_v44  ;;  %v3754_v39 = vpop.f32.mrf.mxu0  ;;  %v3803_v50 = vpop.f32.mrf.mxu1 }
 0x6a7   :  { %v3755_v57 = vadd.f32 %v3754_v39, %v3706_v1 }
 0x6a9   :  { %v3804_v38 = vadd.f32 %v3803_v50, %v3755_v57 }
 0x6ab   :  { %v3847_v14 = vpop.f32.mrf.mxu2 }
 0x6ac   :  { %v3848_v32 = vadd.f32 %v3847_v14, %v3799_v20 }
 0x6ae   :  { %3870 = vst.msk [vmem:[%s8665_s2 + $0x60] sm:$0xff] %vm3857_vm1, %v3848_v32  ;;  %v3756_v25 = vpop.f32.mrf.mxu0  ;;  %v3805_v59 = vpop.f32.mrf.mxu1 }
 0x6af   :  { %v3757_v47 = vadd.f32 %v3756_v25, %v3708_v35 }
 0x6b1   :  { %v3806_v4 = vadd.f32 %v3805_v59, %v3757_v47 }
 0x6b3   :  { %v3849_v28 = vpop.f32.mrf.mxu2 }
 0x6b4   :  { %v3850_v58 = vadd.f32 %v3849_v28, %v3801_v54 }
 0x6b6   :  { %3871 = vst.msk [vmem:[%s8665_s2 + $0x68] sm:$0xff] %vm3857_vm1, %v3850_v58 }
 0x6bb   :  { %v3852_v16 = vpop.f32.mrf.mxu2 }
 0x6bc   :  { %v3853_v51 = vadd.f32 %v3852_v16, %v3804_v38 }
 0x6be   :  { %3872 = vst.msk [vmem:[%s8665_s2 + $0x70] sm:$0xff] %vm3857_vm1, %v3853_v51 }
 0x6c3   :  { %v3854_v11 = vpop.f32.mrf.mxu2 }
 0x6c4   :  { %v3855_v41 = vadd.f32 %v3854_v11, %v3806_v4 }
 0x6c6   :  { %3873 = vst.msk [vmem:[%s8665_s2 + $0x78] sm:$0xff] %vm3857_vm1, %v3855_v41 }

</bundles_post_ra>
